<compile_context>
chip_gen: v7x
topology: tpu7x:2x2x1
jax: 0.10.0
libtpu: 0.0.40
codegen_flags: <defaults>
</compile_context>

<pallas_src>
import jax
import jax.numpy as jnp
from jax import lax
from jax.experimental import pallas as pl
from jax.experimental.pallas import tpu as pltpu


_TILE_M = 512  # rows per grid step; small enough for v7x (64 MiB VMEM), big enough to hide DMA


# ----------------------------- Pallas kernels ------------------------------

def _gemm_bias_relu_kernel(x_ref, w_ref, b_ref, o_ref):
    # x: (tm, K) bf16, w: (K, N) bf16, b: (1, N) f32 -> o = relu(x @ w + b), f32
    acc = jnp.dot(x_ref[...], w_ref[...], preferred_element_type=jnp.float32)
    o_ref[...] = jnp.maximum(acc + b_ref[...], 0.0)


def _conv_pool_relu_kernel(x_ref, w_ref, b_ref, o_ref):
    # x: (4, tm, K) bf16 — one GEMM slab per 2x2-pool position, shared weight.
    # o = relu(max_i(x_i @ w) + b)  ==  relu(maxpool(conv + b))
    w = w_ref[...]
    a0 = jnp.dot(x_ref[0], w, preferred_element_type=jnp.float32)
    a1 = jnp.dot(x_ref[1], w, preferred_element_type=jnp.float32)
    a2 = jnp.dot(x_ref[2], w, preferred_element_type=jnp.float32)
    a3 = jnp.dot(x_ref[3], w, preferred_element_type=jnp.float32)
    m = jnp.maximum(jnp.maximum(a0, a1), jnp.maximum(a2, a3))
    o_ref[...] = jnp.maximum(m + b_ref[...], 0.0)


def _merge_relu_kernel(x1_ref, x2_ref, w1_ref, w2_ref, b_ref, o_ref):
    # fused "concat + 1x1 conv": relu(x1 @ w1 + x2 @ w2 + b); the concat is never built.
    acc = jnp.dot(x1_ref[...], w1_ref[...], preferred_element_type=jnp.float32)
    acc = acc + jnp.dot(x2_ref[...], w2_ref[...], preferred_element_type=jnp.float32)
    o_ref[...] = jnp.maximum(acc + b_ref[...], 0.0)


# --------------------------- gridded call wrappers ---------------------------

def _m_tiling(M, tile_m=_TILE_M):
    """Return (padded_M, tile_m, grid_m) satisfying the (8,128) block rule."""
    if M <= tile_m:
        return M, M, 1                       # single block == full array dims
    gm = pl.cdiv(M, tile_m)
    return gm * tile_m, tile_m, gm


def _pad_rows(x, m_padded):
    m = x.shape[-2]
    if m == m_padded:
        return x
    pad = [(0, 0)] * x.ndim
    pad[-2] = (0, m_padded - m)
    return jnp.pad(x, pad)


_PARALLEL = pltpu.CompilerParams(dimension_semantics=("parallel",))


def gemm_bias_relu(x, w, b):
    M, K = x.shape
    N = w.shape[1]
    Mp, tm, gm = _m_tiling(M)
    xp = _pad_rows(x, Mp)
    out = pl.pallas_call(
        _gemm_bias_relu_kernel,
        out_shape=jax.ShapeDtypeStruct((Mp, N), jnp.float32),
        grid=(gm,),
        in_specs=[pl.BlockSpec((tm, K), lambda i: (i, 0)),
                  pl.BlockSpec((K, N), lambda i: (0, 0)),
                  pl.BlockSpec((1, N), lambda i: (0, 0))],
        out_specs=pl.BlockSpec((tm, N), lambda i: (i, 0)),
        compiler_params=_PARALLEL,
    )(xp, w, b)
    return out if Mp == M else out[:M]


def conv_pool_bias_relu(x4, w, b):
    # x4: (4, M, K)
    _, M, K = x4.shape
    N = w.shape[1]
    Mp, tm, gm = _m_tiling(M)
    xp = _pad_rows(x4, Mp)
    out = pl.pallas_call(
        _conv_pool_relu_kernel,
        out_shape=jax.ShapeDtypeStruct((Mp, N), jnp.float32),
        grid=(gm,),
        in_specs=[pl.BlockSpec((4, tm, K), lambda i: (0, i, 0)),
                  pl.BlockSpec((K, N), lambda i: (0, 0)),
                  pl.BlockSpec((1, N), lambda i: (0, 0))],
        out_specs=pl.BlockSpec((tm, N), lambda i: (i, 0)),
        compiler_params=_PARALLEL,
    )(xp, w, b)
    return out if Mp == M else out[:M]


def merge_bias_relu(x1, x2, w1, w2, b):
    M, K1 = x1.shape
    K2 = x2.shape[1]
    N = w1.shape[1]
    Mp, tm, gm = _m_tiling(M)
    x1p = _pad_rows(x1, Mp)
    x2p = _pad_rows(x2, Mp)
    out = pl.pallas_call(
        _merge_relu_kernel,
        out_shape=jax.ShapeDtypeStruct((Mp, N), jnp.float32),
        grid=(gm,),
        in_specs=[pl.BlockSpec((tm, K1), lambda i: (i, 0)),
                  pl.BlockSpec((tm, K2), lambda i: (i, 0)),
                  pl.BlockSpec((K1, N), lambda i: (0, 0)),
                  pl.BlockSpec((K2, N), lambda i: (0, 0)),
                  pl.BlockSpec((1, N), lambda i: (0, 0))],
        out_specs=pl.BlockSpec((tm, N), lambda i: (i, 0)),
        compiler_params=_PARALLEL,
    )(x1p, x2p, w1, w2, b)
    return out if Mp == M else out[:M]


# ------------------------------ layer wrappers -------------------------------

def conv2x2_s2_relu(x_nhwc, wm, b):
    # 2x2/stride-2 conv as a GEMM over non-overlapping im2col patches.
    B, H, W, C = x_nhwc.shape
    Ho, Wo = H // 2, W // 2
    x = x_nhwc.astype(jnp.bfloat16)
    patches = (x.reshape(B, Ho, 2, Wo, 2, C)
                 .transpose(0, 1, 3, 2, 4, 5)        # (B,Ho,Wo,kh,kw,C)
                 .reshape(B * Ho * Wo, 4 * C))
    out = gemm_bias_relu(patches, wm, b)
    return out.reshape(B, Ho, Wo, -1)


def conv2x2_s2_pool2x2_relu(x_nhwc, wm, b):
    # Fused conv(2x2,s2) + MaxPool2d(2,2) + relu.  Pooled output: (B, H/4, W/4, Cout).
    B, H, W, C = x_nhwc.shape
    Ho, Wo = H // 4, W // 4
    x = x_nhwc.astype(jnp.bfloat16)
    # h = 4*ho + 2*pi + ki ; w = 4*wo + 2*pj + kj   (pi,pj = pool pos, ki,kj = kernel pos)
    x = x.reshape(B, Ho, 2, 2, Wo, 2, 2, C)          # (B, ho, pi, ki, wo, pj, kj, C)
    x = x.transpose(2, 5, 0, 1, 4, 3, 6, 7)          # (pi, pj, B, ho, wo, ki, kj, C)
    patches = x.reshape(4, B * Ho * Wo, 4 * C)
    out = conv_pool_bias_relu(patches, wm, b)
    return out.reshape(B, Ho, Wo, -1)


def merge1x1_relu(x1_nhwc, x2_nhwc, w1, w2, b):
    B, H, W, C1 = x1_nhwc.shape
    C2 = x2_nhwc.shape[-1]
    M = B * H * W
    out = merge_bias_relu(x1_nhwc.astype(jnp.bfloat16).reshape(M, C1),
                          x2_nhwc.astype(jnp.bfloat16).reshape(M, C2),
                          w1, w2, b)
    return out.reshape(B, H, W, -1)


# --------------------------- parameter pre-packing ---------------------------

def pack_params(params):
    """One-time relayout of PyTorch-style weights into bf16 GEMM slabs."""
    packed = {}
    for name in ("cm1", "cm2", "cm3", "cm4"):
        w = params[name + "_w"]                       # (Cout, Cin, 2, 2)
        Cout, Cin, kh, kw = w.shape
        packed[name + "_w"] = (w.transpose(2, 3, 1, 0)
                                 .reshape(kh * kw * Cin, Cout)
                                 .astype(jnp.bfloat16))
        packed[name + "_b"] = params[name + "_b"].reshape(1, Cout).astype(jnp.float32)
    for i in range(4):
        w = params[f"merge{i}_w"]                     # (Cout, C1+C2, 1, 1)
        Cout = w.shape[0]
        warp_c = params[f"cm{i + 1}_w"].shape[0]      # channels of the warped feature
        c1 = w.shape[1] - warp_c                      # channels of in_list[i]
        wm = w[:, :, 0, 0]                            # (Cout, C1+C2)
        packed[f"merge{i}_w1"] = wm[:, :c1].T.astype(jnp.bfloat16)   # applied to in_list
        packed[f"merge{i}_w2"] = wm[:, c1:].T.astype(jnp.bfloat16)   # applied to warped feat
        packed[f"merge{i}_b"] = params[f"merge{i}_b"].reshape(1, Cout).astype(jnp.float32)
    return packed


# ----------------------------- model forward --------------------------------

def conv_model_forward(packed, warped_nchw, in_list_nchw):
    warped = jnp.transpose(warped_nchw, (0, 2, 3, 1))
    in_list = [jnp.transpose(t, (0, 2, 3, 1)) for t in in_list_nchw]

    cm1_out = conv2x2_s2_pool2x2_relu(warped, packed["cm1_w"], packed["cm1_b"])
    cm2_out = conv2x2_s2_relu(cm1_out, packed["cm2_w"], packed["cm2_b"])
    cm3_out = conv2x2_s2_relu(cm2_out, packed["cm3_w"], packed["cm3_b"])
    cm4_out = conv2x2_s2_relu(cm3_out, packed["cm4_w"], packed["cm4_b"])

    feats = [cm1_out, cm2_out, cm3_out, cm4_out]
    merged = []
    for i in range(4):
        y = merge1x1_relu(in_list[i], feats[i],
                          packed[f"merge{i}_w1"], packed[f"merge{i}_w2"],
                          packed[f"merge{i}_b"])
        merged.append(jnp.transpose(y, (0, 3, 1, 2)))  # back to NCHW
    return merged


# ----------------------------- pure-JAX reference ---------------------------

def _ref_conv(x, w, b, stride):
    y = lax.conv_general_dilated(
        x, w, (stride, stride), "VALID",
        dimension_numbers=("NCHW", "OIHW", "NCHW"),
        precision=lax.Precision.HIGHEST)
    return y + b[None, :, None, None]


def ref_forward(params, warped, in_list):
    relu = lambda t: jnp.maximum(t, 0.0)
    c1 = _ref_conv(warped, params["cm1_w"], params["cm1_b"], 2)
    c1 = lax.reduce_window(c1, -jnp.inf, lax.max, (1, 1, 2, 2), (1, 1, 2, 2), "VALID")
    cm1_out = relu(c1)
    cm2_out = relu(_ref_conv(cm1_out, params["cm2_w"], params["cm2_b"], 2))
    cm3_out = relu(_ref_conv(cm2_out, params["cm3_w"], params["cm3_b"], 2))
    cm4_out = relu(_ref_conv(cm3_out, params["cm4_w"], params["cm4_b"], 2))
    feats = [cm1_out, cm2_out, cm3_out, cm4_out]
    out = []
    for i in range(4):
        x = jnp.concatenate([in_list[i], feats[i]], axis=1)
        out.append(relu(_ref_conv(x, params[f"merge{i}_w"], params[f"merge{i}_b"], 1)))
    return out


# --------------------------------- main --------------------------------------

def init_params(key):
    specs = {
        "cm1": (48, 80, 2, 2), "cm2": (96, 48, 2, 2),
        "cm3": (192, 96, 2, 2), "cm4": (384, 192, 2, 2),
        "merge0": (48, 96, 1, 1), "merge1": (96, 192, 1, 1),
        "merge2": (192, 384, 1, 1), "merge3": (384, 768, 1, 1),
    }
    params = {}
    for name, shape in specs.items():
        key, kw, kb = jax.random.split(key, 3)
        params[name + "_w"] = 0.02 * jax.random.normal(kw, shape, dtype=jnp.float32)
        params[name + "_b"] = 0.01 * jax.random.normal(kb, (shape[0],), dtype=jnp.float32)
    return params


# TODO(synk): backbone (HRNet), Gaussian label smoothing and the MoE-label / loss
# bookkeeping of Baseline_Counter are training-time host logic, not implemented here.

if __name__ == "__main__":
    key = jax.random.PRNGKey(0)
    kp, kx, k0, k1, k2, k3 = jax.random.split(key, 6)
    params = init_params(kp)
    packed = pack_params(params)     # one-time weight relayout (bf16 GEMM layout)

    B, H, W = 2, 32, 32
    warped = jax.random.normal(kx, (B, 80, H, W), dtype=jnp.float32)
    in_list = [
        jax.random.normal(k0, (B, 48, H // 4, W // 4), dtype=jnp.float32),
        jax.random.normal(k1, (B, 96, H // 8, W // 8), dtype=jnp.float32),
        jax.random.normal(k2, (B, 192, H // 16, W // 16), dtype=jnp.float32),
        jax.random.normal(k3, (B, 384, H // 32, W // 32), dtype=jnp.float32),
    ]

    fwd = jax.jit(conv_model_forward)
    merged = jax.block_until_ready(fwd(packed, warped, in_list))

    ref = ref_forward(params, warped, in_list)
    for got, want in zip(merged, ref):
        assert got.shape == want.shape, (got.shape, want.shape)
        assert jnp.allclose(got, want, rtol=1e-2, atol=1e-2), "mismatch vs reference"

    print("KERNEL_OK")
</pallas_src>

<mosaic_0001>
module attributes {stable_mosaic.version = 11 : i64} {
  func.func @_conv_pool_relu_kernel(%arg0: i32, %arg1: memref<4x128x320xbf16, #tpu.memory_space<vmem>>, %arg2: memref<320x48xbf16, #tpu.memory_space<vmem>>, %arg3: memref<1x48xf32, #tpu.memory_space<vmem>>, %arg4: memref<128x48xf32, #tpu.memory_space<vmem>>) attributes {dimension_semantics = [#tpu.dimension_semantics<parallel>], iteration_bounds = array<i64: 1>, scalar_prefetch = 0 : i64, scratch_operands = 0 : i64, tpu.core_type = #tpu.core_type<tc>, window_params = [{transform_indices = @transform_0, window_bounds = array<i64: 4, 128, 320>}, {pipeline_mode = #tpu.pipeline_mode<synchronous>, transform_indices = @transform_1, window_bounds = array<i64: 320, 48>}, {pipeline_mode = #tpu.pipeline_mode<synchronous>, transform_indices = @transform_2, window_bounds = array<i64: 1, 48>}, {transform_indices = @transform_3, window_bounds = array<i64: 128, 48>}]} {
    %c0 = arith.constant 0 : index
    %c0_0 = arith.constant 0 : index
    %0 = vector.load %arg2[%c0, %c0_0] : memref<320x48xbf16, #tpu.memory_space<vmem>>, vector<320x48xbf16>
    %c0_1 = arith.constant 0 : index
    %c0_2 = arith.constant 0 : index
    %c0_3 = arith.constant 0 : index
    %1 = vector.load %arg1[%c0_1, %c0_2, %c0_3] : memref<4x128x320xbf16, #tpu.memory_space<vmem>>, vector<1x128x320xbf16>
    %2 = vector.shape_cast %1 : vector<1x128x320xbf16> to vector<128x320xbf16>
    %cst = arith.constant dense<0.000000e+00> : vector<128x48xf32>
    %3 = tpu.matmul %2, %0, %cst {dimension_numbers = #tpu.dot_dimension_numbers<[1], [0], [0], [1], [0, 0, 1, 1], [], []>} : vector<128x320xbf16>, vector<320x48xbf16>, vector<128x48xf32> -> vector<128x48xf32>
    %c1 = arith.constant 1 : index
    %c0_4 = arith.constant 0 : index
    %c0_5 = arith.constant 0 : index
    %4 = vector.load %arg1[%c1, %c0_4, %c0_5] : memref<4x128x320xbf16, #tpu.memory_space<vmem>>, vector<1x128x320xbf16>
    %5 = vector.shape_cast %4 : vector<1x128x320xbf16> to vector<128x320xbf16>
    %cst_6 = arith.constant dense<0.000000e+00> : vector<128x48xf32>
    %6 = tpu.matmul %5, %0, %cst_6 {dimension_numbers = #tpu.dot_dimension_numbers<[1], [0], [0], [1], [0, 0, 1, 1], [], []>} : vector<128x320xbf16>, vector<320x48xbf16>, vector<128x48xf32> -> vector<128x48xf32>
    %c2 = arith.constant 2 : index
    %c0_7 = arith.constant 0 : index
    %c0_8 = arith.constant 0 : index
    %7 = vector.load %arg1[%c2, %c0_7, %c0_8] : memref<4x128x320xbf16, #tpu.memory_space<vmem>>, vector<1x128x320xbf16>
    %8 = vector.shape_cast %7 : vector<1x128x320xbf16> to vector<128x320xbf16>
    %cst_9 = arith.constant dense<0.000000e+00> : vector<128x48xf32>
    %9 = tpu.matmul %8, %0, %cst_9 {dimension_numbers = #tpu.dot_dimension_numbers<[1], [0], [0], [1], [0, 0, 1, 1], [], []>} : vector<128x320xbf16>, vector<320x48xbf16>, vector<128x48xf32> -> vector<128x48xf32>
    %c3 = arith.constant 3 : index
    %c0_10 = arith.constant 0 : index
    %c0_11 = arith.constant 0 : index
    %10 = vector.load %arg1[%c3, %c0_10, %c0_11] : memref<4x128x320xbf16, #tpu.memory_space<vmem>>, vector<1x128x320xbf16>
    %11 = vector.shape_cast %10 : vector<1x128x320xbf16> to vector<128x320xbf16>
    %cst_12 = arith.constant dense<0.000000e+00> : vector<128x48xf32>
    %12 = tpu.matmul %11, %0, %cst_12 {dimension_numbers = #tpu.dot_dimension_numbers<[1], [0], [0], [1], [0, 0, 1, 1], [], []>} : vector<128x320xbf16>, vector<320x48xbf16>, vector<128x48xf32> -> vector<128x48xf32>
    %13 = arith.maximumf %3, %6 : vector<128x48xf32>
    %14 = arith.maximumf %9, %12 : vector<128x48xf32>
    %15 = arith.maximumf %13, %14 : vector<128x48xf32>
    %c0_13 = arith.constant 0 : index
    %c0_14 = arith.constant 0 : index
    %16 = vector.load %arg3[%c0_13, %c0_14] : memref<1x48xf32, #tpu.memory_space<vmem>>, vector<1x48xf32>
    %17 = vector.broadcast %16 : vector<1x48xf32> to vector<128x48xf32>
    %18 = arith.addf %15, %17 : vector<128x48xf32>
    %cst_15 = arith.constant 0.000000e+00 : f32
    %19 = vector.broadcast %cst_15 : f32 to vector<128x48xf32>
    %20 = arith.maximumf %18, %19 : vector<128x48xf32>
    %c0_16 = arith.constant 0 : index
    %c0_17 = arith.constant 0 : index
    %21 = vector.load %arg4[%c0_16, %c0_17] : memref<128x48xf32, #tpu.memory_space<vmem>>, vector<128x48xf32>
    tpu.vector_store %arg4[%c0_16, %c0_17], %20 {strides = array<i32>} : memref<128x48xf32, #tpu.memory_space<vmem>>, vector<128x48xf32>,
    return
  }
  func.func @transform_0(%arg0: i32) -> (i32, i32, i32) {
    %c0_i32 = arith.constant 0 : i32
    %c0_i32_0 = arith.constant 0 : i32
    %c0_i32_1 = arith.constant 0 : i32
    return %c0_i32, %arg0, %c0_i32_0 : i32, i32, i32
  }
  func.func @transform_1(%arg0: i32) -> (i32, i32) {
    %c0_i32 = arith.constant 0 : i32
    %c0_i32_0 = arith.constant 0 : i32
    %c0_i32_1 = arith.constant 0 : i32
    return %c0_i32, %c0_i32_0 : i32, i32
  }
  func.func @transform_2(%arg0: i32) -> (i32, i32) {
    %c0_i32 = arith.constant 0 : i32
    %c0_i32_0 = arith.constant 0 : i32
    %c0_i32_1 = arith.constant 0 : i32
    return %c0_i32, %c0_i32_0 : i32, i32
  }
  func.func @transform_3(%arg0: i32) -> (i32, i32) {
    %c0_i32 = arith.constant 0 : i32
    %c0_i32_0 = arith.constant 0 : i32
    return %arg0, %c0_i32 : i32, i32
  }
}

module attributes {stable_mosaic.version = 11 : i64} {
  func.func @_gemm_bias_relu_kernel(%arg0: i32, %arg1: memref<32x192xbf16, #tpu.memory_space<vmem>>, %arg2: memref<192x96xbf16, #tpu.memory_space<vmem>>, %arg3: memref<1x96xf32, #tpu.memory_space<vmem>>, %arg4: memref<32x96xf32, #tpu.memory_space<vmem>>) attributes {dimension_semantics = [#tpu.dimension_semantics<parallel>], iteration_bounds = array<i64: 1>, scalar_prefetch = 0 : i64, scratch_operands = 0 : i64, tpu.core_type = #tpu.core_type<tc>, window_params = [{transform_indices = @transform_0, window_bounds = array<i64: 32, 192>}, {pipeline_mode = #tpu.pipeline_mode<synchronous>, transform_indices = @transform_1, window_bounds = array<i64: 192, 96>}, {pipeline_mode = #tpu.pipeline_mode<synchronous>, transform_indices = @transform_2, window_bounds = array<i64: 1, 96>}, {transform_indices = @transform_3, window_bounds = array<i64: 32, 96>}]} {
    %c0 = arith.constant 0 : index
    %c0_0 = arith.constant 0 : index
    %0 = vector.load %arg1[%c0, %c0_0] : memref<32x192xbf16, #tpu.memory_space<vmem>>, vector<32x192xbf16>
    %c0_1 = arith.constant 0 : index
    %c0_2 = arith.constant 0 : index
    %1 = vector.load %arg2[%c0_1, %c0_2] : memref<192x96xbf16, #tpu.memory_space<vmem>>, vector<192x96xbf16>
    %cst = arith.constant dense<0.000000e+00> : vector<32x96xf32>
    %2 = tpu.matmul %0, %1, %cst {dimension_numbers = #tpu.dot_dimension_numbers<[1], [0], [0], [1], [0, 0, 1, 1], [], []>} : vector<32x192xbf16>, vector<192x96xbf16>, vector<32x96xf32> -> vector<32x96xf32>
    %c0_3 = arith.constant 0 : index
    %c0_4 = arith.constant 0 : index
    %3 = vector.load %arg3[%c0_3, %c0_4] : memref<1x96xf32, #tpu.memory_space<vmem>>, vector<1x96xf32>
    %4 = vector.broadcast %3 : vector<1x96xf32> to vector<32x96xf32>
    %5 = arith.addf %2, %4 : vector<32x96xf32>
    %cst_5 = arith.constant 0.000000e+00 : f32
    %6 = vector.broadcast %cst_5 : f32 to vector<32x96xf32>
    %7 = arith.maximumf %5, %6 : vector<32x96xf32>
    %c0_6 = arith.constant 0 : index
    %c0_7 = arith.constant 0 : index
    %8 = vector.load %arg4[%c0_6, %c0_7] : memref<32x96xf32, #tpu.memory_space<vmem>>, vector<32x96xf32>
    tpu.vector_store %arg4[%c0_6, %c0_7], %7 {strides = array<i32>} : memref<32x96xf32, #tpu.memory_space<vmem>>, vector<32x96xf32>,
    return
  }
  func.func @transform_0(%arg0: i32) -> (i32, i32) {
    %c0_i32 = arith.constant 0 : i32
    %c0_i32_0 = arith.constant 0 : i32
    return %arg0, %c0_i32 : i32, i32
  }
  func.func @transform_1(%arg0: i32) -> (i32, i32) {
    %c0_i32 = arith.constant 0 : i32
    %c0_i32_0 = arith.constant 0 : i32
    %c0_i32_1 = arith.constant 0 : i32
    return %c0_i32, %c0_i32_0 : i32, i32
  }
  func.func @transform_2(%arg0: i32) -> (i32, i32) {
    %c0_i32 = arith.constant 0 : i32
    %c0_i32_0 = arith.constant 0 : i32
    %c0_i32_1 = arith.constant 0 : i32
    return %c0_i32, %c0_i32_0 : i32, i32
  }
  func.func @transform_3(%arg0: i32) -> (i32, i32) {
    %c0_i32 = arith.constant 0 : i32
    %c0_i32_0 = arith.constant 0 : i32
    return %arg0, %c0_i32 : i32, i32
  }
}

module attributes {stable_mosaic.version = 11 : i64} {
  func.func @_gemm_bias_relu_kernel(%arg0: i32, %arg1: memref<8x384xbf16, #tpu.memory_space<vmem>>, %arg2: memref<384x192xbf16, #tpu.memory_space<vmem>>, %arg3: memref<1x192xf32, #tpu.memory_space<vmem>>, %arg4: memref<8x192xf32, #tpu.memory_space<vmem>>) attributes {dimension_semantics = [#tpu.dimension_semantics<parallel>], iteration_bounds = array<i64: 1>, scalar_prefetch = 0 : i64, scratch_operands = 0 : i64, tpu.core_type = #tpu.core_type<tc>, window_params = [{transform_indices = @transform_0, window_bounds = array<i64: 8, 384>}, {pipeline_mode = #tpu.pipeline_mode<synchronous>, transform_indices = @transform_1, window_bounds = array<i64: 384, 192>}, {pipeline_mode = #tpu.pipeline_mode<synchronous>, transform_indices = @transform_2, window_bounds = array<i64: 1, 192>}, {transform_indices = @transform_3, window_bounds = array<i64: 8, 192>}]} {
    %c0 = arith.constant 0 : index
    %c0_0 = arith.constant 0 : index
    %0 = vector.load %arg1[%c0, %c0_0] : memref<8x384xbf16, #tpu.memory_space<vmem>>, vector<8x384xbf16>
    %c0_1 = arith.constant 0 : index
    %c0_2 = arith.constant 0 : index
    %1 = vector.load %arg2[%c0_1, %c0_2] : memref<384x192xbf16, #tpu.memory_space<vmem>>, vector<384x192xbf16>
    %cst = arith.constant dense<0.000000e+00> : vector<8x192xf32>
    %2 = tpu.matmul %0, %1, %cst {dimension_numbers = #tpu.dot_dimension_numbers<[1], [0], [0], [1], [0, 0, 1, 1], [], []>} : vector<8x384xbf16>, vector<384x192xbf16>, vector<8x192xf32> -> vector<8x192xf32>
    %c0_3 = arith.constant 0 : index
    %c0_4 = arith.constant 0 : index
    %3 = vector.load %arg3[%c0_3, %c0_4] : memref<1x192xf32, #tpu.memory_space<vmem>>, vector<1x192xf32>
    %4 = vector.broadcast %3 : vector<1x192xf32> to vector<8x192xf32>
    %5 = arith.addf %2, %4 : vector<8x192xf32>
    %cst_5 = arith.constant 0.000000e+00 : f32
    %6 = vector.broadcast %cst_5 : f32 to vector<8x192xf32>
    %7 = arith.maximumf %5, %6 : vector<8x192xf32>
    %c0_6 = arith.constant 0 : index
    %c0_7 = arith.constant 0 : index
    %8 = vector.load %arg4[%c0_6, %c0_7] : memref<8x192xf32, #tpu.memory_space<vmem>>, vector<8x192xf32>
    tpu.vector_store %arg4[%c0_6, %c0_7], %7 {strides = array<i32>} : memref<8x192xf32, #tpu.memory_space<vmem>>, vector<8x192xf32>,
    return
  }
  func.func @transform_0(%arg0: i32) -> (i32, i32) {
    %c0_i32 = arith.constant 0 : i32
    %c0_i32_0 = arith.constant 0 : i32
    return %arg0, %c0_i32 : i32, i32
  }
  func.func @transform_1(%arg0: i32) -> (i32, i32) {
    %c0_i32 = arith.constant 0 : i32
    %c0_i32_0 = arith.constant 0 : i32
    %c0_i32_1 = arith.constant 0 : i32
    return %c0_i32, %c0_i32_0 : i32, i32
  }
  func.func @transform_2(%arg0: i32) -> (i32, i32) {
    %c0_i32 = arith.constant 0 : i32
    %c0_i32_0 = arith.constant 0 : i32
    %c0_i32_1 = arith.constant 0 : i32
    return %c0_i32, %c0_i32_0 : i32, i32
  }
  func.func @transform_3(%arg0: i32) -> (i32, i32) {
    %c0_i32 = arith.constant 0 : i32
    %c0_i32_0 = arith.constant 0 : i32
    return %arg0, %c0_i32 : i32, i32
  }
}

module attributes {stable_mosaic.version = 11 : i64} {
  func.func @_merge_relu_kernel(%arg0: i32, %arg1: memref<8x192xbf16, #tpu.memory_space<vmem>>, %arg2: memref<8x192xbf16, #tpu.memory_space<vmem>>, %arg3: memref<192x192xbf16, #tpu.memory_space<vmem>>, %arg4: memref<192x192xbf16, #tpu.memory_space<vmem>>, %arg5: memref<1x192xf32, #tpu.memory_space<vmem>>, %arg6: memref<8x192xf32, #tpu.memory_space<vmem>>) attributes {dimension_semantics = [#tpu.dimension_semantics<parallel>], iteration_bounds = array<i64: 1>, scalar_prefetch = 0 : i64, scratch_operands = 0 : i64, tpu.core_type = #tpu.core_type<tc>, window_params = [{transform_indices = @transform_0, window_bounds = array<i64: 8, 192>}, {transform_indices = @transform_1, window_bounds = array<i64: 8, 192>}, {pipeline_mode = #tpu.pipeline_mode<synchronous>, transform_indices = @transform_2, window_bounds = array<i64: 192, 192>}, {pipeline_mode = #tpu.pipeline_mode<synchronous>, transform_indices = @transform_3, window_bounds = array<i64: 192, 192>}, {pipeline_mode = #tpu.pipeline_mode<synchronous>, transform_indices = @transform_4, window_bounds = array<i64: 1, 192>}, {transform_indices = @transform_5, window_bounds = array<i64: 8, 192>}]} {
    %c0 = arith.constant 0 : index
    %c0_0 = arith.constant 0 : index
    %0 = vector.load %arg1[%c0, %c0_0] : memref<8x192xbf16, #tpu.memory_space<vmem>>, vector<8x192xbf16>
    %c0_1 = arith.constant 0 : index
    %c0_2 = arith.constant 0 : index
    %1 = vector.load %arg3[%c0_1, %c0_2] : memref<192x192xbf16, #tpu.memory_space<vmem>>, vector<192x192xbf16>
    %cst = arith.constant dense<0.000000e+00> : vector<8x192xf32>
    %2 = tpu.matmul %0, %1, %cst {dimension_numbers = #tpu.dot_dimension_numbers<[1], [0], [0], [1], [0, 0, 1, 1], [], []>} : vector<8x192xbf16>, vector<192x192xbf16>, vector<8x192xf32> -> vector<8x192xf32>
    %c0_3 = arith.constant 0 : index
    %c0_4 = arith.constant 0 : index
    %3 = vector.load %arg2[%c0_3, %c0_4] : memref<8x192xbf16, #tpu.memory_space<vmem>>, vector<8x192xbf16>
    %c0_5 = arith.constant 0 : index
    %c0_6 = arith.constant 0 : index
    %4 = vector.load %arg4[%c0_5, %c0_6] : memref<192x192xbf16, #tpu.memory_space<vmem>>, vector<192x192xbf16>
    %cst_7 = arith.constant dense<0.000000e+00> : vector<8x192xf32>
    %5 = tpu.matmul %3, %4, %cst_7 {dimension_numbers = #tpu.dot_dimension_numbers<[1], [0], [0], [1], [0, 0, 1, 1], [], []>} : vector<8x192xbf16>, vector<192x192xbf16>, vector<8x192xf32> -> vector<8x192xf32>
    %6 = arith.addf %2, %5 : vector<8x192xf32>
    %c0_8 = arith.constant 0 : index
    %c0_9 = arith.constant 0 : index
    %7 = vector.load %arg5[%c0_8, %c0_9] : memref<1x192xf32, #tpu.memory_space<vmem>>, vector<1x192xf32>
    %8 = vector.broadcast %7 : vector<1x192xf32> to vector<8x192xf32>
    %9 = arith.addf %6, %8 : vector<8x192xf32>
    %cst_10 = arith.constant 0.000000e+00 : f32
    %10 = vector.broadcast %cst_10 : f32 to vector<8x192xf32>
    %11 = arith.maximumf %9, %10 : vector<8x192xf32>
    %c0_11 = arith.constant 0 : index
    %c0_12 = arith.constant 0 : index
    %12 = vector.load %arg6[%c0_11, %c0_12] : memref<8x192xf32, #tpu.memory_space<vmem>>, vector<8x192xf32>
    tpu.vector_store %arg6[%c0_11, %c0_12], %11 {strides = array<i32>} : memref<8x192xf32, #tpu.memory_space<vmem>>, vector<8x192xf32>,
    return
  }
  func.func @transform_0(%arg0: i32) -> (i32, i32) {
    %c0_i32 = arith.constant 0 : i32
    %c0_i32_0 = arith.constant 0 : i32
    return %arg0, %c0_i32 : i32, i32
  }
  func.func @transform_1(%arg0: i32) -> (i32, i32) {
    %c0_i32 = arith.constant 0 : i32
    %c0_i32_0 = arith.constant 0 : i32
    return %arg0, %c0_i32 : i32, i32
  }
  func.func @transform_2(%arg0: i32) -> (i32, i32) {
    %c0_i32 = arith.constant 0 : i32
    %c0_i32_0 = arith.constant 0 : i32
    %c0_i32_1 = arith.constant 0 : i32
    return %c0_i32, %c0_i32_0 : i32, i32
  }
  func.func @transform_3(%arg0: i32) -> (i32, i32) {
    %c0_i32 = arith.constant 0 : i32
    %c0_i32_0 = arith.constant 0 : i32
    %c0_i32_1 = arith.constant 0 : i32
    return %c0_i32, %c0_i32_0 : i32, i32
  }
  func.func @transform_4(%arg0: i32) -> (i32, i32) {
    %c0_i32 = arith.constant 0 : i32
    %c0_i32_0 = arith.constant 0 : i32
    %c0_i32_1 = arith.constant 0 : i32
    return %c0_i32, %c0_i32_0 : i32, i32
  }
  func.func @transform_5(%arg0: i32) -> (i32, i32) {
    %c0_i32 = arith.constant 0 : i32
    %c0_i32_0 = arith.constant 0 : i32
    return %arg0, %c0_i32 : i32, i32
  }
}

module attributes {stable_mosaic.version = 11 : i64} {
  func.func @_gemm_bias_relu_kernel(%arg0: i32, %arg1: memref<2x768xbf16, #tpu.memory_space<vmem>>, %arg2: memref<768x384xbf16, #tpu.memory_space<vmem>>, %arg3: memref<1x384xf32, #tpu.memory_space<vmem>>, %arg4: memref<2x384xf32, #tpu.memory_space<vmem>>) attributes {dimension_semantics = [#tpu.dimension_semantics<parallel>], iteration_bounds = array<i64: 1>, scalar_prefetch = 0 : i64, scratch_operands = 0 : i64, tpu.core_type = #tpu.core_type<tc>, window_params = [{transform_indices = @transform_0, window_bounds = array<i64: 2, 768>}, {pipeline_mode = #tpu.pipeline_mode<synchronous>, transform_indices = @transform_1, window_bounds = array<i64: 768, 384>}, {pipeline_mode = #tpu.pipeline_mode<synchronous>, transform_indices = @transform_2, window_bounds = array<i64: 1, 384>}, {transform_indices = @transform_3, window_bounds = array<i64: 2, 384>}]} {
    %c0 = arith.constant 0 : index
    %c0_0 = arith.constant 0 : index
    %0 = vector.load %arg1[%c0, %c0_0] : memref<2x768xbf16, #tpu.memory_space<vmem>>, vector<2x768xbf16>
    %c0_1 = arith.constant 0 : index
    %c0_2 = arith.constant 0 : index
    %1 = vector.load %arg2[%c0_1, %c0_2] : memref<768x384xbf16, #tpu.memory_space<vmem>>, vector<768x384xbf16>
    %cst = arith.constant dense<0.000000e+00> : vector<2x384xf32>
    %2 = tpu.matmul %0, %1, %cst {dimension_numbers = #tpu.dot_dimension_numbers<[1], [0], [0], [1], [0, 0, 1, 1], [], []>} : vector<2x768xbf16>, vector<768x384xbf16>, vector<2x384xf32> -> vector<2x384xf32>
    %c0_3 = arith.constant 0 : index
    %c0_4 = arith.constant 0 : index
    %3 = vector.load %arg3[%c0_3, %c0_4] : memref<1x384xf32, #tpu.memory_space<vmem>>, vector<1x384xf32>
    %4 = vector.broadcast %3 : vector<1x384xf32> to vector<2x384xf32>
    %5 = arith.addf %2, %4 : vector<2x384xf32>
    %cst_5 = arith.constant 0.000000e+00 : f32
    %6 = vector.broadcast %cst_5 : f32 to vector<2x384xf32>
    %7 = arith.maximumf %5, %6 : vector<2x384xf32>
    %c0_6 = arith.constant 0 : index
    %c0_7 = arith.constant 0 : index
    %8 = vector.load %arg4[%c0_6, %c0_7] : memref<2x384xf32, #tpu.memory_space<vmem>>, vector<2x384xf32>
    tpu.vector_store %arg4[%c0_6, %c0_7], %7 {strides = array<i32>} : memref<2x384xf32, #tpu.memory_space<vmem>>, vector<2x384xf32>,
    return
  }
  func.func @transform_0(%arg0: i32) -> (i32, i32) {
    %c0_i32 = arith.constant 0 : i32
    %c0_i32_0 = arith.constant 0 : i32
    return %arg0, %c0_i32 : i32, i32
  }
  func.func @transform_1(%arg0: i32) -> (i32, i32) {
    %c0_i32 = arith.constant 0 : i32
    %c0_i32_0 = arith.constant 0 : i32
    %c0_i32_1 = arith.constant 0 : i32
    return %c0_i32, %c0_i32_0 : i32, i32
  }
  func.func @transform_2(%arg0: i32) -> (i32, i32) {
    %c0_i32 = arith.constant 0 : i32
    %c0_i32_0 = arith.constant 0 : i32
    %c0_i32_1 = arith.constant 0 : i32
    return %c0_i32, %c0_i32_0 : i32, i32
  }
  func.func @transform_3(%arg0: i32) -> (i32, i32) {
    %c0_i32 = arith.constant 0 : i32
    %c0_i32_0 = arith.constant 0 : i32
    return %arg0, %c0_i32 : i32, i32
  }
}

module attributes {stable_mosaic.version = 11 : i64} {
  func.func @_merge_relu_kernel(%arg0: i32, %arg1: memref<2x384xbf16, #tpu.memory_space<vmem>>, %arg2: memref<2x384xbf16, #tpu.memory_space<vmem>>, %arg3: memref<384x384xbf16, #tpu.memory_space<vmem>>, %arg4: memref<384x384xbf16, #tpu.memory_space<vmem>>, %arg5: memref<1x384xf32, #tpu.memory_space<vmem>>, %arg6: memref<2x384xf32, #tpu.memory_space<vmem>>) attributes {dimension_semantics = [#tpu.dimension_semantics<parallel>], iteration_bounds = array<i64: 1>, scalar_prefetch = 0 : i64, scratch_operands = 0 : i64, tpu.core_type = #tpu.core_type<tc>, window_params = [{transform_indices = @transform_0, window_bounds = array<i64: 2, 384>}, {transform_indices = @transform_1, window_bounds = array<i64: 2, 384>}, {pipeline_mode = #tpu.pipeline_mode<synchronous>, transform_indices = @transform_2, window_bounds = array<i64: 384, 384>}, {pipeline_mode = #tpu.pipeline_mode<synchronous>, transform_indices = @transform_3, window_bounds = array<i64: 384, 384>}, {pipeline_mode = #tpu.pipeline_mode<synchronous>, transform_indices = @transform_4, window_bounds = array<i64: 1, 384>}, {transform_indices = @transform_5, window_bounds = array<i64: 2, 384>}]} {
    %c0 = arith.constant 0 : index
    %c0_0 = arith.constant 0 : index
    %0 = vector.load %arg1[%c0, %c0_0] : memref<2x384xbf16, #tpu.memory_space<vmem>>, vector<2x384xbf16>
    %c0_1 = arith.constant 0 : index
    %c0_2 = arith.constant 0 : index
    %1 = vector.load %arg3[%c0_1, %c0_2] : memref<384x384xbf16, #tpu.memory_space<vmem>>, vector<384x384xbf16>
    %cst = arith.constant dense<0.000000e+00> : vector<2x384xf32>
    %2 = tpu.matmul %0, %1, %cst {dimension_numbers = #tpu.dot_dimension_numbers<[1], [0], [0], [1], [0, 0, 1, 1], [], []>} : vector<2x384xbf16>, vector<384x384xbf16>, vector<2x384xf32> -> vector<2x384xf32>
    %c0_3 = arith.constant 0 : index
    %c0_4 = arith.constant 0 : index
    %3 = vector.load %arg2[%c0_3, %c0_4] : memref<2x384xbf16, #tpu.memory_space<vmem>>, vector<2x384xbf16>
    %c0_5 = arith.constant 0 : index
    %c0_6 = arith.constant 0 : index
    %4 = vector.load %arg4[%c0_5, %c0_6] : memref<384x384xbf16, #tpu.memory_space<vmem>>, vector<384x384xbf16>
    %cst_7 = arith.constant dense<0.000000e+00> : vector<2x384xf32>
    %5 = tpu.matmul %3, %4, %cst_7 {dimension_numbers = #tpu.dot_dimension_numbers<[1], [0], [0], [1], [0, 0, 1, 1], [], []>} : vector<2x384xbf16>, vector<384x384xbf16>, vector<2x384xf32> -> vector<2x384xf32>
    %6 = arith.addf %2, %5 : vector<2x384xf32>
    %c0_8 = arith.constant 0 : index
    %c0_9 = arith.constant 0 : index
    %7 = vector.load %arg5[%c0_8, %c0_9] : memref<1x384xf32, #tpu.memory_space<vmem>>, vector<1x384xf32>
    %8 = vector.broadcast %7 : vector<1x384xf32> to vector<2x384xf32>
    %9 = arith.addf %6, %8 : vector<2x384xf32>
    %cst_10 = arith.constant 0.000000e+00 : f32
    %10 = vector.broadcast %cst_10 : f32 to vector<2x384xf32>
    %11 = arith.maximumf %9, %10 : vector<2x384xf32>
    %c0_11 = arith.constant 0 : index
    %c0_12 = arith.constant 0 : index
    %12 = vector.load %arg6[%c0_11, %c0_12] : memref<2x384xf32, #tpu.memory_space<vmem>>, vector<2x384xf32>
    tpu.vector_store %arg6[%c0_11, %c0_12], %11 {strides = array<i32>} : memref<2x384xf32, #tpu.memory_space<vmem>>, vector<2x384xf32>,
    return
  }
  func.func @transform_0(%arg0: i32) -> (i32, i32) {
    %c0_i32 = arith.constant 0 : i32
    %c0_i32_0 = arith.constant 0 : i32
    return %arg0, %c0_i32 : i32, i32
  }
  func.func @transform_1(%arg0: i32) -> (i32, i32) {
    %c0_i32 = arith.constant 0 : i32
    %c0_i32_0 = arith.constant 0 : i32
    return %arg0, %c0_i32 : i32, i32
  }
  func.func @transform_2(%arg0: i32) -> (i32, i32) {
    %c0_i32 = arith.constant 0 : i32
    %c0_i32_0 = arith.constant 0 : i32
    %c0_i32_1 = arith.constant 0 : i32
    return %c0_i32, %c0_i32_0 : i32, i32
  }
  func.func @transform_3(%arg0: i32) -> (i32, i32) {
    %c0_i32 = arith.constant 0 : i32
    %c0_i32_0 = arith.constant 0 : i32
    %c0_i32_1 = arith.constant 0 : i32
    return %c0_i32, %c0_i32_0 : i32, i32
  }
  func.func @transform_4(%arg0: i32) -> (i32, i32) {
    %c0_i32 = arith.constant 0 : i32
    %c0_i32_0 = arith.constant 0 : i32
    %c0_i32_1 = arith.constant 0 : i32
    return %c0_i32, %c0_i32_0 : i32, i32
  }
  func.func @transform_5(%arg0: i32) -> (i32, i32) {
    %c0_i32 = arith.constant 0 : i32
    %c0_i32_0 = arith.constant 0 : i32
    return %arg0, %c0_i32 : i32, i32
  }
}

module attributes {stable_mosaic.version = 11 : i64} {
  func.func @_merge_relu_kernel(%arg0: i32, %arg1: memref<32x96xbf16, #tpu.memory_space<vmem>>, %arg2: memref<32x96xbf16, #tpu.memory_space<vmem>>, %arg3: memref<96x96xbf16, #tpu.memory_space<vmem>>, %arg4: memref<96x96xbf16, #tpu.memory_space<vmem>>, %arg5: memref<1x96xf32, #tpu.memory_space<vmem>>, %arg6: memref<32x96xf32, #tpu.memory_space<vmem>>) attributes {dimension_semantics = [#tpu.dimension_semantics<parallel>], iteration_bounds = array<i64: 1>, scalar_prefetch = 0 : i64, scratch_operands = 0 : i64, tpu.core_type = #tpu.core_type<tc>, window_params = [{transform_indices = @transform_0, window_bounds = array<i64: 32, 96>}, {transform_indices = @transform_1, window_bounds = array<i64: 32, 96>}, {pipeline_mode = #tpu.pipeline_mode<synchronous>, transform_indices = @transform_2, window_bounds = array<i64: 96, 96>}, {pipeline_mode = #tpu.pipeline_mode<synchronous>, transform_indices = @transform_3, window_bounds = array<i64: 96, 96>}, {pipeline_mode = #tpu.pipeline_mode<synchronous>, transform_indices = @transform_4, window_bounds = array<i64: 1, 96>}, {transform_indices = @transform_5, window_bounds = array<i64: 32, 96>}]} {
    %c0 = arith.constant 0 : index
    %c0_0 = arith.constant 0 : index
    %0 = vector.load %arg1[%c0, %c0_0] : memref<32x96xbf16, #tpu.memory_space<vmem>>, vector<32x96xbf16>
    %c0_1 = arith.constant 0 : index
    %c0_2 = arith.constant 0 : index
    %1 = vector.load %arg3[%c0_1, %c0_2] : memref<96x96xbf16, #tpu.memory_space<vmem>>, vector<96x96xbf16>
    %cst = arith.constant dense<0.000000e+00> : vector<32x96xf32>
    %2 = tpu.matmul %0, %1, %cst {dimension_numbers = #tpu.dot_dimension_numbers<[1], [0], [0], [1], [0, 0, 1, 1], [], []>} : vector<32x96xbf16>, vector<96x96xbf16>, vector<32x96xf32> -> vector<32x96xf32>
    %c0_3 = arith.constant 0 : index
    %c0_4 = arith.constant 0 : index
    %3 = vector.load %arg2[%c0_3, %c0_4] : memref<32x96xbf16, #tpu.memory_space<vmem>>, vector<32x96xbf16>
    %c0_5 = arith.constant 0 : index
    %c0_6 = arith.constant 0 : index
    %4 = vector.load %arg4[%c0_5, %c0_6] : memref<96x96xbf16, #tpu.memory_space<vmem>>, vector<96x96xbf16>
    %cst_7 = arith.constant dense<0.000000e+00> : vector<32x96xf32>
    %5 = tpu.matmul %3, %4, %cst_7 {dimension_numbers = #tpu.dot_dimension_numbers<[1], [0], [0], [1], [0, 0, 1, 1], [], []>} : vector<32x96xbf16>, vector<96x96xbf16>, vector<32x96xf32> -> vector<32x96xf32>
    %6 = arith.addf %2, %5 : vector<32x96xf32>
    %c0_8 = arith.constant 0 : index
    %c0_9 = arith.constant 0 : index
    %7 = vector.load %arg5[%c0_8, %c0_9] : memref<1x96xf32, #tpu.memory_space<vmem>>, vector<1x96xf32>
    %8 = vector.broadcast %7 : vector<1x96xf32> to vector<32x96xf32>
    %9 = arith.addf %6, %8 : vector<32x96xf32>
    %cst_10 = arith.constant 0.000000e+00 : f32
    %10 = vector.broadcast %cst_10 : f32 to vector<32x96xf32>
    %11 = arith.maximumf %9, %10 : vector<32x96xf32>
    %c0_11 = arith.constant 0 : index
    %c0_12 = arith.constant 0 : index
    %12 = vector.load %arg6[%c0_11, %c0_12] : memref<32x96xf32, #tpu.memory_space<vmem>>, vector<32x96xf32>
    tpu.vector_store %arg6[%c0_11, %c0_12], %11 {strides = array<i32>} : memref<32x96xf32, #tpu.memory_space<vmem>>, vector<32x96xf32>,
    return
  }
  func.func @transform_0(%arg0: i32) -> (i32, i32) {
    %c0_i32 = arith.constant 0 : i32
    %c0_i32_0 = arith.constant 0 : i32
    return %arg0, %c0_i32 : i32, i32
  }
  func.func @transform_1(%arg0: i32) -> (i32, i32) {
    %c0_i32 = arith.constant 0 : i32
    %c0_i32_0 = arith.constant 0 : i32
    return %arg0, %c0_i32 : i32, i32
  }
  func.func @transform_2(%arg0: i32) -> (i32, i32) {
    %c0_i32 = arith.constant 0 : i32
    %c0_i32_0 = arith.constant 0 : i32
    %c0_i32_1 = arith.constant 0 : i32
    return %c0_i32, %c0_i32_0 : i32, i32
  }
  func.func @transform_3(%arg0: i32) -> (i32, i32) {
    %c0_i32 = arith.constant 0 : i32
    %c0_i32_0 = arith.constant 0 : i32
    %c0_i32_1 = arith.constant 0 : i32
    return %c0_i32, %c0_i32_0 : i32, i32
  }
  func.func @transform_4(%arg0: i32) -> (i32, i32) {
    %c0_i32 = arith.constant 0 : i32
    %c0_i32_0 = arith.constant 0 : i32
    %c0_i32_1 = arith.constant 0 : i32
    return %c0_i32, %c0_i32_0 : i32, i32
  }
  func.func @transform_5(%arg0: i32) -> (i32, i32) {
    %c0_i32 = arith.constant 0 : i32
    %c0_i32_0 = arith.constant 0 : i32
    return %arg0, %c0_i32 : i32, i32
  }
}

module attributes {stable_mosaic.version = 11 : i64} {
  func.func @_merge_relu_kernel(%arg0: i32, %arg1: memref<128x48xbf16, #tpu.memory_space<vmem>>, %arg2: memref<128x48xbf16, #tpu.memory_space<vmem>>, %arg3: memref<48x48xbf16, #tpu.memory_space<vmem>>, %arg4: memref<48x48xbf16, #tpu.memory_space<vmem>>, %arg5: memref<1x48xf32, #tpu.memory_space<vmem>>, %arg6: memref<128x48xf32, #tpu.memory_space<vmem>>) attributes {dimension_semantics = [#tpu.dimension_semantics<parallel>], iteration_bounds = array<i64: 1>, scalar_prefetch = 0 : i64, scratch_operands = 0 : i64, tpu.core_type = #tpu.core_type<tc>, window_params = [{transform_indices = @transform_0, window_bounds = array<i64: 128, 48>}, {transform_indices = @transform_1, window_bounds = array<i64: 128, 48>}, {pipeline_mode = #tpu.pipeline_mode<synchronous>, transform_indices = @transform_2, window_bounds = array<i64: 48, 48>}, {pipeline_mode = #tpu.pipeline_mode<synchronous>, transform_indices = @transform_3, window_bounds = array<i64: 48, 48>}, {pipeline_mode = #tpu.pipeline_mode<synchronous>, transform_indices = @transform_4, window_bounds = array<i64: 1, 48>}, {transform_indices = @transform_5, window_bounds = array<i64: 128, 48>}]} {
    %c0 = arith.constant 0 : index
    %c0_0 = arith.constant 0 : index
    %0 = vector.load %arg1[%c0, %c0_0] : memref<128x48xbf16, #tpu.memory_space<vmem>>, vector<128x48xbf16>
    %c0_1 = arith.constant 0 : index
    %c0_2 = arith.constant 0 : index
    %1 = vector.load %arg3[%c0_1, %c0_2] : memref<48x48xbf16, #tpu.memory_space<vmem>>, vector<48x48xbf16>
    %cst = arith.constant dense<0.000000e+00> : vector<128x48xf32>
    %2 = tpu.matmul %0, %1, %cst {dimension_numbers = #tpu.dot_dimension_numbers<[1], [0], [0], [1], [0, 0, 1, 1], [], []>} : vector<128x48xbf16>, vector<48x48xbf16>, vector<128x48xf32> -> vector<128x48xf32>
    %c0_3 = arith.constant 0 : index
    %c0_4 = arith.constant 0 : index
    %3 = vector.load %arg2[%c0_3, %c0_4] : memref<128x48xbf16, #tpu.memory_space<vmem>>, vector<128x48xbf16>
    %c0_5 = arith.constant 0 : index
    %c0_6 = arith.constant 0 : index
    %4 = vector.load %arg4[%c0_5, %c0_6] : memref<48x48xbf16, #tpu.memory_space<vmem>>, vector<48x48xbf16>
    %cst_7 = arith.constant dense<0.000000e+00> : vector<128x48xf32>
    %5 = tpu.matmul %3, %4, %cst_7 {dimension_numbers = #tpu.dot_dimension_numbers<[1], [0], [0], [1], [0, 0, 1, 1], [], []>} : vector<128x48xbf16>, vector<48x48xbf16>, vector<128x48xf32> -> vector<128x48xf32>
    %6 = arith.addf %2, %5 : vector<128x48xf32>
    %c0_8 = arith.constant 0 : index
    %c0_9 = arith.constant 0 : index
    %7 = vector.load %arg5[%c0_8, %c0_9] : memref<1x48xf32, #tpu.memory_space<vmem>>, vector<1x48xf32>
    %8 = vector.broadcast %7 : vector<1x48xf32> to vector<128x48xf32>
    %9 = arith.addf %6, %8 : vector<128x48xf32>
    %cst_10 = arith.constant 0.000000e+00 : f32
    %10 = vector.broadcast %cst_10 : f32 to vector<128x48xf32>
    %11 = arith.maximumf %9, %10 : vector<128x48xf32>
    %c0_11 = arith.constant 0 : index
    %c0_12 = arith.constant 0 : index
    %12 = vector.load %arg6[%c0_11, %c0_12] : memref<128x48xf32, #tpu.memory_space<vmem>>, vector<128x48xf32>
    tpu.vector_store %arg6[%c0_11, %c0_12], %11 {strides = array<i32>} : memref<128x48xf32, #tpu.memory_space<vmem>>, vector<128x48xf32>,
    return
  }
  func.func @transform_0(%arg0: i32) -> (i32, i32) {
    %c0_i32 = arith.constant 0 : i32
    %c0_i32_0 = arith.constant 0 : i32
    return %arg0, %c0_i32 : i32, i32
  }
  func.func @transform_1(%arg0: i32) -> (i32, i32) {
    %c0_i32 = arith.constant 0 : i32
    %c0_i32_0 = arith.constant 0 : i32
    return %arg0, %c0_i32 : i32, i32
  }
  func.func @transform_2(%arg0: i32) -> (i32, i32) {
    %c0_i32 = arith.constant 0 : i32
    %c0_i32_0 = arith.constant 0 : i32
    %c0_i32_1 = arith.constant 0 : i32
    return %c0_i32, %c0_i32_0 : i32, i32
  }
  func.func @transform_3(%arg0: i32) -> (i32, i32) {
    %c0_i32 = arith.constant 0 : i32
    %c0_i32_0 = arith.constant 0 : i32
    %c0_i32_1 = arith.constant 0 : i32
    return %c0_i32, %c0_i32_0 : i32, i32
  }
  func.func @transform_4(%arg0: i32) -> (i32, i32) {
    %c0_i32 = arith.constant 0 : i32
    %c0_i32_0 = arith.constant 0 : i32
    %c0_i32_1 = arith.constant 0 : i32
    return %c0_i32, %c0_i32_0 : i32, i32
  }
  func.func @transform_5(%arg0: i32) -> (i32, i32) {
    %c0_i32 = arith.constant 0 : i32
    %c0_i32_0 = arith.constant 0 : i32
    return %arg0, %c0_i32 : i32, i32
  }
}

</mosaic_0001>

<bundles_post_ra>
// kernel: conv_model_forward.8
= control target key start
LH: loop header
LB: loop body
LE: loop exit
PB: predicated region body
PF: predicated region fallthrough
CT: control target
= control target key end

     0   :  { %vm327_vm0 = vcmask 523264   ;;  %vm1746_vm1 = vcmask 392192   ;;  %s3415_s1 = inlined_call_operand.vmem [shape: bf16[320,48], index: 1, kind: input, shape index: {}]   ;;  %s3416_s0 = inlined_call_operand.vmem [shape: bf16[4,128,320], index: 0, kind: input, shape index: {}]   ;;  %s3417_s2 = inlined_call_operand.vmem [shape: f32[1,48], index: 2, kind: input, shape index: {}]   ;;  %s3418_s3 = inlined_call_operand.vmem [shape: f32[128,48], index: 3, kind: output, shape index: {}]  }
   0x1   :  { %v2583_v0 = vld [vmem:[%s3415_s1 + $0x40] sm:$0xff]   ;;  %v2600_v3 = vld [vmem:[%s3415_s1 + $0x48] sm:$0xff]   ;;  %v2619_v6 = vld [vmem:[%s3415_s1 + $0x50] sm:$0xff]  }
   0x2   :  { %v2588_v1 = vld [vmem:[%s3415_s1 + $0x80] sm:$0xff]   ;;  %2012 = vmatprep.subr.bf16.mxu0 %v2583_v0  ;;  %v2607_v4 = vld [vmem:[%s3415_s1 + $0x88] sm:$0xff]   ;;  %v2624_v7 = vld [vmem:[%s3415_s1 + $0x90] sm:$0xff]  }
   0x3   :  { %v2594_v2 = vld [vmem:[%s3415_s1] sm:$0xff]   ;;  %2316 = vmatprep.subr.bf16.mxu1 %v2588_v1  ;;  %v2613_v5 = vld [vmem:[%s3415_s1 + $0x8] sm:$0xff]   ;;  %v2631_v8 = vld [vmem:[%s3415_s1 + $0x10] sm:$0xff]  }
   0x4   :  { %2013 = vmatpush3.bf16.msra.mxu0 %v2594_v2  ;;  %2317 = vmatpush3.bf16.msra.mxu1 %v2588_v1  ;;  %v2638_v9 = vld [vmem:[%s3415_s1 + $0x58] sm:$0xff]   ;;  %v2424_v12 = vld [vmem:[%s3416_s0 + $0x8] ss:$12 sps:$4 sm:$0xff]   ;;  %v2660_v13 = vld [vmem:[%s3415_s1 + $0x60] sm:$0xff]  }
   0x5   :  { %2014 = vmatprep.subr.bf16.mxu0 %v2600_v3  ;;  %2318 = vmatprep.subr.bf16.mxu1 %v2607_v4  ;;  %v2643_v10 = vld [vmem:[%s3415_s1 + $0x98] sm:$0xff]   ;;  %v2426_v14 = vld [vmem:[%s3416_s0 + $0x20] ss:$12 sps:$4 sm:$0xff]   ;;  %v2696_v19 = vld [vmem:[%s3415_s1 + $0x70] sm:$0xff]  }
   0x6   :  { %v2648_v11 = vld [vmem:[%s3415_s1 + $0x18] sm:$0xff]   ;;  %2324 = vmatprep.mubr.msk.bf16.mxu1 %vm327_vm0, %v2424_v12  ;;  %v2671_v15 = vld [vmem:[%s3415_s1 + $0x20] sm:$0xff]   ;;  %v2678_v16 = vld [vmem:[%s3415_s1 + $0x68] sm:$0xff]  }
   0x7   :  { %v2430_v17 = vld [vmem:[%s3416_s0 + $0x38] ss:$12 sps:$4 sm:$0xff]   ;;  %v2689_v18 = vld [vmem:[%s3415_s1 + $0x28] sm:$0xff]   ;;  %v2432_v20 = vld [vmem:[%s3416_s0 + $0x50] ss:$12 sps:$4 sm:$0xff]  }
   0x8   :  { %2015 = vmatpush3.bf16.msra.mxu0 %v2613_v5  ;;  %2319 = vmatpush3.bf16.msra.mxu1 %v2607_v4  ;;  %v2705_v21 = vld [vmem:[%s3415_s1 + $0x30] sm:$0xff]   ;;  %v2712_v22 = vld [vmem:[%s3415_s1 + $0x78] sm:$0xff]   ;;  %v2436_v26 = vld [vmem:[%s3416_s0] ss:$12 sps:$4 sm:$0xff]  }
   0x9   :  { %2016 = vmatprep.subr.bf16.mxu0 %v2619_v6  ;;  %2320 = vmatprep.subr.bf16.mxu1 %v2624_v7  ;;  %v2438_v23 = vld [vmem:[%s3416_s0 + $0x4] ss:$12 sps:$4 sm:$0xff]   ;;  %v2439_v24 = vld [vmem:[%s3416_s0 + $0x68] ss:$12 sps:$4 sm:$0xff]   ;;  %v2728_v25 = vld [vmem:[%s3415_s1 + $0x38] sm:$0xff]  }
   0xa   :  { %384 = vmatprep.mubr.bf16.mxu0 %v2438_v23  ;;  %v2440_v27 = vld [vmem:[%s3416_s0 + $0x80] ss:$12 sps:$4 sm:$0xff]   ;;  %v2441_v28 = vld [vmem:[%s3416_s0 + $0x1c] ss:$12 sps:$4 sm:$0xff]   ;;  %v2443_v29 = vld [vmem:[%s3416_s0 + $0x98] ss:$12 sps:$4 sm:$0xff]  }
   0xb   :  { %v2444_v30 = vld [vmem:[%s3416_s0 + $0x18] ss:$12 sps:$4 sm:$0xff]   ;;  %v2445_v31 = vld [vmem:[%s3416_s0 + $0xb0] ss:$12 sps:$4 sm:$0xff]   ;;  %v2446_v32 = vld [vmem:[%s3416_s0 + $0x34] ss:$12 sps:$4 sm:$0xff]  }
   0xc   :  { %2017 = vmatpush3.bf16.msra.mxu0 %v2631_v8  ;;  %2321 = vmatpush3.bf16.msra.mxu1 %v2624_v7  ;;  %v2450_v33 = vld [vmem:[%s3416_s0 + $0xc4] ss:$12 sps:$4 sm:$0xff]   ;;  %v2448_v34 = vld [vmem:[%s3416_s0 + $0xc0] ss:$12 sps:$4 sm:$0xff]   ;;  %v2454_v37 = vld [vmem:[%s3416_s0 + $0xdc] ss:$12 sps:$4 sm:$0xff]  }
   0xd   :  { %2018 = vmatprep.subr.bf16.mxu0 %v2638_v9  ;;  %2322 = vmatprep.subr.bf16.mxu1 %v2643_v10  ;;  %v2451_v35 = vld [vmem:[%s3416_s0 + $0x30] ss:$12 sps:$4 sm:$0xff]   ;;  %v2452_v36 = vld [vmem:[%s3416_s0 + $0x4c] ss:$12 sps:$4 sm:$0xff]   ;;  %v2456_v38 = vld [vmem:[%s3416_s0 + $0x48] ss:$12 sps:$4 sm:$0xff]  }
   0xe   :  { %v2457_v39 = vld [vmem:[%s3416_s0 + $0xd8] ss:$12 sps:$4 sm:$0xff]   ;;  %v2460_v41 = vld [vmem:[%s3416_s0 + $0xf4] ss:$12 sps:$4 sm:$0xff]   ;;  %v2463_v43 = vld [vmem:[%s3416_s0 + $0xf0] ss:$12 sps:$4 sm:$0xff]  }
   0xf   :  { %v2458_v40 = vld [vmem:[%s3416_s0 + $0x64] ss:$12 sps:$4 sm:$0xff]   ;;  %v2462_v42 = vld [vmem:[%s3416_s0 + $0x60] ss:$12 sps:$4 sm:$0xff]   ;;  %v2464_v44 = vld [vmem:[%s3416_s0 + $0x7c] ss:$12 sps:$4 sm:$0xff]  }
  0x10   :  { %2019 = vmatpush3.bf16.msra.mxu0 %v2648_v11  ;;  %2323 = vmatpush3.bf16.msra.mxu1 %v2643_v10  ;;  %v2466_v45 = vld [vmem:[%s3416_s0 + $0x10c] ss:$12 sps:$4 sm:$0xff]   ;;  %v2469_v47 = vld [vmem:[%s3416_s0 + $0x108] ss:$12 sps:$4 sm:$0xff]   ;;  %v2472_v49 = vld [vmem:[%s3416_s0 + $0x124] ss:$12 sps:$4 sm:$0xff]  }
  0x11   :  { %2020 = vmatprep.subr.bf16.mxu0 %v2660_v13  ;;  %2088 = vmatprep.subr.bf16.mxu1 %v2583_v0  ;;  %v2468_v46 = vld [vmem:[%s3416_s0 + $0x78] ss:$12 sps:$4 sm:$0xff]   ;;  %v2470_v48 = vld [vmem:[%s3416_s0 + $0x94] ss:$12 sps:$4 sm:$0xff]   ;;  %v2474_v50 = vld [vmem:[%s3416_s0 + $0x90] ss:$12 sps:$4 sm:$0xff]  }
  0x12   :  { %v2475_v51 = vld [vmem:[%s3416_s0 + $0x120] ss:$12 sps:$4 sm:$0xff]   ;;  %v2478_v53 = vld [vmem:[%s3416_s0 + $0x13c] ss:$12 sps:$4 sm:$0xff]   ;;  %v2481_v55 = vld [vmem:[%s3416_s0 + $0x138] ss:$12 sps:$4 sm:$0xff]  }
  0x13   :  { %2325 = vmatmul.mubr.msk.bf16.vlgmr.msra.gmra.mrb[0].mxu1 %vm327_vm0, %v2426_v14  ;;  %v2476_v52 = vld [vmem:[%s3416_s0 + $0xac] ss:$12 sps:$4 sm:$0xff]   ;;  %v2480_v54 = vld [vmem:[%s3416_s0 + $0xa8] ss:$12 sps:$4 sm:$0xff]   ;;  %v2485_v58 = vld [vmem:[%s3416_s0 + $0x150] ss:$12 sps:$4 sm:$0xff]  }
  0x14   :  { %2021 = vmatpush3.bf16.msra.mxu0 %v2671_v15  ;;  %2089 = vmatpush3.bf16.msra.mxu1 %v2594_v2  ;;  %v2482_v56 = vld [vmem:[%s3416_s0 + $0x154] ss:$12 sps:$4 sm:$0xff]   ;;  %v2487_v60 = vld [vmem:[%s3416_s0 + $0x16c] ss:$12 sps:$4 sm:$0xff]   ;;  %v2491_v63 = vld [vmem:[%s3416_s0 + $0x110] ss:$12 sps:$4 sm:$0xff]  }
  0x15   :  { %2022 = vmatprep.subr.bf16.mxu0 %v2678_v16  ;;  %2090 = vmatprep.subr.bf16.mxu1 %v2600_v3  ;;  %v2484_v57 = vld [vmem:[%s3416_s0 + $0xc8] ss:$12 sps:$4 sm:$0xff]   ;;  %v2486_v59 = vld [vmem:[%s3416_s0 + $0xe0] ss:$12 sps:$4 sm:$0xff]   ;;  %v2489_v61 = vld [vmem:[%s3416_s0 + $0xf8] ss:$12 sps:$4 sm:$0xff]  }
  0x16   :  { %2328 = vmatprep.mubr.msk.bf16.mxu1 %vm327_vm0, %v2430_v17  ;;  %v2490_v62 = vld [vmem:[%s3416_s0 + $0x168] ss:$12 sps:$4 sm:$0xff]   ;;  %v2495_v14 = vld [vmem:[%s3416_s0 + $0x184] ss:$12 sps:$4 sm:$0xff]   ;;  %v2493_v17 = vld [vmem:[%s3416_s0 + $0x180] ss:$12 sps:$4 sm:$0xff]  }
  0x17   :  { %v2492_v12 = vld [vmem:[%s3416_s0 + $0x128] ss:$12 sps:$4 sm:$0xff]   ;;  %v2497_v23 = vld [vmem:[%s3416_s0 + $0x158] ss:$12 sps:$4 sm:$0xff]  }
  0x18   :  { %2023 = vmatpush3.bf16.msra.mxu0 %v2689_v18  ;;  %2091 = vmatpush3.bf16.msra.mxu1 %v2613_v5 }
  0x19   :  { %2024 = vmatprep.subr.bf16.mxu0 %v2696_v19  ;;  %2092 = vmatprep.subr.bf16.mxu1 %v2619_v6 }
  0x1b   :  { %2329 = vmatmul.mubr.msk.bf16.gmra.mrb[4].mxu1 %vm327_vm0, %v2432_v20  ;;  %v2496_v20 = vld [vmem:[%s3416_s0 + $0x140] ss:$12 sps:$4 sm:$0xff]  }
  0x1c   :  { %2025 = vmatpush3.bf16.msra.mxu0 %v2705_v21  ;;  %2093 = vmatpush3.bf16.msra.mxu1 %v2631_v8 }
  0x1d   :  { %2026 = vmatprep.subr.bf16.mxu0 %v2712_v22  ;;  %2094 = vmatprep.subr.bf16.mxu1 %v2638_v9 }
  0x1e   :  { %2332 = vmatprep.mubr.msk.bf16.mxu1 %vm327_vm0, %v2439_v24  ;;  %v2498_v24 = vld [vmem:[%s3416_s0 + $0x19c] ss:$12 sps:$4 sm:$0xff]  }
  0x20   :  { %2027 = vmatpush3.bf16.msra.mxu0 %v2728_v25  ;;  %2095 = vmatpush3.bf16.msra.mxu1 %v2648_v11 }
  0x21   :  { %2096 = vmatprep.subr.bf16.mxu1 %v2660_v13  ;;  %2340 = vmatprep.subr.bf16.mxu0 %v2588_v1 }
  0x23   :  { %385 = vmatmul.mubr.bf16.vlgmr.msra.gmra.mrb[0].mxu0 %v2436_v26  ;;  %2333 = vmatmul.mubr.msk.bf16.gmra.mrb[8].mxu1 %vm327_vm0, %v2440_v27  ;;  %v2500_v26 = vld [vmem:[%s3416_s0 + $0x170] ss:$12 sps:$4 sm:$0xff]   ;;  %v2501_v27 = vld [vmem:[%s3416_s0 + $0x198] ss:$12 sps:$4 sm:$0xff]  }
  0x24   :  { %2097 = vmatpush3.bf16.msra.mxu1 %v2671_v15  ;;  %2341 = vmatpush3.bf16.msra.mxu0 %v2588_v1 }
  0x25   :  { %2098 = vmatprep.subr.bf16.mxu1 %v2678_v16  ;;  %392 = vmatprep.mubr.bf16.mxu0 %v2441_v28  ;;  %v2504_v28 = vld [vmem:[%s3416_s0 + $0x188] ss:$12 sps:$4 sm:$0xff]  }
  0x26   :  { %2336 = vmatprep.mubr.msk.bf16.mxu1 %vm327_vm0, %v2443_v29  ;;  %2342 = vmatprep.subr.bf16.mxu0 %v2607_v4  ;;  %v2507_v29 = vld [vmem:[%s3416_s0 + $0x1cc] ss:$12 sps:$4 sm:$0xff]  }
  0x28   :  { %2099 = vmatpush3.bf16.msra.mxu1 %v2689_v18  ;;  %2343 = vmatpush3.bf16.msra.mxu0 %v2607_v4 }
  0x29   :  { %2100 = vmatprep.subr.bf16.mxu1 %v2696_v19  ;;  %2344 = vmatprep.subr.bf16.mxu0 %v2624_v7 }
  0x2b   :  { %393 = vmatmul.mubr.bf16.gmra.mrb[4].mxu0 %v2444_v30  ;;  %2337 = vmatmul.mubr.msk.bf16.gmra.mrb[12].mxu1 %vm327_vm0, %v2445_v31  ;;  %v2509_v30 = vld [vmem:[%s3416_s0 + $0x1b8] ss:$12 sps:$4 sm:$0xff]   ;;  %v2511_v31 = vld [vmem:[%s3416_s0 + $0x1d0] ss:$12 sps:$4 sm:$0xff]  }
  0x2c   :  { %2101 = vmatpush3.bf16.msra.mxu1 %v2705_v21  ;;  %400 = vmatprep.mubr.bf16.mxu0 %v2446_v32  ;;  %v2534_v32 = vld [vmem:[%s3416_s0 + $0x274] ss:$12 sps:$4 sm:$0xff]  }
  0x2d   :  { %2102 = vmatprep.subr.bf16.mxu1 %v2712_v22  ;;  %755 = vmatprep.mubr.bf16.mxu1 %v2450_v33  ;;  %v2536_v33 = vld [vmem:[%s3416_s0 + $0x248] ss:$12 sps:$4 sm:$0xff]  }
  0x2e   :  { %2345 = vmatpush3.bf16.msra.mxu0 %v2624_v7 }
  0x2f   :  { %2346 = vmatprep.subr.bf16.mxu0 %v2643_v10 }
  0x30   :  { %2103 = vmatpush3.bf16.msra.mxu1 %v2728_v25 }
  0x31   :  { %2164 = vmatprep.subr.bf16.mxu1 %v2583_v0 }
  0x32   :  { %2347 = vmatpush3.bf16.msra.mxu0 %v2643_v10 }
  0x33   :  { %401 = vmatmul.mubr.bf16.gmra.mrb[8].mxu0 %v2451_v35  ;;  %756 = vmatmul.mubr.bf16.vlgmr.msra.gmra.mrb[16].mxu1 %v2448_v34  ;;  %v2537_v34 = vld [vmem:[%s3416_s0 + $0x270] ss:$12 sps:$4 sm:$0xff]   ;;  %v2538_v35 = vld [vmem:[%s3416_s0 + $0x260] ss:$12 sps:$4 sm:$0xff]  }
  0x34   :  { %408 = vmatprep.mubr.bf16.mxu0 %v2452_v36  ;;  %763 = vmatprep.mubr.bf16.mxu1 %v2454_v37  ;;  %v2539_v36 = vld [vmem:[%s3416_s0 + $0x28c] ss:$12 sps:$4 sm:$0xff]  }
  0x35   :  { %2165 = vmatpush3.bf16.msra.mxu1 %v2594_v2  ;;  %2364 = vmatprep.subr.bf16.mxu0 %v2588_v1  ;;  %v2541_v37 = vld [vmem:[%s3416_s0 + $0x278] ss:$12 sps:$4 sm:$0xff]  }
  0x36   :  { %2166 = vmatprep.subr.bf16.mxu1 %v2600_v3 }
  0x39   :  { %2167 = vmatpush3.bf16.msra.mxu1 %v2613_v5 }
  0x3a   :  { %2168 = vmatprep.subr.bf16.mxu1 %v2619_v6 }
  0x3b   :  { %409 = vmatmul.mubr.bf16.gmra.mrb[12].mxu0 %v2456_v38  ;;  %764 = vmatmul.mubr.bf16.gmra.mrb[20].mxu1 %v2457_v39  ;;  %v2542_v38 = vld [vmem:[%s3416_s0 + $0x288] ss:$12 sps:$4 sm:$0xff]   ;;  %v2543_v39 = vld [vmem:[%s3416_s0 + $0x290] ss:$12 sps:$4 sm:$0xff]  }
  0x3c   :  { %416 = vmatprep.mubr.bf16.mxu0 %v2458_v40  ;;  %771 = vmatprep.mubr.bf16.mxu1 %v2460_v41  ;;  %v2544_v40 = vld [vmem:[%s3416_s0 + $0x2a4] ss:$12 sps:$4 sm:$0xff]   ;;  %v2547_v41 = vld [vmem:[%s3416_s0 + $0x2a8] ss:$12 sps:$4 sm:$0xff]  }
  0x3d   :  { %2169 = vmatpush3.bf16.msra.mxu1 %v2631_v8 }
  0x3e   :  { %2170 = vmatprep.subr.bf16.mxu1 %v2638_v9 }
  0x41   :  { %2171 = vmatpush3.bf16.msra.mxu1 %v2648_v11 }
  0x42   :  { %2172 = vmatprep.subr.bf16.mxu1 %v2660_v13 }
  0x43   :  { %417 = vmatmul.mubr.bf16.gmra.mrb[16].mxu0 %v2462_v42  ;;  %772 = vmatmul.mubr.bf16.gmra.mrb[24].mxu1 %v2463_v43  ;;  %v2546_v42 = vld [vmem:[%s3416_s0 + $0x2a0] ss:$12 sps:$4 sm:$0xff]  }
  0x44   :  { %424 = vmatprep.mubr.bf16.mxu0 %v2464_v44  ;;  %779 = vmatprep.mubr.bf16.mxu1 %v2466_v45  ;;  %v2548_v43 = vld [vmem:[%s3416_s0 + $0x2c0] ss:$12 sps:$4 sm:$0xff]   ;;  %v2549_v44 = vld [vmem:[%s3416_s0 + $0x2bc] ss:$12 sps:$4 sm:$0xff]   ;;  %v2555_v45 = vld [vmem:[%s3416_s0 + $0x2d8] ss:$12 sps:$4 sm:$0xff]  }
  0x45   :  { %2173 = vmatpush3.bf16.msra.mxu1 %v2671_v15 }
  0x46   :  { %2174 = vmatprep.subr.bf16.mxu1 %v2678_v16 }
  0x49   :  { %2175 = vmatpush3.bf16.msra.mxu1 %v2689_v18 }
  0x4a   :  { %2176 = vmatprep.subr.bf16.mxu1 %v2696_v19 }
  0x4b   :  { %425 = vmatmul.mubr.bf16.gmra.mrb[20].mxu0 %v2468_v46  ;;  %780 = vmatmul.mubr.bf16.gmra.mrb[28].mxu1 %v2469_v47  ;;  %v2551_v46 = vld [vmem:[%s3416_s0 + $0x2b8] ss:$12 sps:$4 sm:$0xff]   ;;  %v2556_v47 = vld [vmem:[%s3416_s0 + $0x2f0] ss:$12 sps:$4 sm:$0xff]  }
  0x4c   :  { %432 = vmatprep.mubr.bf16.mxu0 %v2470_v48  ;;  %787 = vmatprep.mubr.bf16.mxu1 %v2472_v49  ;;  %v2552_v48 = vld [vmem:[%s3416_s0 + $0x2d4] ss:$12 sps:$4 sm:$0xff]   ;;  %v2554_v49 = vld [vmem:[%s3416_s0 + $0x2d0] ss:$12 sps:$4 sm:$0xff]  }
  0x4d   :  { %2177 = vmatpush3.bf16.msra.mxu1 %v2705_v21 }
  0x4e   :  { %2178 = vmatprep.subr.bf16.mxu1 %v2712_v22 }
  0x51   :  { %2179 = vmatpush3.bf16.msra.mxu1 %v2728_v25 }
  0x52   :  { %2388 = vmatprep.subr.bf16.mxu1 %v2588_v1 }
  0x53   :  { %433 = vmatmul.mubr.bf16.gmra.mrb[24].mxu0 %v2474_v50  ;;  %788 = vmatmul.mubr.bf16.gmra.mrb[32].mxu1 %v2475_v51  ;;  %v2557_v50 = vld [vmem:[%s3416_s0 + $0x2ec] ss:$12 sps:$4 sm:$0xff]   ;;  %v2559_v51 = vld [vmem:[%s3416_s0 + $0x2e8] ss:$12 sps:$4 sm:$0xff]  }
  0x54   :  { %440 = vmatprep.mubr.bf16.mxu0 %v2476_v52  ;;  %795 = vmatprep.mubr.bf16.mxu1 %v2478_v53 }
  0x5b   :  { %441 = vmatmul.mubr.bf16.gmra.mrb[28].mxu0 %v2480_v54  ;;  %796 = vmatmul.mubr.bf16.gmra.mrb[36].mxu1 %v2481_v55 }
  0x5c   :  { %803 = vmatprep.mubr.bf16.mxu1 %v2482_v56  ;;  %2348 = vmatprep.mubr.msk.bf16.mxu0 %vm327_vm0, %v2484_v57 }
  0x63   :  { %804 = vmatmul.mubr.bf16.gmra.mrb[40].mxu1 %v2485_v58  ;;  %2349 = vmatmul.mubr.msk.bf16.vlgmr.msra.gmra.mrb[32].mxu0 %vm327_vm0, %v2486_v59 }
  0x64   :  { %2365 = vmatpush3.bf16.msra.mxu0 %v2588_v1  ;;  %811 = vmatprep.mubr.bf16.mxu1 %v2487_v60 }
  0x65   :  { %2352 = vmatprep.mubr.msk.bf16.mxu0 %vm327_vm0, %v2489_v61  ;;  %2366 = vmatprep.subr.bf16.mxu0 %v2607_v4 }
  0x68   :  { %2367 = vmatpush3.bf16.msra.mxu0 %v2607_v4 }
  0x69   :  { %2368 = vmatprep.subr.bf16.mxu0 %v2624_v7 }
  0x6b   :  { %812 = vmatmul.mubr.bf16.gmra.mrb[44].mxu1 %v2490_v62  ;;  %2353 = vmatmul.mubr.msk.bf16.gmra.mrb[36].mxu0 %vm327_vm0, %v2491_v63 }
  0x6c   :  { %2356 = vmatprep.mubr.msk.bf16.mxu0 %vm327_vm0, %v2492_v12  ;;  %1126 = vmatprep.mubr.bf16.mxu1 %v2495_v14 }
  0x6d   :  { %2369 = vmatpush3.bf16.msra.mxu0 %v2624_v7 }
  0x6e   :  { %2370 = vmatprep.subr.bf16.mxu0 %v2643_v10 }
  0x71   :  { %2371 = vmatpush3.bf16.msra.mxu0 %v2643_v10 }
  0x72   :  { %2240 = vmatprep.subr.bf16.mxu0 %v2583_v0  ;;  %v2502_v0 = vld [vmem:[%s3416_s0 + $0x1b4] ss:$12 sps:$4 sm:$0xff]  }
  0x73   :  { %2357 = vmatmul.mubr.msk.bf16.gmra.mrb[40].mxu0 %vm327_vm0, %v2496_v20  ;;  %1127 = vmatmul.mubr.bf16.vlgmr.msra.gmra.mrb[48].mxu1 %v2493_v17 }
  0x74   :  { %2360 = vmatprep.mubr.msk.bf16.mxu0 %vm327_vm0, %v2497_v23  ;;  %1134 = vmatprep.mubr.bf16.mxu1 %v2498_v24 }
  0x75   :  { %2389 = vmatpush3.bf16.msra.mxu1 %v2588_v1  ;;  %v2505_v1 = vld [vmem:[%s3416_s0 + $0x1b0] ss:$12 sps:$4 sm:$0xff]  }
  0x76   :  { %2390 = vmatprep.subr.bf16.mxu1 %v2607_v4 }
  0x79   :  { %2391 = vmatpush3.bf16.msra.mxu1 %v2607_v4  ;;  %v2506_v4 = vld [vmem:[%s3416_s0 + $0x1a0] ss:$12 sps:$4 sm:$0xff]  }
  0x7a   :  { %2392 = vmatprep.subr.bf16.mxu1 %v2624_v7 }
  0x7b   :  { %2361 = vmatmul.mubr.msk.bf16.gmra.mrb[44].mxu0 %vm327_vm0, %v2500_v26  ;;  %1135 = vmatmul.mubr.bf16.gmra.mrb[52].mxu1 %v2501_v27 }
  0x7c   :  { %1142 = vmatprep.mubr.bf16.mxu1 %v2502_v0  ;;  %2372 = vmatprep.mubr.msk.bf16.mxu0 %vm327_vm0, %v2504_v28 }
  0x7d   :  { %2393 = vmatpush3.bf16.msra.mxu1 %v2624_v7  ;;  %v2510_v7 = vld [vmem:[%s3416_s0 + $0x1c8] ss:$12 sps:$4 sm:$0xff]  }
  0x7e   :  { %2394 = vmatprep.subr.bf16.mxu1 %v2643_v10 }
  0x81   :  { %2395 = vmatpush3.bf16.msra.mxu1 %v2643_v10  ;;  %v2512_v10 = vld [vmem:[%s3416_s0 + $0x1e4] ss:$12 sps:$4 sm:$0xff]  }
  0x83   :  { %1143 = vmatmul.mubr.bf16.gmra.mrb[56].mxu1 %v2505_v1  ;;  %2373 = vmatmul.mubr.msk.bf16.vlgmr.msra.gmra.mrb[48].mxu0 %vm327_vm0, %v2506_v4 }
  0x84   :  { %2241 = vmatpush3.bf16.msra.mxu0 %v2594_v2  ;;  %1150 = vmatprep.mubr.bf16.mxu1 %v2507_v29  ;;  %v2514_v2 = vld [vmem:[%s3416_s0 + $0x1e8] ss:$12 sps:$4 sm:$0xff]  }
  0x85   :  { %2242 = vmatprep.subr.bf16.mxu0 %v2600_v3  ;;  %2376 = vmatprep.mubr.msk.bf16.mxu0 %vm327_vm0, %v2509_v30  ;;  %v2515_v3 = vld [vmem:[%s3416_s0 + $0x1e0] ss:$12 sps:$4 sm:$0xff]  }
  0x88   :  { %2243 = vmatpush3.bf16.msra.mxu0 %v2613_v5  ;;  %v2516_v5 = vld [vmem:[%s3416_s0 + $0x200] ss:$12 sps:$4 sm:$0xff]  }
  0x89   :  { %2244 = vmatprep.subr.bf16.mxu0 %v2619_v6  ;;  %v2517_v6 = vld [vmem:[%s3416_s0 + $0x1fc] ss:$12 sps:$4 sm:$0xff]  }
  0x8b   :  { %1151 = vmatmul.mubr.bf16.gmra.mrb[60].mxu1 %v2510_v7  ;;  %2377 = vmatmul.mubr.msk.bf16.gmra.mrb[52].mxu0 %vm327_vm0, %v2511_v31 }
  0x8c   :  { %2245 = vmatpush3.bf16.msra.mxu0 %v2631_v8  ;;  %1158 = vmatprep.mubr.bf16.mxu1 %v2512_v10  ;;  %v2519_v8 = vld [vmem:[%s3416_s0 + $0x218] ss:$12 sps:$4 sm:$0xff]  }
  0x8d   :  { %2246 = vmatprep.subr.bf16.mxu0 %v2638_v9  ;;  %2380 = vmatprep.mubr.msk.bf16.mxu0 %vm327_vm0, %v2514_v2  ;;  %v2520_v9 = vld [vmem:[%s3416_s0 + $0x1f8] ss:$12 sps:$4 sm:$0xff]  }
  0x90   :  { %2247 = vmatpush3.bf16.msra.mxu0 %v2648_v11  ;;  %v2521_v11 = vld [vmem:[%s3416_s0 + $0x230] ss:$12 sps:$4 sm:$0xff]  }
  0x91   :  { %2248 = vmatprep.subr.bf16.mxu0 %v2660_v13  ;;  %v2522_v13 = vld [vmem:[%s3416_s0 + $0x214] ss:$12 sps:$4 sm:$0xff]  }
  0x93   :  { %1159 = vmatmul.mubr.bf16.gmra.mrb[64].mxu1 %v2515_v3  ;;  %2381 = vmatmul.mubr.msk.bf16.gmra.mrb[56].mxu0 %vm327_vm0, %v2516_v5 }
  0x94   :  { %2249 = vmatpush3.bf16.msra.mxu0 %v2671_v15  ;;  %1166 = vmatprep.mubr.bf16.mxu1 %v2517_v6  ;;  %v2526_v15 = vld [vmem:[%s3416_s0 + $0x244] ss:$12 sps:$4 sm:$0xff]  }
  0x95   :  { %2250 = vmatprep.subr.bf16.mxu0 %v2678_v16  ;;  %2384 = vmatprep.mubr.msk.bf16.mxu0 %vm327_vm0, %v2519_v8  ;;  %v2524_v16 = vld [vmem:[%s3416_s0 + $0x240] ss:$12 sps:$4 sm:$0xff]  }
  0x98   :  { %2251 = vmatpush3.bf16.msra.mxu0 %v2689_v18  ;;  %v2527_v18 = vld [vmem:[%s3416_s0 + $0x210] ss:$12 sps:$4 sm:$0xff]  }
  0x99   :  { %2252 = vmatprep.subr.bf16.mxu0 %v2696_v19  ;;  %v2528_v19 = vld [vmem:[%s3416_s0 + $0x22c] ss:$12 sps:$4 sm:$0xff]  }
  0x9b   :  { %1167 = vmatmul.mubr.bf16.gmra.mrb[68].mxu1 %v2520_v9  ;;  %2385 = vmatmul.mubr.msk.bf16.gmra.mrb[60].mxu0 %vm327_vm0, %v2521_v11 }
  0x9c   :  { %2253 = vmatpush3.bf16.msra.mxu0 %v2705_v21  ;;  %1174 = vmatprep.mubr.bf16.mxu1 %v2522_v13  ;;  %v2530_v21 = vld [vmem:[%s3416_s0 + $0x25c] ss:$12 sps:$4 sm:$0xff]  }
  0x9d   :  { %2254 = vmatprep.subr.bf16.mxu0 %v2712_v22  ;;  %1497 = vmatprep.mubr.bf16.mxu0 %v2526_v15  ;;  %v2532_v22 = vld [vmem:[%s3416_s0 + $0x228] ss:$12 sps:$4 sm:$0xff]  }
  0xa0   :  { %2255 = vmatpush3.bf16.msra.mxu0 %v2728_v25  ;;  %v2533_v25 = vld [vmem:[%s3416_s0 + $0x258] ss:$12 sps:$4 sm:$0xff]  }
  0xa3   :  { %1175 = vmatmul.mubr.bf16.gmra.mrb[72].mxu1 %v2527_v18  ;;  %1498 = vmatmul.mubr.bf16.vlgmr.msra.gmra.mrb[64].mxu0 %v2524_v16 }
  0xa4   :  { %1182 = vmatprep.mubr.bf16.mxu1 %v2528_v19  ;;  %1505 = vmatprep.mubr.bf16.mxu0 %v2530_v21 }
  0xab   :  { %1183 = vmatmul.mubr.bf16.gmra.mrb[76].mxu1 %v2532_v22  ;;  %1506 = vmatmul.mubr.bf16.gmra.mrb[68].mxu0 %v2533_v25 }
  0xac   :  { %1513 = vmatprep.mubr.bf16.mxu0 %v2534_v32  ;;  %2396 = vmatprep.mubr.msk.bf16.mxu1 %vm327_vm0, %v2536_v33 }
  0xb3   :  { %1514 = vmatmul.mubr.bf16.gmra.mrb[72].mxu0 %v2537_v34  ;;  %2397 = vmatmul.mubr.msk.bf16.vlgmr.msra.gmra.mrb[80].mxu1 %vm327_vm0, %v2538_v35 }
  0xb4   :  { %1521 = vmatprep.mubr.bf16.mxu0 %v2539_v36  ;;  %2400 = vmatprep.mubr.msk.bf16.mxu1 %vm327_vm0, %v2541_v37 }
  0xbb   :  { %1522 = vmatmul.mubr.bf16.gmra.mrb[76].mxu0 %v2542_v38  ;;  %2401 = vmatmul.mubr.msk.bf16.gmra.mrb[84].mxu1 %vm327_vm0, %v2543_v39 }
  0xbc   :  { %1529 = vmatprep.mubr.bf16.mxu0 %v2544_v40  ;;  %2404 = vmatprep.mubr.msk.bf16.mxu1 %vm327_vm0, %v2547_v41 }
  0xc3   :  { %1530 = vmatmul.mubr.bf16.gmra.mrb[80].mxu0 %v2546_v42  ;;  %2405 = vmatmul.mubr.msk.bf16.gmra.mrb[88].mxu1 %vm327_vm0, %v2548_v43 }
  0xc4   :  { %1537 = vmatprep.mubr.bf16.mxu0 %v2549_v44  ;;  %2408 = vmatprep.mubr.msk.bf16.mxu1 %vm327_vm0, %v2555_v45 }
  0xcb   :  { %1538 = vmatmul.mubr.bf16.gmra.mrb[84].mxu0 %v2551_v46  ;;  %2409 = vmatmul.mubr.msk.bf16.gmra.mrb[92].mxu1 %vm327_vm0, %v2556_v47 }
  0xcc   :  { %1545 = vmatprep.mubr.bf16.mxu0 %v2552_v48 }
  0xd3   :  { %1546 = vmatmul.mubr.bf16.gmra.mrb[88].mxu0 %v2554_v49 }
  0xd4   :  { %1553 = vmatprep.mubr.bf16.mxu0 %v2557_v50 }
  0xdb   :  { %1554 = vmatmul.mubr.bf16.gmra.mrb[92].mxu0 %v2559_v51 }
  0xe6   :  { %v2326_v52 = vpop.f32.mrb[0].mxu1 }
  0xe7   :  { %v483_v53 = vpop.f32.mrb[1].mxu1 }
  0xe8   :  { %v2327_v54 = vpop.f32.mrb[2].mxu1 }
  0xe9   :  { %v486_v55 = vpop.f32.mrb[3].mxu1 }
  0xee   :  { %v2330_v56 = vpop.f32.mrb[4].mxu1 }
  0xef   :  { %v499_v57 = vpop.f32.mrb[5].mxu1 }
  0xf0   :  { %v2331_v58 = vpop.f32.mrb[6].mxu1 }
  0xf1   :  { %v502_v59 = vpop.f32.mrb[7].mxu1 }
  0xf6   :  { %v2028_v60 = vpop.f32.mrb[0].mxu0  ;;  %v3096_v61 = vpop.f32.mrb[8].mxu1 }
  0xf7   :  { %v2029_v62 = vpop.f32.mrb[1].mxu0  ;;  %v515_v63 = vpop.f32.mrb[9].mxu1 }
  0xf8   :  { %v2030_v12 = vadd.f32 %v2029_v62, %v2028_v60  ;;  %v2031_v14 = vpop.f32.mrb[2].mxu0  ;;  %v3098_v17 = vpop.f32.mrb[10].mxu1 }
  0xf9   :  { %v2032_v20 = vpop.f32.mrb[3].mxu0  ;;  %v518_v23 = vpop.f32.mrb[11].mxu1 }
  0xfa   :  { %v3100_v24 = vadd.f32 %v2030_v12, %v483_v53  ;;  %v2033_v26 = vadd.f32 %v2032_v20, %v2031_v14 }
  0xfc   :  { %v3102_v27 = vadd.f32 %v2033_v26, %v486_v55 }
  0xfe   :  { %v2034_v0 = vpop.f32.mrb[4].mxu0  ;;  %v3104_v28 = vpop.f32.mrb[12].mxu1 }
  0xff   :  { %v2035_v1 = vpop.f32.mrb[5].mxu0  ;;  %v3106_v4 = vpop.f32.mrb[13].mxu1 }
 0x100   :  { %v2036_v29 = vadd.f32 %v2035_v1, %v2034_v0  ;;  %v2037_v30 = vpop.f32.mrb[6].mxu0  ;;  %v3108_v7 = vpop.f32.mrb[14].mxu1 }
 0x101   :  { %v2038_v31 = vpop.f32.mrb[7].mxu0  ;;  %v3110_v10 = vpop.f32.mrb[15].mxu1 }
 0x102   :  { %v3112_v2 = vadd.f32 %v2326_v52, %v2036_v29  ;;  %v2039_v3 = vadd.f32 %v2038_v31, %v2037_v30 }
 0x104   :  { %v3114_v5 = vadd.f32 %v2327_v54, %v2039_v3 }
 0x106   :  { %v2040_v6 = vpop.f32.mrb[8].mxu0  ;;  %v2104_v8 = vpop.f32.mrb[16].mxu1 }
 0x107   :  { %v2041_v9 = vpop.f32.mrb[9].mxu0  ;;  %v2105_v11 = vpop.f32.mrb[17].mxu1 }
 0x108   :  { %v2042_v13 = vadd.f32 %v2041_v9, %v2040_v6  ;;  %v2043_v15 = vpop.f32.mrb[10].mxu0  ;;  %v3116_v16 = vadd.f32 %v2105_v11, %v2104_v8  ;;  %v2107_v18 = vpop.f32.mrb[18].mxu1 }
 0x109   :  { %v2044_v19 = vpop.f32.mrb[11].mxu0  ;;  %v2108_v21 = vpop.f32.mrb[19].mxu1 }
 0x10a   :  { %v3118_v22 = vadd.f32 %v2042_v13, %v499_v57  ;;  %v2045_v25 = vadd.f32 %v2044_v19, %v2043_v15  ;;  %v3120_v32 = vadd.f32 %v2108_v21, %v2107_v18 }
 0x10c   :  { %v3122_v33 = vadd.f32 %v2045_v25, %v502_v59 }
 0x10e   :  { %v2046_v34 = vpop.f32.mrb[12].mxu0  ;;  %v2110_v35 = vpop.f32.mrb[20].mxu1 }
 0x10f   :  { %v2047_v36 = vpop.f32.mrb[13].mxu0  ;;  %v2111_v37 = vpop.f32.mrb[21].mxu1 }
 0x110   :  { %v2048_v38 = vadd.f32 %v2047_v36, %v2046_v34  ;;  %v2049_v39 = vpop.f32.mrb[14].mxu0  ;;  %v3124_v40 = vadd.f32 %v2111_v37, %v2110_v35  ;;  %v2113_v41 = vpop.f32.mrb[22].mxu1 }
 0x111   :  { %v2050_v42 = vpop.f32.mrb[15].mxu0  ;;  %v2114_v43 = vpop.f32.mrb[23].mxu1 }
 0x112   :  { %v3126_v44 = vadd.f32 %v2330_v56, %v2048_v38  ;;  %v2051_v45 = vadd.f32 %v2050_v42, %v2049_v39  ;;  %v3128_v46 = vadd.f32 %v2114_v43, %v2113_v41 }
 0x114   :  { %v3130_v47 = vadd.f32 %v2331_v58, %v2051_v45 }
 0x116   :  { %v2052_v48 = vpop.f32.mrb[16].mxu0  ;;  %v2116_v49 = vpop.f32.mrb[24].mxu1 }
 0x117   :  { %v2053_v50 = vpop.f32.mrb[17].mxu0  ;;  %v2117_v51 = vpop.f32.mrb[25].mxu1 }
 0x118   :  { %v2054_v52 = vadd.f32 %v2053_v50, %v2052_v48  ;;  %v2055_v53 = vpop.f32.mrb[18].mxu0  ;;  %v3132_v54 = vadd.f32 %v2117_v51, %v2116_v49  ;;  %v2119_v55 = vpop.f32.mrb[26].mxu1 }
 0x119   :  { %v2056_v57 = vpop.f32.mrb[19].mxu0  ;;  %v2120_v59 = vpop.f32.mrb[27].mxu1 }
 0x11a   :  { %v3134_v60 = vadd.f32 %v2054_v52, %v515_v63  ;;  %v2057_v56 = vadd.f32 %v2056_v57, %v2055_v53  ;;  %v3136_v62 = vadd.f32 %v2120_v59, %v2119_v55 }
 0x11c   :  { %v3138_v12 = vadd.f32 %v2057_v56, %v518_v23 }
 0x11e   :  { %v2058_v58 = vpop.f32.mrb[20].mxu0  ;;  %v2122_v14 = vpop.f32.mrb[28].mxu1 }
 0x11f   :  { %v2059_v20 = vpop.f32.mrb[21].mxu0  ;;  %v2123_v26 = vpop.f32.mrb[29].mxu1 }
 0x120   :  { %v2060_v0 = vadd.f32 %v2059_v20, %v2058_v58  ;;  %v2061_v1 = vpop.f32.mrb[22].mxu0  ;;  %v2124_v29 = vadd.f32 %v2123_v26, %v2122_v14  ;;  %v2125_v30 = vpop.f32.mrb[30].mxu1 }
 0x121   :  { %v2062_v31 = vpop.f32.mrb[23].mxu0  ;;  %v2126_v3 = vpop.f32.mrb[31].mxu1 }
 0x122   :  { %v3141_v6 = vadd.f32 %v3096_v61, %v2060_v0  ;;  %v2063_v63 = vadd.f32 %v2062_v31, %v2061_v1  ;;  %v2127_v8 = vadd.f32 %v2126_v3, %v2125_v30 }
 0x124   :  { %v3144_v9 = vadd.f32 %v3098_v17, %v2063_v63 }
 0x126   :  { %v2064_v23 = vpop.f32.mrb[24].mxu0  ;;  %v2128_v11 = vpop.f32.mrb[32].mxu1 }
 0x127   :  { %v2065_v13 = vpop.f32.mrb[25].mxu0  ;;  %v2129_v15 = vpop.f32.mrb[33].mxu1 }
 0x128   :  { %v2066_v18 = vadd.f32 %v2065_v13, %v2064_v23  ;;  %v2067_v19 = vpop.f32.mrb[26].mxu0  ;;  %v3146_v21 = vadd.f32 %v2129_v15, %v2128_v11  ;;  %v2131_v25 = vpop.f32.mrb[34].mxu1 }
 0x129   :  { %v2068_v34 = vpop.f32.mrb[27].mxu0  ;;  %v2132_v35 = vpop.f32.mrb[35].mxu1 }
 0x12a   :  { %v3149_v36 = vadd.f32 %v2066_v18, %v3106_v4  ;;  %v2069_v61 = vadd.f32 %v2068_v34, %v2067_v19  ;;  %v3151_v37 = vadd.f32 %v2132_v35, %v2131_v25 }
 0x12c   :  { %3427 = vst [vmem:[#allocation2_spill] sm:$0xff] %v3149_v36  ;;  %v3154_v17 = vadd.f32 %v2069_v61, %v3110_v10 }
 0x12e   :  { %3428 = vst [vmem:[#allocation3_spill] sm:$0xff] %v3154_v17  ;;  %v2070_v38 = vpop.f32.mrb[28].mxu0  ;;  %v2134_v39 = vpop.f32.mrb[36].mxu1 }
 0x12f   :  { %v2071_v41 = vpop.f32.mrb[29].mxu0  ;;  %v2135_v42 = vpop.f32.mrb[37].mxu1 }
 0x130   :  { %v2072_v43 = vadd.f32 %v2071_v41, %v2070_v38  ;;  %v2073_v45 = vpop.f32.mrb[30].mxu0  ;;  %v2136_v48 = vadd.f32 %v2135_v42, %v2134_v39  ;;  %v2137_v49 = vpop.f32.mrb[38].mxu1 }
 0x131   :  { %v2074_v50 = vpop.f32.mrb[31].mxu0  ;;  %v2138_v51 = vpop.f32.mrb[39].mxu1 }
 0x132   :  { %v3157_v52 = vadd.f32 %v3104_v28, %v2072_v43  ;;  %v2075_v4 = vadd.f32 %v2074_v50, %v2073_v45  ;;  %v2139_v53 = vadd.f32 %v2138_v51, %v2137_v49 }
 0x134   :  { %3429 = vst [vmem:[#allocation4_spill] sm:$0xff] %v3157_v52  ;;  %v3160_v55 = vadd.f32 %v3108_v7, %v2075_v4 }
 0x136   :  { %3430 = vst [vmem:[#allocation5_spill] sm:$0xff] %v3160_v55  ;;  %v2350_v10 = vpop.f32.mrb[32].mxu0  ;;  %v2140_v57 = vpop.f32.mrb[40].mxu1 }
 0x137   :  { %v3163_v59 = vadd.f32 %v2350_v10, %v3124_v40  ;;  %v854_v56 = vpop.f32.mrb[33].mxu0  ;;  %v2141_v58 = vpop.f32.mrb[41].mxu1 }
 0x138   :  { %v3166_v14 = vadd.f32 %v3116_v16, %v854_v56  ;;  %v2351_v20 = vpop.f32.mrb[34].mxu0  ;;  %v2142_v26 = vadd.f32 %v2141_v58, %v2140_v57  ;;  %v2143_v0 = vpop.f32.mrb[42].mxu1 }
 0x139   :  { %v3171_v1 = vadd.f32 %v2351_v20, %v3128_v46  ;;  %v857_v7 = vpop.f32.mrb[35].mxu0  ;;  %v2144_v30 = vpop.f32.mrb[43].mxu1 }
 0x13a   :  { %v3176_v31 = vadd.f32 %v3120_v32, %v857_v7  ;;  %v2145_v3 = vadd.f32 %v2144_v30, %v2143_v0 }
 0x13e   :  { %v2354_v23 = vpop.f32.mrb[36].mxu0  ;;  %v2146_v11 = vpop.f32.mrb[44].mxu1 }
 0x13f   :  { %v3182_v13 = vadd.f32 %v2354_v23, %v2124_v29  ;;  %v870_v46 = vpop.f32.mrb[37].mxu0  ;;  %v2147_v15 = vpop.f32.mrb[45].mxu1 }
 0x140   :  { %v3185_v18 = vadd.f32 %v3132_v54, %v870_v46  ;;  %v2355_v19 = vpop.f32.mrb[38].mxu0  ;;  %v2148_v25 = vadd.f32 %v2147_v15, %v2146_v11  ;;  %v2149_v32 = vpop.f32.mrb[46].mxu1 }
 0x141   :  { %v3189_v35 = vadd.f32 %v2355_v19, %v2127_v8  ;;  %v873_v61 = vpop.f32.mrb[39].mxu0  ;;  %v2150_v38 = vpop.f32.mrb[47].mxu1 }
 0x142   :  { %v3194_v29 = vadd.f32 %v3136_v62, %v873_v61  ;;  %v2151_v41 = vadd.f32 %v2150_v38, %v2149_v32 }
 0x146   :  { %v2358_v43 = vpop.f32.mrb[40].mxu0  ;;  %v2180_v45 = vpop.f32.mrb[48].mxu1 }
 0x147   :  { %v3200_v49 = vadd.f32 %v2358_v43, %v2136_v48  ;;  %v886_v8 = vpop.f32.mrb[41].mxu0  ;;  %v2181_v50 = vpop.f32.mrb[49].mxu1 }
 0x148   :  { %v3203_v51 = vadd.f32 %v3146_v21, %v886_v8  ;;  %v2359_v4 = vpop.f32.mrb[42].mxu0  ;;  %v2182_v10 = vadd.f32 %v2181_v50, %v2180_v45  ;;  %v2183_v62 = vpop.f32.mrb[50].mxu1 }
 0x149   :  { %v3207_v56 = vadd.f32 %v2359_v4, %v2139_v53  ;;  %v889_v58 = vpop.f32.mrb[43].mxu0  ;;  %v2184_v20 = vpop.f32.mrb[51].mxu1 }
 0x14a   :  { %v3212_v48 = vadd.f32 %v3151_v37, %v889_v58  ;;  %v2185_v7 = vadd.f32 %v2184_v20, %v2183_v62 }
 0x14e   :  { %v2362_v23 = vpop.f32.mrb[44].mxu0  ;;  %v2186_v11 = vpop.f32.mrb[52].mxu1 }
 0x14f   :  { %v3218_v46 = vadd.f32 %v2362_v23, %v2148_v25  ;;  %v902_v53 = vpop.f32.mrb[45].mxu0  ;;  %v2187_v15 = vpop.f32.mrb[53].mxu1 }
 0x150   :  { %v3220_v19 = vadd.f32 %v2142_v26, %v902_v53  ;;  %v2363_v32 = vpop.f32.mrb[46].mxu0  ;;  %v2188_v61 = vadd.f32 %v2187_v15, %v2186_v11  ;;  %v2189_v38 = vpop.f32.mrb[54].mxu1 }
 0x151   :  { %3431 = vst [vmem:[#allocation6_spill] sm:$0xff] %v3218_v46  ;;  %v3224_v43 = vadd.f32 %v2363_v32, %v2151_v41  ;;  %v905_v45 = vpop.f32.mrb[47].mxu0  ;;  %v2190_v8 = vpop.f32.mrb[55].mxu1 }
 0x152   :  { %3432 = vst [vmem:[#allocation7_spill] sm:$0xff] %v3220_v19  ;;  %v3228_v4 = vadd.f32 %v2145_v3, %v905_v45  ;;  %v2191_v25 = vadd.f32 %v2190_v8, %v2189_v38 }
 0x153   :  { %3433 = vst [vmem:[#allocation8_spill] sm:$0xff] %v3224_v43 }
 0x154   :  { %3434 = vst [vmem:[#allocation9_spill] sm:$0xff] %v3228_v4 }
 0x156   :  { %v2374_v58 = vpop.f32.mrb[48].mxu0  ;;  %v2192_v20 = vpop.f32.mrb[56].mxu1 }
 0x157   :  { %v3234_v23 = vadd.f32 %v2374_v58, %v2188_v61  ;;  %v1225_v41 = vpop.f32.mrb[49].mxu0  ;;  %v2193_v11 = vpop.f32.mrb[57].mxu1 }
 0x158   :  { %v3236_v53 = vadd.f32 %v2182_v10, %v1225_v41  ;;  %v2375_v15 = vpop.f32.mrb[50].mxu0  ;;  %v2194_v32 = vadd.f32 %v2193_v11, %v2192_v20  ;;  %v2195_v37 = vpop.f32.mrb[58].mxu1 }
 0x159   :  { %v3238_v3 = vadd.f32 %v2375_v15, %v2191_v25  ;;  %v1228_v38 = vpop.f32.mrb[51].mxu0  ;;  %v2196_v45 = vpop.f32.mrb[59].mxu1 }
 0x15a   :  { %v3240_v8 = vadd.f32 %v2185_v7, %v1228_v38  ;;  %v2197_v26 = vadd.f32 %v2196_v45, %v2195_v37 }
 0x15e   :  { %v2198_v50 = vpop.f32.mrb[60].mxu1  ;;  %v2378_v62 = vpop.f32.mrb[52].mxu0 }
 0x15f   :  { %v2199_v21 = vpop.f32.mrb[61].mxu1  ;;  %v1241_v57 = vpop.f32.mrb[53].mxu0 }
 0x160   :  { %v2200_v61 = vadd.f32 %v2199_v21, %v2198_v50  ;;  %v3242_v58 = vadd.f32 %v2194_v32, %v1241_v57  ;;  %v2201_v30 = vpop.f32.mrb[62].mxu1  ;;  %v2379_v10 = vpop.f32.mrb[54].mxu0 }
 0x161   :  { %v2202_v41 = vpop.f32.mrb[63].mxu1  ;;  %v1244_v0 = vpop.f32.mrb[55].mxu0 }
 0x162   :  { %v3244_v20 = vadd.f32 %v2378_v62, %v2200_v61  ;;  %v2203_v25 = vadd.f32 %v2202_v41, %v2201_v30  ;;  %v3246_v11 = vadd.f32 %v2197_v26, %v1244_v0 }
 0x164   :  { %v3248_v15 = vadd.f32 %v2379_v10, %v2203_v25 }
 0x166   :  { %v2204_v7 = vpop.f32.mrb[64].mxu1  ;;  %v2382_v37 = vpop.f32.mrb[56].mxu0 }
 0x167   :  { %v2205_v38 = vpop.f32.mrb[65].mxu1  ;;  %v1257_v45 = vpop.f32.mrb[57].mxu0 }
 0x168   :  { %v2206_v54 = vadd.f32 %v2205_v38, %v2204_v7  ;;  %v2207_v42 = vpop.f32.mrb[66].mxu1  ;;  %v2383_v21 = vpop.f32.mrb[58].mxu0 }
 0x169   :  { %v2208_v57 = vpop.f32.mrb[67].mxu1  ;;  %v1260_v50 = vpop.f32.mrb[59].mxu0 }
 0x16a   :  { %v3250_v32 = vadd.f32 %v2206_v54, %v1257_v45  ;;  %v2209_v34 = vadd.f32 %v2208_v57, %v2207_v42 }
 0x16c   :  { %v3252_v39 = vadd.f32 %v2209_v34, %v1260_v50 }
 0x16e   :  { %v2210_v62 = vpop.f32.mrb[68].mxu1  ;;  %v2386_v30 = vpop.f32.mrb[60].mxu0 }
 0x16f   :  { %v2211_v0 = vpop.f32.mrb[69].mxu1  ;;  %v1273_v26 = vpop.f32.mrb[61].mxu0 }
 0x170   :  { %v2212_v61 = vadd.f32 %v2211_v0, %v2210_v62  ;;  %v2213_v10 = vpop.f32.mrb[70].mxu1  ;;  %v2387_v41 = vpop.f32.mrb[62].mxu0 }
 0x171   :  { %v2214_v25 = vpop.f32.mrb[71].mxu1  ;;  %v1276_v63 = vpop.f32.mrb[63].mxu0 }
 0x172   :  { %v3254_v16 = vadd.f32 %v2382_v37, %v2212_v61  ;;  %v2215_v7 = vadd.f32 %v2214_v25, %v2213_v10 }
 0x174   :  { %v3256_v38 = vadd.f32 %v2383_v21, %v2215_v7 }
 0x176   :  { %v2216_v40 = vpop.f32.mrb[72].mxu1  ;;  %v2256_v54 = vpop.f32.mrb[64].mxu0 }
 0x177   :  { %v2217_v45 = vpop.f32.mrb[73].mxu1  ;;  %v2257_v42 = vpop.f32.mrb[65].mxu0 }
 0x178   :  { %v2218_v34 = vadd.f32 %v2217_v45, %v2216_v40  ;;  %v2258_v57 = vadd.f32 %v2257_v42, %v2256_v54  ;;  %v2219_v50 = vpop.f32.mrb[74].mxu1  ;;  %v2259_v28 = vpop.f32.mrb[66].mxu0 }
 0x179   :  { %v2220_v43 = vpop.f32.mrb[75].mxu1  ;;  %v2260_v55 = vpop.f32.mrb[67].mxu0 }
 0x17a   :  { %v3258_v62 = vadd.f32 %v2218_v34, %v1273_v26  ;;  %v2221_v0 = vadd.f32 %v2220_v43, %v2219_v50  ;;  %v2261_v46 = vadd.f32 %v2260_v55, %v2259_v28 }
 0x17c   :  { %v3260_v52 = vadd.f32 %v2221_v0, %v1276_v63 }
 0x17e   :  { %3435 = vst [vmem:[#allocation10_spill] sm:$0xff] %v3260_v52  ;;  %v2222_v37 = vpop.f32.mrb[76].mxu1  ;;  %v2262_v61 = vpop.f32.mrb[68].mxu0 }
 0x17f   :  { %v2223_v21 = vpop.f32.mrb[77].mxu1  ;;  %v2263_v10 = vpop.f32.mrb[69].mxu0 }
 0x180   :  { %v2224_v25 = vadd.f32 %v2223_v21, %v2222_v37  ;;  %v2264_v7 = vadd.f32 %v2263_v10, %v2262_v61  ;;  %v2225_v4 = vpop.f32.mrb[78].mxu1  ;;  %v2265_v17 = vpop.f32.mrb[70].mxu0 }
 0x181   :  { %v2226_v40 = vpop.f32.mrb[79].mxu1  ;;  %v2266_v54 = vpop.f32.mrb[71].mxu0 }
 0x182   :  { %v3262_v45 = vadd.f32 %v2386_v30, %v2224_v25  ;;  %v2227_v42 = vadd.f32 %v2226_v40, %v2225_v4  ;;  %v2267_v19 = vadd.f32 %v2266_v54, %v2265_v17  ;;  %v3270_v17 = vld [vmem:[%s3417_s2] ss:$0 sm:$0xff]  ;;  %v3436_v25 = vmax.f32 %v3112_v2, %v3163_v59 }
 0x183   :  { %v3439_v2 = vmax.f32 %v3102_v27, %v3176_v31 }
 0x184   :  { %v3264_v26 = vadd.f32 %v2387_v41, %v2227_v42  ;;  %v3438_v42 = vmax.f32 %v3114_v5, %v3171_v1 }
 0x186   :  { %v2268_v43 = vpop.f32.mrb[72].mxu0  ;;  %v2398_v55 = vpop.f32.mrb[80].mxu1 }
 0x187   :  { %v1605_v28 = vadd.f32 %v2398_v55, %v2264_v7  ;;  %v2269_v63 = vpop.f32.mrb[73].mxu0  ;;  %v1596_v34 = vpop.f32.mrb[81].mxu1 }
 0x188   :  { %v2270_v50 = vadd.f32 %v2269_v63, %v2268_v43  ;;  %v1597_v0 = vadd.f32 %v2258_v57, %v1596_v34  ;;  %v2271_v52 = vpop.f32.mrb[74].mxu0  ;;  %v2399_v37 = vpop.f32.mrb[82].mxu1 }
 0x189   :  { %v1677_v61 = vmax.f32 %v3234_v23, %v1605_v28  ;;  %v1608_v21 = vadd.f32 %v2399_v37, %v2267_v19  ;;  %v2272_v10 = vpop.f32.mrb[75].mxu0  ;;  %v1599_v36 = vpop.f32.mrb[83].mxu1  ;;  %v3437_v19 = vmax.f32 %v3100_v24, %v3166_v14 }
 0x18a   :  { %v1675_v4 = vmax.f32 %v3236_v53, %v1597_v0  ;;  %v2273_v30 = vadd.f32 %v2272_v10, %v2271_v52  ;;  %v1600_v41 = vadd.f32 %v2261_v46, %v1599_v36 }
 0x18b   :  { %v1693_v57 = vmax.f32 %v3436_v25, %v1677_v61  ;;  %v1678_v7 = vmax.f32 %v3238_v3, %v1608_v21 }
 0x18c   :  { %v1691_v23 = vmax.f32 %v3437_v19, %v1675_v4  ;;  %v1676_v40 = vmax.f32 %v3240_v8, %v1600_v41  ;;  %v3440_v4 = vmax.f32 %v3118_v22, %v3185_v18 }
 0x18d   :  { %v1716_v54 = vadd.f32 %v3270_v17, %v1693_v57  ;;  %v1694_v53 = vmax.f32 %v3438_v42, %v1678_v7  ;;  %v3441_v57 = vmax.f32 %v3126_v44, %v3182_v13 }
 0x18e   :  { %v1714_v36 = vadd.f32 %v3270_v17, %v1691_v23  ;;  %v1692_v52 = vmax.f32 %v3439_v2, %v1676_v40  ;;  %v2274_v59 = vpop.f32.mrb[76].mxu0  ;;  %v2402_v46 = vpop.f32.mrb[84].mxu1 }
 0x18f   :  { %v1732_v3 = vmax.f32 %v1716_v54, 0.0  ;;  %v1717_v24 = vadd.f32 %v3270_v17, %v1694_v53  ;;  %v2275_v14 = vpop.f32.mrb[77].mxu0  ;;  %v1612_v8 = vpop.f32.mrb[85].mxu1 }
 0x190   :  { %v1730_v43 = vmax.f32 %v1714_v36, 0.0  ;;  %v1715_v55 = vadd.f32 %v3270_v17, %v1692_v52  ;;  %v2276_v28 = vadd.f32 %v2275_v14, %v2274_v59  ;;  %v1613_v5 = vadd.f32 %v2270_v50, %v1612_v8  ;;  %v2277_v1 = vpop.f32.mrb[78].mxu0  ;;  %v2403_v63 = vpop.f32.mrb[86].mxu1 }
 0x191   :  { %1749 = vst.msk [vmem:[%s3418_s3 + $0x10] sm:$0xff] %vm1746_vm1, %v1732_v3  ;;  %v1733_v27 = vmax.f32 %v1717_v24, 0.0  ;;  %v2278_v31 = vpop.f32.mrb[79].mxu0  ;;  %v1615_v34 = vpop.f32.mrb[87].mxu1  ;;  %v3444_v8 = vmax.f32 %v3134_v60, %v3203_v51 }
 0x192   :  { %1747 = vst.msk [vmem:[%s3418_s3] sm:$0xff] %vm1746_vm1, %v1730_v43  ;;  %v1731_v0 = vmax.f32 %v1715_v55, 0.0  ;;  %v1621_v37 = vadd.f32 %v2402_v46, %v2276_v28  ;;  %v1679_v61 = vmax.f32 %v3242_v58, %v1613_v5  ;;  %v2279_v50 = vadd.f32 %v2278_v31, %v2277_v1 }
 0x193   :  { %1750 = vst.msk [vmem:[%s3418_s3 + $0x18] sm:$0xff] %vm1746_vm1, %v1733_v27  ;;  %v1616_v21 = vadd.f32 %v2273_v30, %v1615_v34  ;;  %v3445_v27 = vmax.f32 %v3138_v12, %v3212_v48  ;;  %v3446_v48 = vmax.f32 %v3141_v6, %v3200_v49 }
 0x194   :  { %1748 = vst.msk [vmem:[%s3418_s3 + $0x8] sm:$0xff] %vm1746_vm1, %v1731_v0  ;;  %v1681_v10 = vmax.f32 %v3244_v20, %v1621_v37  ;;  %v1695_v41 = vmax.f32 %v3440_v4, %v1679_v61  ;;  %v1624_v25 = vadd.f32 %v2403_v63, %v2279_v50  ;;  %v3442_v20 = vmax.f32 %v3122_v33, %v3194_v29 }
 0x195   :  { %v1680_v58 = vmax.f32 %v3246_v11, %v1616_v21  ;;  %v3443_v11 = vmax.f32 %v3130_v47, %v3189_v35 }
 0x196   :  { %v1697_v7 = vmax.f32 %v3441_v57, %v1681_v10  ;;  %v1718_v30 = vadd.f32 %v3270_v17, %v1695_v41  ;;  %v1682_v19 = vmax.f32 %v3248_v15, %v1624_v25  ;;  %v2280_v23 = vpop.f32.mrb[80].mxu0  ;;  %v2406_v40 = vpop.f32.mrb[88].mxu1 }
 0x197   :  { %v1696_v54 = vmax.f32 %v3442_v20, %v1680_v58  ;;  %v2281_v42 = vpop.f32.mrb[81].mxu0  ;;  %v1628_v22 = vpop.f32.mrb[89].mxu1 }
 0x198   :  { %v1720_v18 = vadd.f32 %v3270_v17, %v1697_v7  ;;  %v1734_v53 = vmax.f32 %v1718_v30, 0.0  ;;  %v1698_v44 = vmax.f32 %v3443_v11, %v1682_v19  ;;  %v2282_v13 = vadd.f32 %v2281_v42, %v2280_v23  ;;  %v2283_v36 = vpop.f32.mrb[82].mxu0  ;;  %v2407_v2 = vpop.f32.mrb[90].mxu1  ;;  %v3451_v11 = vld [vmem:[#allocation10_spill] sm:$0xff] }
 0x199   :  { %v1719_v15 = vadd.f32 %v3270_v17, %v1696_v54  ;;  %v2284_v52 = vpop.f32.mrb[83].mxu0  ;;  %v1631_v59 = vpop.f32.mrb[91].mxu1  ;;  %v3447_v30 = vmax.f32 %v3144_v9, %v3207_v56  ;;  %v3448_v9 = vld [vmem:[#allocation2_spill] sm:$0xff]  ;;  %v3449_v56 = vld [vmem:[#allocation7_spill] sm:$0xff] }
 0x19a   :  { %v1736_v46 = vmax.f32 %v1720_v18, 0.0  ;;  %1751 = vst.msk [vmem:[%s3418_s3 + $0x20] sm:$0xff] %vm1746_vm1, %v1734_v53  ;;  %v1721_v33 = vadd.f32 %v3270_v17, %v1698_v44  ;;  %v2285_v29 = vadd.f32 %v2284_v52, %v2283_v36  ;;  %v1629_v3 = vadd.f32 %v2282_v13, %v1628_v22  ;;  %v3453_v52 = vld [vmem:[#allocation9_spill] sm:$0xff] }
 0x19b   :  { %v1735_v24 = vmax.f32 %v1719_v15, 0.0  ;;  %v3450_v18 = vmax.f32 %v3448_v9, %v3449_v56  ;;  %v3452_v15 = vld [vmem:[#allocation3_spill] sm:$0xff] }
 0x19c   :  { %1753 = vst.msk [vmem:[%s3418_s3 + $0x30] sm:$0xff] %vm1746_vm1, %v1736_v46  ;;  %v1737_v47 = vmax.f32 %v1721_v33, 0.0  ;;  %v1683_v35 = vmax.f32 %v3250_v32, %v1629_v3  ;;  %v1632_v14 = vadd.f32 %v2285_v29, %v1631_v59  ;;  %v3454_v59 = vmax.f32 %v3452_v15, %v3453_v52 }
 0x19d   :  { %1752 = vst.msk [vmem:[%s3418_s3 + $0x28] sm:$0xff] %vm1746_vm1, %v1735_v24 }
 0x19e   :  { %1754 = vst.msk [vmem:[%s3418_s3 + $0x38] sm:$0xff] %vm1746_vm1, %v1737_v47  ;;  %v1699_v43 = vmax.f32 %v3444_v8, %v1683_v35  ;;  %v1684_v55 = vmax.f32 %v3252_v39, %v1632_v14  ;;  %v2286_v28 = vpop.f32.mrb[84].mxu0  ;;  %v2410_v5 = vpop.f32.mrb[92].mxu1 }
 0x19f   :  { %v2287_v32 = vpop.f32.mrb[85].mxu0  ;;  %v1644_v1 = vpop.f32.mrb[93].mxu1 }
 0x1a0   :  { %v1722_v63 = vadd.f32 %v3270_v17, %v1699_v43  ;;  %v1700_v31 = vmax.f32 %v3445_v27, %v1684_v55  ;;  %v2288_v34 = vadd.f32 %v2287_v32, %v2286_v28  ;;  %v2289_v0 = vpop.f32.mrb[86].mxu0  ;;  %v2411_v37 = vpop.f32.mrb[94].mxu1  ;;  %v3455_v55 = vld [vmem:[#allocation4_spill] sm:$0xff]  ;;  %v3456_v28 = vld [vmem:[#allocation6_spill] sm:$0xff]  ;;  %v3458_v27 = vld [vmem:[#allocation5_spill] sm:$0xff] }
 0x1a1   :  { %v2290_v61 = vpop.f32.mrb[87].mxu0  ;;  %v1647_v50 = vpop.f32.mrb[95].mxu1  ;;  %v3457_v32 = vmax.f32 %v3455_v55, %v3456_v28 }
 0x1a2   :  { %v1738_v21 = vmax.f32 %v1722_v63, 0.0  ;;  %v1723_v60 = vadd.f32 %v3270_v17, %v1700_v31  ;;  %v1637_v51 = vadd.f32 %v2406_v40, %v2288_v34  ;;  %v2291_v39 = vadd.f32 %v2290_v61, %v2289_v0  ;;  %v3459_v31 = vld [vmem:[#allocation8_spill] sm:$0xff] }
 0x1a3   :  { %v3460_v34 = vmax.f32 %v3458_v27, %v3459_v31 }
 0x1a4   :  { %1755 = vst.msk [vmem:[%s3418_s3 + $0x40] sm:$0xff] %vm1746_vm1, %v1738_v21  ;;  %v1739_v10 = vmax.f32 %v1723_v60, 0.0  ;;  %v1685_v4 = vmax.f32 %v3254_v16, %v1637_v51  ;;  %v1640_v12 = vadd.f32 %v2407_v2, %v2291_v39 }
 0x1a6   :  { %1756 = vst.msk [vmem:[%s3418_s3 + $0x48] sm:$0xff] %vm1746_vm1, %v1739_v10  ;;  %v1701_v41 = vmax.f32 %v3446_v48, %v1685_v4  ;;  %v1686_v25 = vmax.f32 %v3256_v38, %v1640_v12  ;;  %v2292_v58 = vpop.f32.mrb[88].mxu0 }
 0x1a7   :  { %v2293_v57 = vpop.f32.mrb[89].mxu0 }
 0x1a8   :  { %v1724_v7 = vadd.f32 %v3270_v17, %v1701_v41  ;;  %v1702_v16 = vmax.f32 %v3447_v30, %v1686_v25  ;;  %v2294_v19 = vadd.f32 %v2293_v57, %v2292_v58  ;;  %v2295_v23 = vpop.f32.mrb[90].mxu0 }
 0x1a9   :  { %v2296_v40 = vpop.f32.mrb[91].mxu0 }
 0x1aa   :  { %v1740_v20 = vmax.f32 %v1724_v7, 0.0  ;;  %v1725_v54 = vadd.f32 %v3270_v17, %v1702_v16  ;;  %v2297_v42 = vadd.f32 %v2296_v40, %v2295_v23  ;;  %v1645_v22 = vadd.f32 %v2294_v19, %v1644_v1 }
 0x1ac   :  { %1757 = vst.msk [vmem:[%s3418_s3 + $0x50] sm:$0xff] %vm1746_vm1, %v1740_v20  ;;  %v1741_v6 = vmax.f32 %v1725_v54, 0.0  ;;  %v1687_v49 = vmax.f32 %v3258_v62, %v1645_v22  ;;  %v1648_v38 = vadd.f32 %v2297_v42, %v1647_v50 }
 0x1ae   :  { %1758 = vst.msk [vmem:[%s3418_s3 + $0x58] sm:$0xff] %vm1746_vm1, %v1741_v6  ;;  %v1703_v53 = vmax.f32 %v3450_v18, %v1687_v49  ;;  %v1688_v44 = vmax.f32 %v3451_v11, %v1648_v38  ;;  %v2298_v13 = vpop.f32.mrb[92].mxu0 }
 0x1af   :  { %v2299_v36 = vpop.f32.mrb[93].mxu0 }
 0x1b0   :  { %v1726_v2 = vadd.f32 %v3270_v17, %v1703_v53  ;;  %v1704_v62 = vmax.f32 %v3454_v59, %v1688_v44  ;;  %v2300_v46 = vadd.f32 %v2299_v36, %v2298_v13  ;;  %v2301_v33 = vpop.f32.mrb[94].mxu0 }
 0x1b1   :  { %v2302_v29 = vpop.f32.mrb[95].mxu0 }
 0x1b2   :  { %v1742_v3 = vmax.f32 %v1726_v2, 0.0  ;;  %v1727_v24 = vadd.f32 %v3270_v17, %v1704_v62  ;;  %v1653_v47 = vadd.f32 %v2410_v5, %v2300_v46  ;;  %v2303_v35 = vadd.f32 %v2302_v29, %v2301_v33 }
 0x1b4   :  { %1759 = vst.msk [vmem:[%s3418_s3 + $0x60] sm:$0xff] %vm1746_vm1, %v1742_v3  ;;  %v1743_v14 = vmax.f32 %v1727_v24, 0.0  ;;  %v1689_v8 = vmax.f32 %v3262_v45, %v1653_v47  ;;  %v1656_v43 = vadd.f32 %v2411_v37, %v2303_v35 }
 0x1b6   :  { %1760 = vst.msk [vmem:[%s3418_s3 + $0x68] sm:$0xff] %vm1746_vm1, %v1743_v14  ;;  %v1705_v1 = vmax.f32 %v3457_v32, %v1689_v8  ;;  %v1690_v5 = vmax.f32 %v3264_v26, %v1656_v43 }
 0x1b8   :  { %v1728_v63 = vadd.f32 %v3270_v17, %v1705_v1  ;;  %v1706_v0 = vmax.f32 %v3460_v34, %v1690_v5 }
 0x1ba   :  { %v1744_v61 = vmax.f32 %v1728_v63, 0.0  ;;  %v1729_v45 = vadd.f32 %v3270_v17, %v1706_v0 }
 0x1bc   :  { %1761 = vst.msk [vmem:[%s3418_s3 + $0x70] sm:$0xff] %vm1746_vm1, %v1744_v61  ;;  %v1745_v37 = vmax.f32 %v1729_v45, 0.0 }
 0x1be   :  { %1762 = vst.msk [vmem:[%s3418_s3 + $0x78] sm:$0xff] %vm1746_vm1, %v1745_v37 }

// kernel: conv_model_forward.9
= control target key start
LH: loop header
LB: loop body
LE: loop exit
PB: predicated region body
PF: predicated region fallthrough
CT: control target
= control target key end

     0   :  { %v271_v0 = vmov 0   ;;  %vm140_vm0 = vcmask 523264   ;;  %vm200_vm1 = vcmask 785408   ;;  %s379_s1 = inlined_call_operand.vmem [shape: bf16[192,96], index: 1, kind: input, shape index: {}]   ;;  %s380_s0 = inlined_call_operand.vmem [shape: bf16[32,192], index: 0, kind: input, shape index: {}]   ;;  %s381_s2 = inlined_call_operand.vmem [shape: f32[1,96], index: 2, kind: input, shape index: {}]   ;;  %s382_s3 = inlined_call_operand.vmem [shape: f32[32,96], index: 3, kind: output, shape index: {}]  }
   0x1   :  { %147 = vmatprep.subr.bf16.mxu0 %v271_v0  ;;  %228 = vmatprep.subr.bf16.mxu1 %v271_v0  ;;  %v253_v1 = vld [vmem:[%s379_s1] sm:$0xff]   ;;  %v254_v2 = vld [vmem:[%s379_s1 + $0x8] sm:$0xff]   ;;  %v255_v3 = vld [vmem:[%s379_s1 + $0x10] sm:$0xff]  }
   0x2   :  { %148 = vmatpush1.bf16.msra.mxu0 %v253_v1  ;;  %240 = vmatpush1.bf16.msra.mxu1 %v253_v1  ;;  %v256_v4 = vld [vmem:[%s379_s1 + $0x18] sm:$0xff]   ;;  %v267_v5 = vld [vmem:[%s380_s0 + $0x4] ss:$8 sps:$4 sm:$0xff]   ;;  %v259_v9 = vld [vmem:[%s379_s1 + $0x30] sm:$0xff]  }
   0x3   :  { %149 = vmatprep.subr.bf16.mxu0 %v271_v0  ;;  %229 = vmatprep.subr.bf16.mxu1 %v271_v0  ;;  %v257_v6 = vld [vmem:[%s379_s1 + $0x20] sm:$0xff]   ;;  %v270_v7 = vld [vmem:[%s380_s0 + $0x14] ss:$8 sps:$4 sm:$0xff]   ;;  %v258_v8 = vld [vmem:[%s379_s1 + $0x28] sm:$0xff]  }
   0x4   :  { %226 = vmatprep.mubr.msk.bf16.mxu0 %vm140_vm0, %v267_v5  ;;  %227 = vmatprep.mubr.msk.bf16.mxu1 %vm140_vm0, %v270_v7  ;;  %v260_v10 = vld [vmem:[%s379_s1 + $0x38] sm:$0xff]   ;;  %v261_v11 = vld [vmem:[%s379_s1 + $0x40] sm:$0xff]   ;;  %v262_v12 = vld [vmem:[%s379_s1 + $0x48] sm:$0xff]  }
   0x5   :  { %v263_v13 = vld [vmem:[%s379_s1 + $0x50] sm:$0xff]   ;;  %v264_v14 = vld [vmem:[%s379_s1 + $0x58] sm:$0xff]   ;;  %v265_v15 = vld [vmem:[%s380_s0] ss:$8 sps:$4 sm:$0xff]  }
   0x6   :  { %150 = vmatpush1.bf16.msra.mxu0 %v254_v2  ;;  %241 = vmatpush1.bf16.msra.mxu1 %v254_v2  ;;  %v268_v16 = vld [vmem:[%s380_s0 + $0x10] ss:$8 sps:$4 sm:$0xff]   ;;  %v209_v17 = vld [vmem:[%s381_s2] ss:$0 sm:$0xff] }
   0x7   :  { %151 = vmatprep.subr.bf16.mxu0 %v271_v0  ;;  %230 = vmatprep.subr.bf16.mxu1 %v271_v0 }
   0xa   :  { %152 = vmatpush1.bf16.msra.mxu0 %v255_v3  ;;  %242 = vmatpush1.bf16.msra.mxu1 %v255_v3 }
   0xb   :  { %153 = vmatprep.subr.bf16.mxu0 %v271_v0  ;;  %231 = vmatprep.subr.bf16.mxu1 %v271_v0 }
   0xe   :  { %154 = vmatpush1.bf16.msra.mxu0 %v256_v4  ;;  %243 = vmatpush1.bf16.msra.mxu1 %v256_v4 }
   0xf   :  { %155 = vmatprep.subr.bf16.mxu0 %v271_v0  ;;  %232 = vmatprep.subr.bf16.mxu1 %v271_v0 }
  0x12   :  { %156 = vmatpush1.bf16.msra.mxu0 %v257_v6  ;;  %244 = vmatpush1.bf16.msra.mxu1 %v257_v6 }
  0x13   :  { %157 = vmatprep.subr.bf16.mxu0 %v271_v0  ;;  %233 = vmatprep.subr.bf16.mxu1 %v271_v0 }
  0x16   :  { %158 = vmatpush1.bf16.msra.mxu0 %v258_v8  ;;  %245 = vmatpush1.bf16.msra.mxu1 %v258_v8 }
  0x17   :  { %159 = vmatprep.subr.bf16.mxu0 %v271_v0  ;;  %234 = vmatprep.subr.bf16.mxu1 %v271_v0 }
  0x1a   :  { %160 = vmatpush1.bf16.msra.mxu0 %v259_v9  ;;  %246 = vmatpush1.bf16.msra.mxu1 %v259_v9 }
  0x1b   :  { %161 = vmatprep.subr.bf16.mxu0 %v271_v0  ;;  %235 = vmatprep.subr.bf16.mxu1 %v271_v0 }
  0x1e   :  { %162 = vmatpush1.bf16.msra.mxu0 %v260_v10  ;;  %247 = vmatpush1.bf16.msra.mxu1 %v260_v10 }
  0x1f   :  { %163 = vmatprep.subr.bf16.mxu0 %v271_v0  ;;  %236 = vmatprep.subr.bf16.mxu1 %v271_v0 }
  0x22   :  { %164 = vmatpush1.bf16.msra.mxu0 %v261_v11  ;;  %248 = vmatpush1.bf16.msra.mxu1 %v261_v11 }
  0x23   :  { %165 = vmatprep.subr.bf16.mxu0 %v271_v0  ;;  %237 = vmatprep.subr.bf16.mxu1 %v271_v0 }
  0x26   :  { %166 = vmatpush1.bf16.msra.mxu0 %v262_v12  ;;  %249 = vmatpush1.bf16.msra.mxu1 %v262_v12 }
  0x27   :  { %167 = vmatprep.subr.bf16.mxu0 %v271_v0  ;;  %238 = vmatprep.subr.bf16.mxu1 %v271_v0 }
  0x2a   :  { %168 = vmatpush1.bf16.msra.mxu0 %v263_v13  ;;  %250 = vmatpush1.bf16.msra.mxu1 %v263_v13 }
  0x2b   :  { %169 = vmatprep.subr.bf16.mxu0 %v271_v0  ;;  %239 = vmatprep.subr.bf16.mxu1 %v271_v0 }
  0x2e   :  { %170 = vmatpush1.bf16.msra.mxu0 %v264_v14  ;;  %251 = vmatpush1.bf16.msra.mxu1 %v264_v14 }
  0x31   :  { %180 = vmatmul.mubr.bf16.vlgmr.msra.gmra.mrb[0].mxu0 %v265_v15  ;;  %188 = vmatmul.mubr.bf16.vlgmr.msra.gmra.mrb[0].mxu1 %v268_v16 }
 0x104   :  { %v181_v18 = vpop.f32.mrb[0].mxu0  ;;  %v189_v19 = vpop.f32.mrb[0].mxu1 }
 0x105   :  { %v182_v20 = vadd.f32 %v209_v17, %v181_v18  ;;  %v190_v21 = vadd.f32 %v209_v17, %v189_v19  ;;  %v183_v22 = vpop.f32.mrb[1].mxu0  ;;  %v191_v23 = vpop.f32.mrb[1].mxu1 }
 0x106   :  { %v184_v24 = vpop.f32.mrb[2].mxu0  ;;  %v192_v25 = vpop.f32.mrb[2].mxu1 }
 0x107   :  { %v196_v26 = vmax.f32 %v182_v20, 0.0  ;;  %v198_v27 = vmax.f32 %v190_v21, 0.0  ;;  %v185_v28 = vadd.f32 %v209_v17, %v184_v24  ;;  %v193_v29 = vadd.f32 %v209_v17, %v192_v25  ;;  %v186_v30 = vpop.f32.mrb[3].mxu0  ;;  %v194_v31 = vpop.f32.mrb[3].mxu1 }
 0x109   :  { %201 = vst.msk [vmem:[%s382_s3] sm:$0xff] %vm200_vm1, %v196_v26  ;;  %203 = vst.msk [vmem:[%s382_s3 + $0x10] sm:$0xff] %vm200_vm1, %v198_v27  ;;  %v197_v32 = vmax.f32 %v185_v28, 0.0  ;;  %v199_v33 = vmax.f32 %v193_v29, 0.0 }
 0x10b   :  { %202 = vst.msk [vmem:[%s382_s3 + $0x8] sm:$0xff] %vm200_vm1, %v197_v32  ;;  %204 = vst.msk [vmem:[%s382_s3 + $0x18] sm:$0xff] %vm200_vm1, %v199_v33 }

// kernel: conv_model_forward.10
= control target key start
LH: loop header
LB: loop body
LE: loop exit
PB: predicated region body
PF: predicated region fallthrough
CT: control target
= control target key end

     0   :  { %v550_v1 = vmov 0   ;;  %v67_v57 = vlaneseq  ;;  %vm413_vm0 = vcmask 523264   ;;  %s730_s1 = inlined_call_operand.vmem [shape: bf16[384,192], index: 1, kind: input, shape index: {}]   ;;  %s731_s0 = inlined_call_operand.vmem [shape: bf16[8,384], index: 0, kind: input, shape index: {}]   ;;  %s732_s2 = inlined_call_operand.vmem [shape: f32[1,192], index: 2, kind: input, shape index: {}]   ;;  %s733_s3 = inlined_call_operand.vmem [shape: f32[8,192], index: 3, kind: output, shape index: {}]  }
   0x1   :  { %v475_v0 = vld [vmem:[%s730_s1 + $0x4] ss:$8 sps:$4 sm:$0xff]   ;;  %401 = vmatprep.mubr.bf16.mxu0 %v550_v1  ;;  %v477_v2 = vld [vmem:[%s730_s1] ss:$8 sps:$4 sm:$0xff]   ;;  %v478_v3 = vld [vmem:[%s730_s1 + $0x14] ss:$8 sps:$4 sm:$0xff]  }
   0x2   :  { %328 = vmatprep.subr.bf16.mxu1 %v475_v0  ;;  %v480_v4 = vld [vmem:[%s730_s1 + $0x10] ss:$8 sps:$4 sm:$0xff]   ;;  %v481_v5 = vld [vmem:[%s730_s1 + $0x24] ss:$8 sps:$4 sm:$0xff]   ;;  %v483_v6 = vld [vmem:[%s730_s1 + $0x20] ss:$8 sps:$4 sm:$0xff]  }
   0x3   :  { %329 = vmatpush1.bf16.msra.mxu1 %v477_v2  ;;  %v484_v7 = vld [vmem:[%s730_s1 + $0x34] ss:$8 sps:$4 sm:$0xff]   ;;  %v486_v8 = vld [vmem:[%s730_s1 + $0x30] ss:$8 sps:$4 sm:$0xff]   ;;  %v499_v9 = vld [vmem:[%s730_s1 + $0x104] ss:$8 sps:$4 sm:$0xff]  }
   0x4   :  { %330 = vmatprep.subr.bf16.mxu1 %v478_v3  ;;  %v487_v10 = vld [vmem:[%s730_s1 + $0x44] ss:$8 sps:$4 sm:$0xff]   ;;  %v503_v11 = vld [vmem:[%s730_s1 + $0x100] ss:$8 sps:$4 sm:$0xff]   ;;  %369 = vmatprep.subr.bf16.mxu0 %v499_v9  ;;  %v505_v12 = vld [vmem:[%s730_s1 + $0x114] ss:$8 sps:$4 sm:$0xff]  }
   0x5   :  { %370 = vmatpush1.bf16.msra.mxu0 %v503_v11  ;;  %v489_v13 = vld [vmem:[%s730_s1 + $0x40] ss:$8 sps:$4 sm:$0xff]   ;;  %v490_v14 = vld [vmem:[%s730_s1 + $0x54] ss:$8 sps:$4 sm:$0xff]   ;;  %v509_v15 = vld [vmem:[%s730_s1 + $0x110] ss:$8 sps:$4 sm:$0xff]  }
   0x6   :  { %371 = vmatprep.subr.bf16.mxu0 %v505_v12  ;;  %v511_v16 = vld [vmem:[%s730_s1 + $0x124] ss:$8 sps:$4 sm:$0xff]   ;;  %v492_v17 = vld [vmem:[%s730_s1 + $0x50] ss:$8 sps:$4 sm:$0xff]   ;;  %v515_v18 = vld [vmem:[%s730_s1 + $0x120] ss:$8 sps:$4 sm:$0xff]  }
   0x7   :  { %331 = vmatpush1.bf16.msra.mxu1 %v480_v4  ;;  %v517_v19 = vld [vmem:[%s730_s1 + $0x134] ss:$8 sps:$4 sm:$0xff]   ;;  %v493_v20 = vld [vmem:[%s730_s1 + $0x64] ss:$8 sps:$4 sm:$0xff]   ;;  %v521_v21 = vld [vmem:[%s730_s1 + $0x130] ss:$8 sps:$4 sm:$0xff]  }
   0x8   :  { %332 = vmatprep.subr.bf16.mxu1 %v481_v5  ;;  %v495_v22 = vld [vmem:[%s730_s1 + $0x60] ss:$8 sps:$4 sm:$0xff]   ;;  %v523_v23 = vld [vmem:[%s730_s1 + $0x144] ss:$8 sps:$4 sm:$0xff]   ;;  %v496_v24 = vld [vmem:[%s730_s1 + $0x74] ss:$8 sps:$4 sm:$0xff]  }
   0x9   :  { %372 = vmatpush1.bf16.msra.mxu0 %v509_v15  ;;  %v498_v25 = vld [vmem:[%s730_s1 + $0x70] ss:$8 sps:$4 sm:$0xff]   ;;  %v527_v26 = vld [vmem:[%s730_s1 + $0x140] ss:$8 sps:$4 sm:$0xff]   ;;  %v529_v27 = vld [vmem:[%s730_s1 + $0x154] ss:$8 sps:$4 sm:$0xff]  }
   0xa   :  { %373 = vmatprep.subr.bf16.mxu0 %v511_v16  ;;  %v501_v28 = vld [vmem:[%s730_s1 + $0x84] ss:$8 sps:$4 sm:$0xff]   ;;  %v533_v29 = vld [vmem:[%s730_s1 + $0x150] ss:$8 sps:$4 sm:$0xff]   ;;  %v504_v30 = vld [vmem:[%s730_s1 + $0x80] ss:$8 sps:$4 sm:$0xff]  }
   0xb   :  { %333 = vmatpush1.bf16.msra.mxu1 %v483_v6  ;;  %v535_v31 = vld [vmem:[%s730_s1 + $0x164] ss:$8 sps:$4 sm:$0xff]   ;;  %v507_v32 = vld [vmem:[%s730_s1 + $0x94] ss:$8 sps:$4 sm:$0xff]   ;;  %v539_v35 = vld [vmem:[%s730_s1 + $0x160] ss:$8 sps:$4 sm:$0xff]  }
   0xc   :  { %334 = vmatprep.subr.bf16.mxu1 %v484_v7  ;;  %v15_v33 = vld [vmem:[%s731_s0] sm:$0xff]  ;;  %v510_v36 = vld [vmem:[%s730_s1 + $0x90] ss:$8 sps:$4 sm:$0xff]   ;;  %v541_v37 = vld [vmem:[%s730_s1 + $0x174] ss:$8 sps:$4 sm:$0xff]   ;;  %v68_v58 = vshrl.u32 %v67_v57, 7 }
   0xd   :  { %374 = vmatpush1.bf16.msra.mxu0 %v515_v18  ;;  %v420_v34 = vcombine.high %v15_v33, %v15_v33  ;;  %v513_v38 = vld [vmem:[%s730_s1 + $0xa4] ss:$8 sps:$4 sm:$0xff]   ;;  %v545_v39 = vld [vmem:[%s730_s1 + $0x170] ss:$8 sps:$4 sm:$0xff]   ;;  %v516_v40 = vld [vmem:[%s730_s1 + $0xa0] ss:$8 sps:$4 sm:$0xff]   ;;  %v419_v52 = vcombine.low %v15_v33, %v15_v33 }
   0xe   :  { %375 = vmatprep.subr.bf16.mxu0 %v517_v19  ;;  %v519_v41 = vld [vmem:[%s730_s1 + $0xb4] ss:$8 sps:$4 sm:$0xff]   ;;  %v549_v42 = vld [vmem:[%s731_s0 + $0x8] ss:$0 sps:$4 sm:$0xff]   ;;  %v522_v43 = vld [vmem:[%s730_s1 + $0xb0] ss:$8 sps:$4 sm:$0xff]  }
   0xf   :  { %335 = vmatpush1.bf16.msra.mxu1 %v486_v8  ;;  %360 = vmatprep.mubr.bf16.mxu1 %v420_v34  ;;  %v525_v44 = vld [vmem:[%s730_s1 + $0xc4] ss:$8 sps:$4 sm:$0xff]   ;;  %v528_v45 = vld [vmem:[%s730_s1 + $0xc0] ss:$8 sps:$4 sm:$0xff]   ;;  %v531_v46 = vld [vmem:[%s730_s1 + $0xd4] ss:$8 sps:$4 sm:$0xff]  }
  0x10   :  { %336 = vmatprep.subr.bf16.mxu1 %v487_v10  ;;  %v534_v47 = vld [vmem:[%s730_s1 + $0xd0] ss:$8 sps:$4 sm:$0xff]   ;;  %v537_v48 = vld [vmem:[%s730_s1 + $0xe4] ss:$8 sps:$4 sm:$0xff]   ;;  %v540_v49 = vld [vmem:[%s730_s1 + $0xe0] ss:$8 sps:$4 sm:$0xff]  }
  0x11   :  { %376 = vmatpush1.bf16.msra.mxu0 %v521_v21  ;;  %v543_v50 = vld [vmem:[%s730_s1 + $0xf4] ss:$8 sps:$4 sm:$0xff]   ;;  %v546_v51 = vld [vmem:[%s730_s1 + $0xf0] ss:$8 sps:$4 sm:$0xff]   ;;  %v69_v59 = vsub.s32 0, %v68_v58  ;;  %v73_v61 = vsub.s32 1, %v68_v58 }
  0x12   :  { %377 = vmatprep.subr.bf16.mxu0 %v523_v23  ;;  %v65_v60 = vld [vmem:[%s732_s2] sm:$0x3] }
  0x13   :  { %337 = vmatpush1.bf16.msra.mxu1 %v489_v13  ;;  %v70_v62 = vrot.slane %v65_v60, %v69_v59  ;;  %v74_v63 = vrot.slane %v65_v60, %v73_v61 }
  0x14   :  { %338 = vmatprep.subr.bf16.mxu1 %v490_v14 }
  0x15   :  { %378 = vmatpush1.bf16.msra.mxu0 %v527_v26 }
  0x16   :  { %379 = vmatprep.subr.bf16.mxu0 %v529_v27 }
  0x17   :  { %339 = vmatpush1.bf16.msra.mxu1 %v492_v17 }
  0x18   :  { %340 = vmatprep.subr.bf16.mxu1 %v493_v20 }
  0x19   :  { %380 = vmatpush1.bf16.msra.mxu0 %v533_v29 }
  0x1a   :  { %381 = vmatprep.subr.bf16.mxu0 %v535_v31 }
  0x1b   :  { %341 = vmatpush1.bf16.msra.mxu1 %v495_v22 }
  0x1c   :  { %342 = vmatprep.subr.bf16.mxu1 %v496_v24 }
  0x1d   :  { %382 = vmatpush1.bf16.msra.mxu0 %v539_v35 }
  0x1e   :  { %383 = vmatprep.subr.bf16.mxu0 %v541_v37 }
  0x1f   :  { %343 = vmatpush1.bf16.msra.mxu1 %v498_v25 }
  0x20   :  { %344 = vmatprep.subr.bf16.mxu1 %v501_v28 }
  0x21   :  { %384 = vmatpush1.bf16.msra.mxu0 %v545_v39 }
  0x23   :  { %345 = vmatpush1.bf16.msra.mxu1 %v504_v30 }
  0x24   :  { %346 = vmatprep.subr.bf16.mxu1 %v507_v32  ;;  %402 = vmatmul.mubr.bf16.vlgmr.msra.gmra.mrb[0].mxu0 %v549_v42 }
  0x27   :  { %347 = vmatpush1.bf16.msra.mxu1 %v510_v36 }
  0x28   :  { %348 = vmatprep.subr.bf16.mxu1 %v513_v38 }
  0x2b   :  { %349 = vmatpush1.bf16.msra.mxu1 %v516_v40 }
  0x2c   :  { %350 = vmatprep.subr.bf16.mxu1 %v519_v41 }
  0x2f   :  { %351 = vmatpush1.bf16.msra.mxu1 %v522_v43 }
  0x30   :  { %352 = vmatprep.subr.bf16.mxu1 %v525_v44 }
  0x33   :  { %353 = vmatpush1.bf16.msra.mxu1 %v528_v45 }
  0x34   :  { %354 = vmatprep.subr.bf16.mxu1 %v531_v46 }
  0x37   :  { %355 = vmatpush1.bf16.msra.mxu1 %v534_v47 }
  0x38   :  { %356 = vmatprep.subr.bf16.mxu1 %v537_v48 }
  0x3b   :  { %357 = vmatpush1.bf16.msra.mxu1 %v540_v49 }
  0x3c   :  { %358 = vmatprep.subr.bf16.mxu1 %v543_v50 }
  0x3f   :  { %359 = vmatpush1.bf16.msra.mxu1 %v546_v51 }
  0x42   :  { %361 = vmatmul.mubr.bf16.vlgmr.msra.gmra.mrb[0].mxu1 %v419_v52 }
  0xf7   :  { %v403_v53 = vpop.f32.mrb[0].mxu0 }
  0xf8   :  { %v405_v54 = vpop.f32.mrb[1].mxu0 }
  0xf9   :  { %v407_v55 = vpop.f32.mrb[2].mxu0 }
  0xfa   :  { %v408_v56 = vpop.f32.mrb[3].mxu0 }
 0x115   :  { %v362_v0 = vpop.f32.mrb[0].mxu1 }
 0x116   :  { %v363_v1 = vadd.f32 %v362_v0, %v70_v62  ;;  %v364_v2 = vpop.f32.mrb[1].mxu1 }
 0x117   :  { %v365_v3 = vadd.f32 %v364_v2, %v74_v63  ;;  %v366_v4 = vpop.f32.mrb[2].mxu1 }
 0x118   :  { %v404_v5 = vadd.f32 %v403_v53, %v363_v1  ;;  %v367_v6 = vpop.f32.mrb[3].mxu1 }
 0x119   :  { %v406_v7 = vadd.f32 %v405_v54, %v365_v3 }
 0x11a   :  { %v410_v8 = vmax.f32 %v404_v5, 0.0 }
 0x11b   :  { %v411_v9 = vmax.f32 %v406_v7, 0.0 }
 0x11c   :  { %412 = vst [vmem:[%s733_s3] sm:$0xff] %v410_v8 }
 0x11d   :  { %414 = vst.msk [vmem:[%s733_s3 + $0x8] sm:$0xff] %vm413_vm0, %v411_v9 }

// kernel: conv_model_forward.14
= control target key start
LH: loop header
LB: loop body
LE: loop exit
PB: predicated region body
PF: predicated region fallthrough
CT: control target
= control target key end

     0   :  { %vm197_vm0 = vcmask 523264   ;;  %v414_v54 = vlaneseq  ;;  %s756_s3 = inlined_call_operand.vmem [shape: bf16[192,192], index: 3, kind: input, shape index: {}]   ;;  %s757_s2 = inlined_call_operand.vmem [shape: bf16[192,192], index: 2, kind: input, shape index: {}]   ;;  %s758_s1 = inlined_call_operand.vmem [shape: bf16[8,192], index: 1, kind: input, shape index: {}]   ;;  %s759_s0 = inlined_call_operand.vmem [shape: bf16[8,192], index: 0, kind: input, shape index: {}]   ;;  %s760_s4 = inlined_call_operand.vmem [shape: f32[1,192], index: 4, kind: input, shape index: {}]   ;;  %s761_s5 = inlined_call_operand.vmem [shape: f32[8,192], index: 5, kind: output, shape index: {}]  }
   0x1   :  { %v488_v0 = vld [vmem:[%s756_s3 + $0x4] ss:$8 sps:$4 sm:$0xff]   ;;  %v492_v2 = vld [vmem:[%s756_s3] ss:$8 sps:$4 sm:$0xff]   ;;  %v494_v4 = vld [vmem:[%s756_s3 + $0x14] ss:$8 sps:$4 sm:$0xff]  }
   0x2   :  { %v490_v1 = vld [vmem:[%s757_s2 + $0x4] ss:$8 sps:$4 sm:$0xff]   ;;  %201 = vmatprep.subr.bf16.mxu0 %v488_v0  ;;  %v493_v3 = vld [vmem:[%s757_s2] ss:$8 sps:$4 sm:$0xff]   ;;  %v496_v5 = vld [vmem:[%s757_s2 + $0x14] ss:$8 sps:$4 sm:$0xff]  }
   0x3   :  { %371 = vmatprep.subr.bf16.mxu1 %v490_v1  ;;  %202 = vmatpush1.bf16.msra.mxu0 %v492_v2  ;;  %v498_v6 = vld [vmem:[%s756_s3 + $0x10] ss:$8 sps:$4 sm:$0xff]   ;;  %v500_v8 = vld [vmem:[%s756_s3 + $0x24] ss:$8 sps:$4 sm:$0xff]   ;;  %v504_v10 = vld [vmem:[%s756_s3 + $0x20] ss:$8 sps:$4 sm:$0xff]  }
   0x4   :  { %372 = vmatpush1.bf16.msra.mxu1 %v493_v3  ;;  %203 = vmatprep.subr.bf16.mxu0 %v494_v4  ;;  %v499_v7 = vld [vmem:[%s757_s2 + $0x10] ss:$8 sps:$4 sm:$0xff]   ;;  %v502_v9 = vld [vmem:[%s757_s2 + $0x24] ss:$8 sps:$4 sm:$0xff]   ;;  %v505_v11 = vld [vmem:[%s757_s2 + $0x20] ss:$8 sps:$4 sm:$0xff]  }
   0x5   :  { %373 = vmatprep.subr.bf16.mxu1 %v496_v5  ;;  %v506_v12 = vld [vmem:[%s756_s3 + $0x34] ss:$8 sps:$4 sm:$0xff]   ;;  %v510_v14 = vld [vmem:[%s756_s3 + $0x30] ss:$8 sps:$4 sm:$0xff]   ;;  %v512_v16 = vld [vmem:[%s756_s3 + $0x44] ss:$8 sps:$4 sm:$0xff]  }
   0x6   :  { %v508_v13 = vld [vmem:[%s757_s2 + $0x34] ss:$8 sps:$4 sm:$0xff]   ;;  %v511_v15 = vld [vmem:[%s757_s2 + $0x30] ss:$8 sps:$4 sm:$0xff]   ;;  %v514_v17 = vld [vmem:[%s757_s2 + $0x44] ss:$8 sps:$4 sm:$0xff]  }
   0x7   :  { %204 = vmatpush1.bf16.msra.mxu0 %v498_v6  ;;  %v516_v18 = vld [vmem:[%s756_s3 + $0x40] ss:$8 sps:$4 sm:$0xff]   ;;  %v518_v20 = vld [vmem:[%s756_s3 + $0x54] ss:$8 sps:$4 sm:$0xff]   ;;  %v522_v22 = vld [vmem:[%s756_s3 + $0x50] ss:$8 sps:$4 sm:$0xff]  }
   0x8   :  { %374 = vmatpush1.bf16.msra.mxu1 %v499_v7  ;;  %205 = vmatprep.subr.bf16.mxu0 %v500_v8  ;;  %v517_v19 = vld [vmem:[%s757_s2 + $0x40] ss:$8 sps:$4 sm:$0xff]   ;;  %v520_v21 = vld [vmem:[%s757_s2 + $0x54] ss:$8 sps:$4 sm:$0xff]   ;;  %v523_v23 = vld [vmem:[%s757_s2 + $0x50] ss:$8 sps:$4 sm:$0xff]  }
   0x9   :  { %375 = vmatprep.subr.bf16.mxu1 %v502_v9  ;;  %v524_v24 = vld [vmem:[%s756_s3 + $0x64] ss:$8 sps:$4 sm:$0xff]   ;;  %v528_v26 = vld [vmem:[%s756_s3 + $0x60] ss:$8 sps:$4 sm:$0xff]   ;;  %v530_v28 = vld [vmem:[%s756_s3 + $0x74] ss:$8 sps:$4 sm:$0xff]  }
   0xa   :  { %v526_v25 = vld [vmem:[%s757_s2 + $0x64] ss:$8 sps:$4 sm:$0xff]   ;;  %v529_v27 = vld [vmem:[%s757_s2 + $0x60] ss:$8 sps:$4 sm:$0xff]   ;;  %v532_v29 = vld [vmem:[%s757_s2 + $0x74] ss:$8 sps:$4 sm:$0xff]  }
   0xb   :  { %206 = vmatpush1.bf16.msra.mxu0 %v504_v10  ;;  %v534_v30 = vld [vmem:[%s756_s3 + $0x70] ss:$8 sps:$4 sm:$0xff]   ;;  %v536_v32 = vld [vmem:[%s756_s3 + $0x84] ss:$8 sps:$4 sm:$0xff]   ;;  %v540_v34 = vld [vmem:[%s756_s3 + $0x80] ss:$8 sps:$4 sm:$0xff]  }
   0xc   :  { %376 = vmatpush1.bf16.msra.mxu1 %v505_v11  ;;  %207 = vmatprep.subr.bf16.mxu0 %v506_v12  ;;  %v535_v31 = vld [vmem:[%s757_s2 + $0x70] ss:$8 sps:$4 sm:$0xff]   ;;  %v538_v33 = vld [vmem:[%s757_s2 + $0x84] ss:$8 sps:$4 sm:$0xff]   ;;  %v541_v35 = vld [vmem:[%s757_s2 + $0x80] ss:$8 sps:$4 sm:$0xff]  }
   0xd   :  { %377 = vmatprep.subr.bf16.mxu1 %v508_v13  ;;  %v46_v36 = vld [vmem:[%s758_s1] sm:$0xff]  ;;  %v542_v38 = vld [vmem:[%s756_s3 + $0x94] ss:$8 sps:$4 sm:$0xff]   ;;  %v546_v42 = vld [vmem:[%s756_s3 + $0x90] ss:$8 sps:$4 sm:$0xff]   ;;  %v415_v55 = vshrl.u32 %v414_v54, 7 }
   0xe   :  { %v21_v37 = vld [vmem:[%s759_s0] sm:$0xff]  ;;  %v544_v39 = vld [vmem:[%s757_s2 + $0x94] ss:$8 sps:$4 sm:$0xff]   ;;  %v435_v40 = vcombine.high %v46_v36, %v46_v36  ;;  %v547_v43 = vld [vmem:[%s757_s2 + $0x90] ss:$8 sps:$4 sm:$0xff]   ;;  %v434_v52 = vcombine.low %v46_v36, %v46_v36 }
   0xf   :  { %208 = vmatpush1.bf16.msra.mxu0 %v510_v14  ;;  %v462_v41 = vcombine.high %v21_v37, %v21_v37  ;;  %v548_v44 = vld [vmem:[%s756_s3 + $0xa4] ss:$8 sps:$4 sm:$0xff]   ;;  %v552_v46 = vld [vmem:[%s756_s3 + $0xa0] ss:$8 sps:$4 sm:$0xff]   ;;  %v554_v48 = vld [vmem:[%s756_s3 + $0xb4] ss:$8 sps:$4 sm:$0xff]   ;;  %v461_v53 = vcombine.low %v21_v37, %v21_v37 }
  0x10   :  { %378 = vmatpush1.bf16.msra.mxu1 %v511_v15  ;;  %209 = vmatprep.subr.bf16.mxu0 %v512_v16  ;;  %v550_v45 = vld [vmem:[%s757_s2 + $0xa4] ss:$8 sps:$4 sm:$0xff]   ;;  %v553_v47 = vld [vmem:[%s757_s2 + $0xa0] ss:$8 sps:$4 sm:$0xff]   ;;  %v556_v49 = vld [vmem:[%s757_s2 + $0xb4] ss:$8 sps:$4 sm:$0xff]  }
  0x11   :  { %379 = vmatprep.subr.bf16.mxu1 %v514_v17  ;;  %460 = vmatprep.mubr.msk.bf16.mxu0 %vm197_vm0, %v435_v40  ;;  %v558_v50 = vld [vmem:[%s756_s3 + $0xb0] ss:$8 sps:$4 sm:$0xff]   ;;  %v416_v56 = vsub.s32 0, %v415_v55  ;;  %v412_v57 = vld [vmem:[%s760_s4] sm:$0x3]  ;;  %v420_v58 = vsub.s32 1, %v415_v55 }
  0x12   :  { %487 = vmatprep.mubr.msk.bf16.mxu1 %vm197_vm0, %v462_v41  ;;  %v559_v51 = vld [vmem:[%s757_s2 + $0xb0] ss:$8 sps:$4 sm:$0xff]  }
  0x13   :  { %210 = vmatpush1.bf16.msra.mxu0 %v516_v18  ;;  %v417_v59 = vrot.slane %v412_v57, %v416_v56  ;;  %v421_v62 = vrot.slane %v412_v57, %v420_v58 }
  0x14   :  { %380 = vmatpush1.bf16.msra.mxu1 %v517_v19  ;;  %211 = vmatprep.subr.bf16.mxu0 %v518_v20 }
  0x15   :  { %381 = vmatprep.subr.bf16.mxu1 %v520_v21 }
  0x17   :  { %212 = vmatpush1.bf16.msra.mxu0 %v522_v22 }
  0x18   :  { %382 = vmatpush1.bf16.msra.mxu1 %v523_v23  ;;  %213 = vmatprep.subr.bf16.mxu0 %v524_v24 }
  0x19   :  { %383 = vmatprep.subr.bf16.mxu1 %v526_v25 }
  0x1b   :  { %214 = vmatpush1.bf16.msra.mxu0 %v528_v26 }
  0x1c   :  { %384 = vmatpush1.bf16.msra.mxu1 %v529_v27  ;;  %215 = vmatprep.subr.bf16.mxu0 %v530_v28 }
  0x1d   :  { %385 = vmatprep.subr.bf16.mxu1 %v532_v29 }
  0x1f   :  { %216 = vmatpush1.bf16.msra.mxu0 %v534_v30 }
  0x20   :  { %386 = vmatpush1.bf16.msra.mxu1 %v535_v31  ;;  %217 = vmatprep.subr.bf16.mxu0 %v536_v32 }
  0x21   :  { %387 = vmatprep.subr.bf16.mxu1 %v538_v33 }
  0x23   :  { %218 = vmatpush1.bf16.msra.mxu0 %v540_v34 }
  0x24   :  { %388 = vmatpush1.bf16.msra.mxu1 %v541_v35  ;;  %219 = vmatprep.subr.bf16.mxu0 %v542_v38 }
  0x25   :  { %389 = vmatprep.subr.bf16.mxu1 %v544_v39 }
  0x27   :  { %220 = vmatpush1.bf16.msra.mxu0 %v546_v42 }
  0x28   :  { %390 = vmatpush1.bf16.msra.mxu1 %v547_v43  ;;  %221 = vmatprep.subr.bf16.mxu0 %v548_v44 }
  0x29   :  { %391 = vmatprep.subr.bf16.mxu1 %v550_v45 }
  0x2b   :  { %222 = vmatpush1.bf16.msra.mxu0 %v552_v46 }
  0x2c   :  { %392 = vmatpush1.bf16.msra.mxu1 %v553_v47  ;;  %223 = vmatprep.subr.bf16.mxu0 %v554_v48 }
  0x2d   :  { %393 = vmatprep.subr.bf16.mxu1 %v556_v49 }
  0x2f   :  { %224 = vmatpush1.bf16.msra.mxu0 %v558_v50 }
  0x30   :  { %394 = vmatpush1.bf16.msra.mxu1 %v559_v51 }
  0x32   :  { %234 = vmatmul.mubr.bf16.vlgmr.msra.gmra.mrb[0].mxu0 %v434_v52 }
  0x33   :  { %404 = vmatmul.mubr.bf16.vlgmr.msra.gmra.mrb[0].mxu1 %v461_v53 }
 0x105   :  { %v235_v60 = vpop.f32.mrb[0].mxu0 }
 0x106   :  { %v405_v61 = vpop.f32.mrb[0].mxu1  ;;  %v237_v0 = vpop.f32.mrb[1].mxu0 }
 0x107   :  { %v406_v63 = vadd.f32 %v405_v61, %v235_v60  ;;  %v407_v1 = vpop.f32.mrb[1].mxu1  ;;  %v239_v3 = vpop.f32.mrb[2].mxu0 }
 0x108   :  { %v408_v2 = vadd.f32 %v407_v1, %v237_v0  ;;  %v409_v4 = vpop.f32.mrb[2].mxu1  ;;  %v240_v6 = vpop.f32.mrb[3].mxu0 }
 0x109   :  { %v424_v5 = vadd.f32 %v417_v59, %v406_v63  ;;  %v410_v7 = vpop.f32.mrb[3].mxu1 }
 0x10a   :  { %v425_v8 = vadd.f32 %v421_v62, %v408_v2 }
 0x10b   :  { %v426_v9 = vmax.f32 %v424_v5, 0.0 }
 0x10c   :  { %v427_v10 = vmax.f32 %v425_v8, 0.0 }
 0x10d   :  { %428 = vst [vmem:[%s761_s5] sm:$0xff] %v426_v9 }
 0x10e   :  { %429 = vst.msk [vmem:[%s761_s5 + $0x8] sm:$0xff] %vm197_vm0, %v427_v10 }

// kernel: conv_model_forward.11
= control target key start
LH: loop header
LB: loop body
LE: loop exit
PB: predicated region body
PF: predicated region fallthrough
CT: control target
= control target key end

     0   :  { %v210_v36 = vlaneseq  ;;  %v1731_v37 = vmov 1966171168   ;;  %s2231_s1 = inlined_call_operand.vmem [shape: bf16[768,384], index: 1, kind: input, shape index: {}]   ;;  %s2232_s0 = inlined_call_operand.vmem [shape: bf16[2,768], index: 0, kind: input, shape index: {}]   ;;  %s2233_s2 = inlined_call_operand.vmem [shape: f32[1,384], index: 2, kind: input, shape index: {}]   ;;  %s2234_s3 = inlined_call_operand.vmem [shape: f32[2,384], index: 3, kind: output, shape index: {}]  }
   0x1   :  { %v1538_v0 = vld [vmem:[%s2231_s1 + $0x4] ss:$12 sps:$4 sm:$0xff]   ;;  %v1542_v2 = vld [vmem:[%s2231_s1] ss:$12 sps:$4 sm:$0xff]   ;;  %v1544_v4 = vld [vmem:[%s2231_s1 + $0x1c] ss:$12 sps:$4 sm:$0xff]   ;;  %v228_v38 = vunpack.c.l.s4 %v1731_v37 }
   0x2   :  { %v1540_v1 = vld [vmem:[%s2231_s1 + $0x184] ss:$12 sps:$4 sm:$0xff]   ;;  %1047 = vmatprep.subr.bf16.mxu1 %v1538_v0  ;;  %v1543_v3 = vld [vmem:[%s2231_s1 + $0x180] ss:$12 sps:$4 sm:$0xff]   ;;  %v1546_v5 = vld [vmem:[%s2231_s1 + $0x19c] ss:$12 sps:$4 sm:$0xff]  }
   0x3   :  { %1088 = vmatprep.subr.bf16.mxu0 %v1540_v1  ;;  %1048 = vmatpush1.bf16.msra.mxu1 %v1542_v2  ;;  %v1548_v6 = vld [vmem:[%s2231_s1 + $0x18] ss:$12 sps:$4 sm:$0xff]   ;;  %v1550_v8 = vld [vmem:[%s2231_s1 + $0x34] ss:$12 sps:$4 sm:$0xff]   ;;  %v1554_v10 = vld [vmem:[%s2231_s1 + $0x30] ss:$12 sps:$4 sm:$0xff]   ;;  %v229_v43 = vunpack.c.0.s8 %v228_v38 }
   0x4   :  { %1089 = vmatpush1.bf16.msra.mxu0 %v1543_v3  ;;  %1049 = vmatprep.subr.bf16.mxu1 %v1544_v4  ;;  %v1549_v7 = vld [vmem:[%s2231_s1 + $0x198] ss:$12 sps:$4 sm:$0xff]   ;;  %v1552_v9 = vld [vmem:[%s2231_s1 + $0x1b4] ss:$12 sps:$4 sm:$0xff]   ;;  %v1555_v11 = vld [vmem:[%s2231_s1 + $0x1b0] ss:$12 sps:$4 sm:$0xff]  }
   0x5   :  { %1090 = vmatprep.subr.bf16.mxu0 %v1546_v5  ;;  %v1556_v12 = vld [vmem:[%s2231_s1 + $0x4c] ss:$12 sps:$4 sm:$0xff]   ;;  %v1560_v14 = vld [vmem:[%s2231_s1 + $0x48] ss:$12 sps:$4 sm:$0xff]   ;;  %v1562_v16 = vld [vmem:[%s2231_s1 + $0x64] ss:$12 sps:$4 sm:$0xff]  }
   0x6   :  { %v1558_v13 = vld [vmem:[%s2231_s1 + $0x1cc] ss:$12 sps:$4 sm:$0xff]   ;;  %v1561_v15 = vld [vmem:[%s2231_s1 + $0x1c8] ss:$12 sps:$4 sm:$0xff]   ;;  %v1564_v17 = vld [vmem:[%s2231_s1 + $0x1e4] ss:$12 sps:$4 sm:$0xff]  }
   0x7   :  { %1050 = vmatpush1.bf16.msra.mxu1 %v1548_v6  ;;  %v1566_v18 = vld [vmem:[%s2231_s1 + $0x60] ss:$12 sps:$4 sm:$0xff]   ;;  %v1568_v20 = vld [vmem:[%s2231_s1 + $0x7c] ss:$12 sps:$4 sm:$0xff]   ;;  %v1572_v22 = vld [vmem:[%s2231_s1 + $0x78] ss:$12 sps:$4 sm:$0xff]  }
   0x8   :  { %1091 = vmatpush1.bf16.msra.mxu0 %v1549_v7  ;;  %1051 = vmatprep.subr.bf16.mxu1 %v1550_v8  ;;  %v1567_v19 = vld [vmem:[%s2231_s1 + $0x1e0] ss:$12 sps:$4 sm:$0xff]   ;;  %v1570_v21 = vld [vmem:[%s2231_s1 + $0x1fc] ss:$12 sps:$4 sm:$0xff]   ;;  %v1573_v23 = vld [vmem:[%s2231_s1 + $0x1f8] ss:$12 sps:$4 sm:$0xff]  }
   0x9   :  { %1092 = vmatprep.subr.bf16.mxu0 %v1552_v9  ;;  %v1574_v24 = vld [vmem:[%s2231_s1 + $0x94] ss:$12 sps:$4 sm:$0xff]   ;;  %v1578_v26 = vld [vmem:[%s2231_s1 + $0x90] ss:$12 sps:$4 sm:$0xff]   ;;  %v1580_v28 = vld [vmem:[%s2231_s1 + $0xac] ss:$12 sps:$4 sm:$0xff]  }
   0xa   :  { %v1576_v25 = vld [vmem:[%s2231_s1 + $0x214] ss:$12 sps:$4 sm:$0xff]   ;;  %v1579_v27 = vld [vmem:[%s2231_s1 + $0x210] ss:$12 sps:$4 sm:$0xff]   ;;  %v1582_v29 = vld [vmem:[%s2231_s1 + $0x22c] ss:$12 sps:$4 sm:$0xff]  }
   0xb   :  { %1052 = vmatpush1.bf16.msra.mxu1 %v1554_v10  ;;  %v1584_v30 = vld [vmem:[%s2231_s1 + $0xa8] ss:$12 sps:$4 sm:$0xff]   ;;  %v1586_v32 = vld [vmem:[%s2231_s1 + $0xc4] ss:$12 sps:$4 sm:$0xff]   ;;  %v1590_v34 = vld [vmem:[%s2231_s1 + $0xc0] ss:$12 sps:$4 sm:$0xff]  }
   0xc   :  { %1093 = vmatpush1.bf16.msra.mxu0 %v1555_v11  ;;  %1053 = vmatprep.subr.bf16.mxu1 %v1556_v12  ;;  %v1585_v31 = vld [vmem:[%s2231_s1 + $0x228] ss:$12 sps:$4 sm:$0xff]   ;;  %v1588_v33 = vld [vmem:[%s2231_s1 + $0x244] ss:$12 sps:$4 sm:$0xff]   ;;  %v1591_v35 = vld [vmem:[%s2231_s1 + $0x240] ss:$12 sps:$4 sm:$0xff]  }
   0xd   :  { %1094 = vmatprep.subr.bf16.mxu0 %v1558_v13  ;;  %v1592_v39 = vld [vmem:[%s2231_s1 + $0xdc] ss:$12 sps:$4 sm:$0xff]   ;;  %v1596_v41 = vld [vmem:[%s2231_s1 + $0xd8] ss:$12 sps:$4 sm:$0xff]   ;;  %v1870_v42 = vshrl.u32 %v210_v36, 7 }
   0xe   :  { %v1594_v40 = vld [vmem:[%s2231_s1 + $0x25c] ss:$12 sps:$4 sm:$0xff]   ;;  %v1597_v44 = vld [vmem:[%s2231_s1 + $0x258] ss:$12 sps:$4 sm:$0xff]   ;;  %v1598_v45 = vld [vmem:[%s2231_s1 + $0xf4] ss:$12 sps:$4 sm:$0xff]  }
   0xf   :  { %1054 = vmatpush1.bf16.msra.mxu1 %v1560_v14  ;;  %v1600_v46 = vld [vmem:[%s2231_s1 + $0x274] ss:$12 sps:$4 sm:$0xff]   ;;  %v1602_v47 = vld [vmem:[%s2231_s1 + $0xf0] ss:$12 sps:$4 sm:$0xff]   ;;  %v1888_v49 = vsub.s32 %v229_v43, %v1870_v42  ;;  %v1604_v50 = vld [vmem:[%s2231_s1 + $0x10c] ss:$12 sps:$4 sm:$0xff]  }
  0x10   :  { %1095 = vmatpush1.bf16.msra.mxu0 %v1561_v15  ;;  %1055 = vmatprep.subr.bf16.mxu1 %v1562_v16  ;;  %v1603_v48 = vld [vmem:[%s2231_s1 + $0x270] ss:$12 sps:$4 sm:$0xff]   ;;  %v1606_v51 = vld [vmem:[%s2231_s1 + $0x28c] ss:$12 sps:$4 sm:$0xff]   ;;  %v1608_v52 = vld [vmem:[%s2231_s1 + $0x108] ss:$12 sps:$4 sm:$0xff]  }
  0x11   :  { %1096 = vmatprep.subr.bf16.mxu0 %v1564_v17  ;;  %v15_v53 = vld [vmem:[%s2232_s0] sm:$0x3f]  ;;  %v1609_v54 = vld [vmem:[%s2231_s1 + $0x288] ss:$12 sps:$4 sm:$0xff]   ;;  %v1626_v8 = vld [vmem:[%s2231_s1 + $0x150] ss:$12 sps:$4 sm:$0xff]  }
  0x12   :  { %v233_v55 = vrot.slane %v15_v53, %v1888_v49  ;;  %v226_v56 = vcombine.high %v15_v53, %v15_v53  ;;  %v1610_v57 = vld [vmem:[%s2231_s1 + $0x124] ss:$12 sps:$4 sm:$0xff]   ;;  %v1614_v61 = vld [vmem:[%s2231_s1 + $0x120] ss:$12 sps:$4 sm:$0xff]   ;;  %v1616_v1 = vld [vmem:[%s2231_s1 + $0x13c] ss:$12 sps:$4 sm:$0xff]  }
  0x13   :  { %1056 = vmatpush1.bf16.msra.mxu1 %v1566_v18  ;;  %v1612_v58 = vld [vmem:[%s2231_s1 + $0x2a4] ss:$12 sps:$4 sm:$0xff]   ;;  %v1615_v62 = vld [vmem:[%s2231_s1 + $0x2a0] ss:$12 sps:$4 sm:$0xff]   ;;  %v1618_v2 = vld [vmem:[%s2231_s1 + $0x2bc] ss:$12 sps:$4 sm:$0xff]  }
  0x14   :  { %1097 = vmatpush1.bf16.msra.mxu0 %v1567_v19  ;;  %1057 = vmatprep.subr.bf16.mxu1 %v1568_v20  ;;  %v241_v59 = vcombine.high %v233_v55, %v233_v55  ;;  %v240_v60 = vrot.slane %v226_v56, %v1888_v49  ;;  %v1620_v4 = vld [vmem:[%s2231_s1 + $0x138] ss:$12 sps:$4 sm:$0xff]   ;;  %v1622_v6 = vld [vmem:[%s2231_s1 + $0x154] ss:$12 sps:$4 sm:$0xff]   ;;  %v1627_v9 = vld [vmem:[%s2231_s1 + $0x2d0] ss:$12 sps:$4 sm:$0xff]   ;;  %v1960_v13 = vrot.slane %v233_v55, %v1888_v49 }
  0x15   :  { %1098 = vmatprep.subr.bf16.mxu0 %v1570_v21  ;;  %v1621_v5 = vld [vmem:[%s2231_s1 + $0x2b8] ss:$12 sps:$4 sm:$0xff]   ;;  %v1624_v7 = vld [vmem:[%s2231_s1 + $0x2d4] ss:$12 sps:$4 sm:$0xff]   ;;  %v1641_v21 = vld [vmem:[%s2231_s1 + $0x31c] ss:$12 sps:$4 sm:$0xff]  }
  0x16   :  { %v263_v63 = vrot.slane %v241_v59, %v1888_v49  ;;  %v1921_v0 = vrot.slane %v240_v60, %v1888_v49  ;;  %v1628_v10 = vld [vmem:[%s2231_s1 + $0x16c] ss:$12 sps:$4 sm:$0xff]   ;;  %v1632_v12 = vld [vmem:[%s2231_s1 + $0x168] ss:$12 sps:$4 sm:$0xff]   ;;  %v1636_v15 = vld [vmem:[%s2231_s1 + $0x304] ss:$12 sps:$4 sm:$0xff]   ;;  %v242_v18 = vcombine.high %v240_v60, %v240_v60  ;;  %v1976_v19 = vcombine.high %v1960_v13, %v1960_v13 }
  0x17   :  { %1058 = vmatpush1.bf16.msra.mxu1 %v1572_v22  ;;  %v1630_v11 = vld [vmem:[%s2231_s1 + $0x2ec] ss:$12 sps:$4 sm:$0xff]   ;;  %v1633_v14 = vld [vmem:[%s2231_s1 + $0x2e8] ss:$12 sps:$4 sm:$0xff]  }
  0x18   :  { %1099 = vmatpush1.bf16.msra.mxu0 %v1573_v23  ;;  %1059 = vmatprep.subr.bf16.mxu1 %v1574_v24  ;;  %v1929_v3 = vcombine.high %v263_v63, %v263_v63  ;;  %v1637_v16 = vld [vmem:[%s2231_s1 + $0xc8] ss:$12 sps:$4 sm:$0xff]   ;;  %v1634_v17 = vld [vmem:[%s2231_s1 + $0x300] ss:$12 sps:$4 sm:$0xff]   ;;  %v1988_v23 = vrot.slane %v242_v18, %v1888_v49  ;;  %v1639_v24 = vld [vmem:[%s2231_s1 + $0x318] ss:$12 sps:$4 sm:$0xff]  }
  0x19   :  { %1100 = vmatprep.subr.bf16.mxu0 %v1576_v25  ;;  %1079 = vmatprep.mubr.bf16.mxu1 %v263_v63  ;;  %v1638_v20 = vld [vmem:[%s2231_s1 + $0x8] ss:$12 sps:$4 sm:$0xff]   ;;  %v1642_v22 = vld [vmem:[%s2231_s1 + $0xe0] ss:$12 sps:$4 sm:$0xff]   ;;  %v1687_v60 = vld [vmem:[%s2231_s1 + $0x278] ss:$12 sps:$4 sm:$0xff]  }
  0x1a   :  { %1120 = vmatprep.mubr.bf16.mxu0 %v1929_v3  ;;  %v1643_v25 = vld [vmem:[%s2231_s1 + $0x20] ss:$12 sps:$4 sm:$0xff]   ;;  %v1658_v37 = vld [vmem:[%s2231_s1 + $0x68] ss:$12 sps:$4 sm:$0xff]  }
  0x1b   :  { %1060 = vmatpush1.bf16.msra.mxu1 %v1578_v26  ;;  %v1646_v26 = vld [vmem:[%s2231_s1 + $0x334] ss:$12 sps:$4 sm:$0xff]   ;;  %v1661_v38 = vld [vmem:[%s2231_s1 + $0x37c] ss:$12 sps:$4 sm:$0xff]  }
  0x1c   :  { %1101 = vmatpush1.bf16.msra.mxu0 %v1579_v27  ;;  %1061 = vmatprep.subr.bf16.mxu1 %v1580_v28  ;;  %v1647_v27 = vld [vmem:[%s2231_s1 + $0xf8] ss:$12 sps:$4 sm:$0xff]   ;;  %v1644_v28 = vld [vmem:[%s2231_s1 + $0x330] ss:$12 sps:$4 sm:$0xff]   ;;  %v1654_v36 = vld [vmem:[%s2231_s1 + $0x360] ss:$12 sps:$4 sm:$0xff]  }
  0x1d   :  { %1102 = vmatprep.subr.bf16.mxu0 %v1582_v29  ;;  %v1648_v29 = vld [vmem:[%s2231_s1 + $0x38] ss:$12 sps:$4 sm:$0xff]   ;;  %v1666_v43 = vld [vmem:[%s2231_s1 + $0x394] ss:$12 sps:$4 sm:$0xff]   ;;  %v1681_v55 = vld [vmem:[%s2231_s1 + $0x3dc] ss:$12 sps:$4 sm:$0xff]  }
  0x1e   :  { %v1669_v49 = vld [vmem:[%s2231_s1 + $0x3a8] ss:$12 sps:$4 sm:$0xff]   ;;  %v1674_v53 = vld [vmem:[%s2231_s1 + $0x3c0] ss:$12 sps:$4 sm:$0xff]  }
  0x1f   :  { %1062 = vmatpush1.bf16.msra.mxu1 %v1584_v30  ;;  %v1651_v30 = vld [vmem:[%s2231_s1 + $0x34c] ss:$12 sps:$4 sm:$0xff]   ;;  %v1686_v59 = vld [vmem:[%s2231_s1 + $0x3f4] ss:$12 sps:$4 sm:$0xff]  }
  0x20   :  { %1103 = vmatpush1.bf16.msra.mxu0 %v1585_v31  ;;  %1063 = vmatprep.subr.bf16.mxu1 %v1586_v32  ;;  %v1652_v31 = vld [vmem:[%s2231_s1 + $0x110] ss:$12 sps:$4 sm:$0xff]   ;;  %v1649_v32 = vld [vmem:[%s2231_s1 + $0x348] ss:$12 sps:$4 sm:$0xff]   ;;  %v1682_v56 = vld [vmem:[%s2231_s1 + $0x260] ss:$12 sps:$4 sm:$0xff]  }
  0x21   :  { %1104 = vmatprep.subr.bf16.mxu0 %v1588_v33  ;;  %v1653_v33 = vld [vmem:[%s2231_s1 + $0x50] ss:$12 sps:$4 sm:$0xff]   ;;  %v1709_v18 = vld [vmem:[%s2231_s1 + $0x468] ss:$12 sps:$4 sm:$0xff]  }
  0x23   :  { %1064 = vmatpush1.bf16.msra.mxu1 %v1590_v34  ;;  %v1656_v34 = vld [vmem:[%s2231_s1 + $0x364] ss:$12 sps:$4 sm:$0xff]  }
  0x24   :  { %1105 = vmatpush1.bf16.msra.mxu0 %v1591_v35  ;;  %1065 = vmatprep.subr.bf16.mxu1 %v1592_v39  ;;  %v1657_v35 = vld [vmem:[%s2231_s1 + $0x128] ss:$12 sps:$4 sm:$0xff]   ;;  %v1662_v39 = vld [vmem:[%s2231_s1 + $0x140] ss:$12 sps:$4 sm:$0xff]  }
  0x25   :  { %1106 = vmatprep.subr.bf16.mxu0 %v1594_v40  ;;  %v1659_v40 = vld [vmem:[%s2231_s1 + $0x378] ss:$12 sps:$4 sm:$0xff]  }
  0x27   :  { %1066 = vmatpush1.bf16.msra.mxu1 %v1596_v41  ;;  %v1663_v41 = vld [vmem:[%s2231_s1 + $0x80] ss:$12 sps:$4 sm:$0xff]  }
  0x28   :  { %1107 = vmatpush1.bf16.msra.mxu0 %v1597_v44  ;;  %1067 = vmatprep.subr.bf16.mxu1 %v1598_v45  ;;  %v1667_v44 = vld [vmem:[%s2231_s1 + $0x158] ss:$12 sps:$4 sm:$0xff]   ;;  %v1664_v45 = vld [vmem:[%s2231_s1 + $0x390] ss:$12 sps:$4 sm:$0xff]  }
  0x29   :  { %1108 = vmatprep.subr.bf16.mxu0 %v1600_v46  ;;  %v1668_v46 = vld [vmem:[%s2231_s1 + $0x98] ss:$12 sps:$4 sm:$0xff]  }
  0x2b   :  { %1068 = vmatpush1.bf16.msra.mxu1 %v1602_v47  ;;  %v1671_v47 = vld [vmem:[%s2231_s1 + $0x3ac] ss:$12 sps:$4 sm:$0xff]  }
  0x2c   :  { %1109 = vmatpush1.bf16.msra.mxu0 %v1603_v48  ;;  %1069 = vmatprep.subr.bf16.mxu1 %v1604_v50  ;;  %v1672_v48 = vld [vmem:[%s2231_s1 + $0x170] ss:$12 sps:$4 sm:$0xff]  }
  0x2d   :  { %1110 = vmatprep.subr.bf16.mxu0 %v1606_v51  ;;  %v1673_v50 = vld [vmem:[%s2231_s1 + $0xb0] ss:$12 sps:$4 sm:$0xff]  }
  0x2e   :  { %v1676_v51 = vld [vmem:[%s2231_s1 + $0x3c4] ss:$12 sps:$4 sm:$0xff]  }
  0x2f   :  { %1070 = vmatpush1.bf16.msra.mxu1 %v1608_v52  ;;  %v1677_v52 = vld [vmem:[%s2231_s1 + $0x248] ss:$12 sps:$4 sm:$0xff]  }
  0x30   :  { %1111 = vmatpush1.bf16.msra.mxu0 %v1609_v54  ;;  %1071 = vmatprep.subr.bf16.mxu1 %v1610_v57  ;;  %v1678_v54 = vld [vmem:[%s2231_s1 + $0x188] ss:$12 sps:$4 sm:$0xff]   ;;  %v1679_v57 = vld [vmem:[%s2231_s1 + $0x3d8] ss:$12 sps:$4 sm:$0xff]  }
  0x31   :  { %1112 = vmatprep.subr.bf16.mxu0 %v1612_v58  ;;  %v1683_v58 = vld [vmem:[%s2231_s1 + $0x1a0] ss:$12 sps:$4 sm:$0xff]  }
  0x33   :  { %1072 = vmatpush1.bf16.msra.mxu1 %v1614_v61  ;;  %v1684_v61 = vld [vmem:[%s2231_s1 + $0x3f0] ss:$12 sps:$4 sm:$0xff]  }
  0x34   :  { %1113 = vmatpush1.bf16.msra.mxu0 %v1615_v62  ;;  %1073 = vmatprep.subr.bf16.mxu1 %v1616_v1  ;;  %v1688_v62 = vld [vmem:[%s2231_s1 + $0x1b8] ss:$12 sps:$4 sm:$0xff]   ;;  %v1692_v1 = vld [vmem:[%s2231_s1 + $0x290] ss:$12 sps:$4 sm:$0xff]  }
  0x35   :  { %1114 = vmatprep.subr.bf16.mxu0 %v1618_v2  ;;  %v1689_v2 = vld [vmem:[%s2231_s1 + $0x408] ss:$12 sps:$4 sm:$0xff]  }
  0x37   :  { %1074 = vmatpush1.bf16.msra.mxu1 %v1620_v4  ;;  %v1696_v4 = vld [vmem:[%s2231_s1 + $0x424] ss:$12 sps:$4 sm:$0xff]  }
  0x38   :  { %1115 = vmatpush1.bf16.msra.mxu0 %v1621_v5  ;;  %1075 = vmatprep.subr.bf16.mxu1 %v1622_v6  ;;  %v1697_v5 = vld [vmem:[%s2231_s1 + $0x2a8] ss:$12 sps:$4 sm:$0xff]   ;;  %v1694_v6 = vld [vmem:[%s2231_s1 + $0x420] ss:$12 sps:$4 sm:$0xff]  }
  0x39   :  { %1116 = vmatprep.subr.bf16.mxu0 %v1624_v7  ;;  %v1698_v7 = vld [vmem:[%s2231_s1 + $0x1e8] ss:$12 sps:$4 sm:$0xff]  }
  0x3b   :  { %1076 = vmatpush1.bf16.msra.mxu1 %v1626_v8  ;;  %v1701_v8 = vld [vmem:[%s2231_s1 + $0x43c] ss:$12 sps:$4 sm:$0xff]  }
  0x3c   :  { %1117 = vmatpush1.bf16.msra.mxu0 %v1627_v9  ;;  %1077 = vmatprep.subr.bf16.mxu1 %v1628_v10  ;;  %v1702_v9 = vld [vmem:[%s2231_s1 + $0x2c0] ss:$12 sps:$4 sm:$0xff]   ;;  %v1699_v10 = vld [vmem:[%s2231_s1 + $0x438] ss:$12 sps:$4 sm:$0xff]  }
  0x3d   :  { %1118 = vmatprep.subr.bf16.mxu0 %v1630_v11  ;;  %v1703_v11 = vld [vmem:[%s2231_s1 + $0x200] ss:$12 sps:$4 sm:$0xff]  }
  0x3f   :  { %1078 = vmatpush1.bf16.msra.mxu1 %v1632_v12  ;;  %v1706_v12 = vld [vmem:[%s2231_s1 + $0x454] ss:$12 sps:$4 sm:$0xff]  }
  0x40   :  { %1119 = vmatpush1.bf16.msra.mxu0 %v1633_v14  ;;  %1462 = vmatprep.subr.bf16.mxu1 %v1637_v16  ;;  %v1704_v14 = vld [vmem:[%s2231_s1 + $0x450] ss:$12 sps:$4 sm:$0xff]   ;;  %v1711_v16 = vld [vmem:[%s2231_s1 + $0x46c] ss:$12 sps:$4 sm:$0xff]  }
  0x41   :  { %1129 = vmatprep.subr.bf16.mxu0 %v1636_v15  ;;  %v1708_v15 = vld [vmem:[%s2231_s1 + $0x218] ss:$12 sps:$4 sm:$0xff]  }
  0x42   :  { %1080 = vmatmul.mubr.bf16.vlgmr.msra.gmra.mrb[0].mxu1 %v1960_v13 }
  0x43   :  { %1121 = vmatmul.mubr.bf16.vlgmr.msra.gmra.mrb[0].mxu0 %v1976_v19  ;;  %1463 = vmatpush3.bf16.msra.mxu1 %v1638_v20  ;;  %v1713_v20 = vld [vmem:[%s2231_s1 + $0x230] ss:$12 sps:$4 sm:$0xff]  }
  0x44   :  { %1130 = vmatpush1.bf16.msra.mxu0 %v1634_v17  ;;  %1464 = vmatprep.subr.bf16.mxu1 %v1642_v22  ;;  %v1712_v17 = vld [vmem:[%s2231_s1 + $0x2f0] ss:$12 sps:$4 sm:$0xff]   ;;  %v1716_v22 = vld [vmem:[%s2231_s1 + $0x308] ss:$12 sps:$4 sm:$0xff]  }
  0x45   :  { %1131 = vmatprep.subr.bf16.mxu0 %v1641_v21  ;;  %1202 = vmatprep.mubr.bf16.mxu1 %v263_v63  ;;  %v1691_v63 = vld [vmem:[%s2231_s1 + $0x40c] ss:$12 sps:$4 sm:$0xff]   ;;  %v1715_v21 = vld [vmem:[%s2231_s1 + $0x3c8] ss:$12 sps:$4 sm:$0xff]  }
  0x46   :  { %1161 = vmatprep.mubr.bf16.mxu0 %v1988_v23 }
  0x47   :  { %1465 = vmatpush3.bf16.msra.mxu1 %v1643_v25  ;;  %v1718_v25 = vld [vmem:[%s2231_s1 + $0x320] ss:$12 sps:$4 sm:$0xff]  }
  0x48   :  { %1132 = vmatpush1.bf16.msra.mxu0 %v1639_v24  ;;  %1466 = vmatprep.subr.bf16.mxu1 %v1647_v27  ;;  %v1717_v24 = vld [vmem:[%s2231_s1 + $0x3e0] ss:$12 sps:$4 sm:$0xff]   ;;  %v1720_v27 = vld [vmem:[%s2231_s1 + $0x338] ss:$12 sps:$4 sm:$0xff]  }
  0x49   :  { %1133 = vmatprep.subr.bf16.mxu0 %v1646_v26  ;;  %v1719_v26 = vld [vmem:[%s2231_s1 + $0x3f8] ss:$12 sps:$4 sm:$0xff]  }
  0x4b   :  { %1467 = vmatpush3.bf16.msra.mxu1 %v1648_v29  ;;  %v1724_v29 = vld [vmem:[%s2231_s1 + $0x368] ss:$12 sps:$4 sm:$0xff]  }
  0x4c   :  { %1134 = vmatpush1.bf16.msra.mxu0 %v1644_v28  ;;  %1468 = vmatprep.subr.bf16.mxu1 %v1652_v31  ;;  %v1723_v28 = vld [vmem:[%s2231_s1 + $0x428] ss:$12 sps:$4 sm:$0xff]   ;;  %v1726_v31 = vld [vmem:[%s2231_s1 + $0x380] ss:$12 sps:$4 sm:$0xff]  }
  0x4d   :  { %1135 = vmatprep.subr.bf16.mxu0 %v1651_v30  ;;  %v1725_v30 = vld [vmem:[%s2231_s1 + $0x440] ss:$12 sps:$4 sm:$0xff]  }
  0x4f   :  { %1469 = vmatpush3.bf16.msra.mxu1 %v1653_v33  ;;  %v1728_v33 = vld [vmem:[%s2231_s1 + $0x398] ss:$12 sps:$4 sm:$0xff]  }
  0x50   :  { %1136 = vmatpush1.bf16.msra.mxu0 %v1649_v32  ;;  %1470 = vmatprep.subr.bf16.mxu1 %v1657_v35  ;;  %v1727_v32 = vld [vmem:[%s2231_s1 + $0x458] ss:$12 sps:$4 sm:$0xff]   ;;  %v1730_v35 = vld [vmem:[%s2231_s1 + $0x3b0] ss:$12 sps:$4 sm:$0xff]  }
  0x51   :  { %1137 = vmatprep.subr.bf16.mxu0 %v1656_v34  ;;  %v1729_v34 = vld [vmem:[%s2231_s1 + $0x470] ss:$12 sps:$4 sm:$0xff]  }
  0x53   :  { %1471 = vmatpush3.bf16.msra.mxu1 %v1658_v37 }
  0x54   :  { %1138 = vmatpush1.bf16.msra.mxu0 %v1654_v36  ;;  %1472 = vmatprep.subr.bf16.mxu1 %v1662_v39 }
  0x55   :  { %1139 = vmatprep.subr.bf16.mxu0 %v1661_v38 }
  0x57   :  { %1473 = vmatpush3.bf16.msra.mxu1 %v1663_v41 }
  0x58   :  { %1140 = vmatpush1.bf16.msra.mxu0 %v1659_v40  ;;  %1474 = vmatprep.subr.bf16.mxu1 %v1667_v44 }
  0x59   :  { %1141 = vmatprep.subr.bf16.mxu0 %v1666_v43 }
  0x5b   :  { %1475 = vmatpush3.bf16.msra.mxu1 %v1668_v46  ;;  %v212_v46 = vsub.s32 0, %v1870_v42 }
  0x5c   :  { %1142 = vmatpush1.bf16.msra.mxu0 %v1664_v45  ;;  %1476 = vmatprep.subr.bf16.mxu1 %v1672_v48  ;;  %v216_v48 = vsub.s32 1, %v1870_v42 }
  0x5d   :  { %1143 = vmatprep.subr.bf16.mxu0 %v1671_v47  ;;  %v208_v47 = vld [vmem:[%s2233_s2] sm:$0x7] }
  0x5f   :  { %1477 = vmatpush3.bf16.msra.mxu1 %v1673_v50  ;;  %v217_v50 = vrot.slane %v208_v47, %v216_v48 }
  0x60   :  { %1144 = vmatpush1.bf16.msra.mxu0 %v1669_v49  ;;  %1484 = vmatprep.subr.bf16.mxu1 %v1677_v52  ;;  %v220_v49 = vsub.s32 2, %v1870_v42 }
  0x61   :  { %1145 = vmatprep.subr.bf16.mxu0 %v1676_v51 }
  0x62   :  { %1203 = vmatmul.mubr.bf16.vlgmr.msra.gmra.mrb[4].mxu1 %v1960_v13  ;;  %v1707_v13 = vld [vmem:[%s2231_s1 + $0x2d8] ss:$12 sps:$4 sm:$0xff]   ;;  %v221_v51 = vrot.slane %v208_v47, %v220_v49 }
  0x63   :  { %1485 = vmatpush3.bf16.msra.mxu1 %v1678_v54  ;;  %1242 = vmatprep.mubr.bf16.mxu1 %v1929_v3  ;;  %v1693_v3 = vld [vmem:[%s2231_s1 + $0x1d0] ss:$12 sps:$4 sm:$0xff]  }
  0x64   :  { %1146 = vmatpush1.bf16.msra.mxu0 %v1674_v53  ;;  %1486 = vmatprep.subr.bf16.mxu1 %v1682_v56 }
  0x65   :  { %1147 = vmatprep.subr.bf16.mxu0 %v1681_v55 }
  0x67   :  { %1487 = vmatpush3.bf16.msra.mxu1 %v1683_v58 }
  0x68   :  { %1148 = vmatpush1.bf16.msra.mxu0 %v1679_v57  ;;  %1488 = vmatprep.subr.bf16.mxu1 %v1687_v60 }
  0x69   :  { %1149 = vmatprep.subr.bf16.mxu0 %v1686_v59 }
  0x6b   :  { %1489 = vmatpush3.bf16.msra.mxu1 %v1688_v62 }
  0x6c   :  { %1150 = vmatpush1.bf16.msra.mxu0 %v1684_v61  ;;  %1490 = vmatprep.subr.bf16.mxu1 %v1692_v1 }
  0x6d   :  { %1151 = vmatprep.subr.bf16.mxu0 %v1691_v63 }
  0x6f   :  { %1491 = vmatpush3.bf16.msra.mxu1 %v1693_v3 }
  0x70   :  { %1152 = vmatpush1.bf16.msra.mxu0 %v1689_v2  ;;  %1492 = vmatprep.subr.bf16.mxu1 %v1697_v5 }
  0x71   :  { %1153 = vmatprep.subr.bf16.mxu0 %v1696_v4 }
  0x73   :  { %1493 = vmatpush3.bf16.msra.mxu1 %v1698_v7  ;;  %v1732_v7 = vmov 1983009808  }
  0x74   :  { %1154 = vmatpush1.bf16.msra.mxu0 %v1694_v6  ;;  %1494 = vmatprep.subr.bf16.mxu1 %v1702_v9 }
  0x75   :  { %1155 = vmatprep.subr.bf16.mxu0 %v1701_v8  ;;  %v1298_v8 = vunpack.c.l.s4 %v1732_v7 }
  0x77   :  { %1495 = vmatpush3.bf16.msra.mxu1 %v1703_v11  ;;  %v1299_v9 = vunpack.c.0.s8 %v1298_v8 }
  0x78   :  { %1156 = vmatpush1.bf16.msra.mxu0 %v1699_v10  ;;  %1496 = vmatprep.subr.bf16.mxu1 %v1707_v13 }
  0x79   :  { %1157 = vmatprep.subr.bf16.mxu0 %v1706_v12 }
  0x7b   :  { %1497 = vmatpush3.bf16.msra.mxu1 %v1708_v15  ;;  %v1302_v15 = vsub.s32 %v1299_v9, %v1870_v42 }
  0x7c   :  { %1158 = vmatpush1.bf16.msra.mxu0 %v1704_v14  ;;  %1498 = vmatprep.subr.bf16.mxu1 %v1712_v17 }
  0x7d   :  { %1159 = vmatprep.subr.bf16.mxu0 %v1711_v16 }
  0x7f   :  { %1499 = vmatpush3.bf16.msra.mxu1 %v1713_v20 }
  0x80   :  { %1160 = vmatpush1.bf16.msra.mxu0 %v1709_v18  ;;  %1506 = vmatprep.subr.bf16.mxu1 %v1715_v21 }
  0x82   :  { %1243 = vmatmul.mubr.bf16.vlgmr.msra.gmra.mrb[8].mxu1 %v1976_v19  ;;  %v1721_v19 = vld [vmem:[%s2231_s1 + $0x410] ss:$12 sps:$4 sm:$0xff]  }
  0x83   :  { %1162 = vmatmul.mubr.bf16.vlgmr.msra.gmra.mrb[0].mxu0 %v1921_v0  ;;  %1507 = vmatpush3.bf16.msra.mxu1 %v1716_v22 }
  0x84   :  { %1282 = vmatprep.mubr.bf16.mxu1 %v1988_v23  ;;  %1508 = vmatprep.subr.bf16.mxu1 %v1717_v24  ;;  %v1722_v23 = vld [vmem:[%s2231_s1 + $0x350] ss:$12 sps:$4 sm:$0xff]  }
  0x87   :  { %1509 = vmatpush3.bf16.msra.mxu1 %v1718_v25 }
  0x88   :  { %1510 = vmatprep.subr.bf16.mxu1 %v1719_v26 }
  0x8b   :  { %1511 = vmatpush3.bf16.msra.mxu1 %v1720_v27 }
  0x8c   :  { %1512 = vmatprep.subr.bf16.mxu1 %v1721_v19 }
  0x8f   :  { %1513 = vmatpush3.bf16.msra.mxu1 %v1722_v23 }
  0x90   :  { %1514 = vmatprep.subr.bf16.mxu1 %v1723_v28 }
  0x93   :  { %1515 = vmatpush3.bf16.msra.mxu1 %v1724_v29 }
  0x94   :  { %1516 = vmatprep.subr.bf16.mxu1 %v1725_v30 }
  0x97   :  { %1517 = vmatpush3.bf16.msra.mxu1 %v1726_v31 }
  0x98   :  { %1518 = vmatprep.subr.bf16.mxu1 %v1727_v32 }
  0x9b   :  { %1519 = vmatpush3.bf16.msra.mxu1 %v1728_v33 }
  0x9c   :  { %1520 = vmatprep.subr.bf16.mxu1 %v1729_v34 }
  0x9f   :  { %1521 = vmatpush3.bf16.msra.mxu1 %v1730_v35 }
  0xa2   :  { %1283 = vmatmul.mubr.bf16.vlgmr.msra.gmra.mrb[12].mxu1 %v1921_v0  ;;  %v213_v0 = vrot.slane %v208_v47, %v212_v46 }
 0x115   :  { %v1081_v36 = vpop.f32.mrb[0].mxu1 }
 0x116   :  { %v1083_v37 = vpop.f32.mrb[1].mxu1  ;;  %v1082_v52 = vadd.f32 %v1081_v36, %v213_v0 }
 0x117   :  { %v1085_v38 = vpop.f32.mrb[2].mxu1  ;;  %v1084_v53 = vadd.f32 %v1083_v37, %v217_v50 }
 0x118   :  { %v1086_v39 = vpop.f32.mrb[3].mxu1 }
 0x135   :  { %v1478_v40 = vpop.f32.mrb[4].mxu1 }
 0x136   :  { %v1479_v41 = vpop.f32.mrb[5].mxu1 }
 0x137   :  { %v1480_v43 = vadd.f32 %v1479_v41, %v1478_v40  ;;  %v1481_v44 = vpop.f32.mrb[6].mxu1 }
 0x138   :  { %v1482_v45 = vpop.f32.mrb[7].mxu1 }
 0x139   :  { %v1205_v59 = vadd.f32 %v1480_v43, %v221_v51 }
 0x155   :  { %v1500_v55 = vpop.f32.mrb[8].mxu1 }
 0x156   :  { %v1163_v54 = vpop.f32.mrb[0].mxu0  ;;  %v1501_v58 = vpop.f32.mrb[9].mxu1 }
 0x157   :  { %v1529_v56 = vadd.f32 %v1163_v54, %v1082_v52  ;;  %v1165_v57 = vpop.f32.mrb[1].mxu0  ;;  %v1502_v61 = vadd.f32 %v1501_v58, %v1500_v55  ;;  %v1503_v63 = vpop.f32.mrb[10].mxu1 }
 0x158   :  { %v1531_v60 = vadd.f32 %v1165_v57, %v1084_v53  ;;  %v1167_v62 = vpop.f32.mrb[2].mxu0  ;;  %v1504_v3 = vpop.f32.mrb[11].mxu1 }
 0x159   :  { %v1290_v1 = vmax.f32 %v1529_v56, 0.0  ;;  %v1168_v2 = vpop.f32.mrb[3].mxu0  ;;  %v1245_v5 = vadd.f32 %v1502_v61, %v1205_v59 }
 0x15a   :  { %v1291_v4 = vmax.f32 %v1531_v60, 0.0 }
 0x15c   :  { %v1296_v6 = vcombine.low %v1290_v1, %v1291_v4 }
 0x15e   :  { %v1303_v18 = vrot.slane %v1296_v6, %v1302_v15 }
 0x175   :  { %v1522_v10 = vpop.f32.mrb[12].mxu1 }
 0x176   :  { %v1523_v11 = vpop.f32.mrb[13].mxu1 }
 0x177   :  { %v1524_v12 = vadd.f32 %v1523_v11, %v1522_v10  ;;  %v1525_v13 = vpop.f32.mrb[14].mxu1 }
 0x178   :  { %v1526_v14 = vpop.f32.mrb[15].mxu1 }
 0x179   :  { %v1285_v16 = vadd.f32 %v1524_v12, %v1245_v5 }
 0x17b   :  { %v1292_v17 = vmax.f32 %v1285_v16, 0.0 }
 0x17d   :  { %v1310_v20 = vrot.slane %v1292_v17, %v1302_v15 }
 0x17f   :  { %v1311_v21 = vcombine.low %v1303_v18, %v1310_v20 }
 0x181   :  { %1313 = vst [vmem:[%s2234_s3] sm:$0x3f] %v1311_v21 }

// kernel: conv_model_forward.13
= control target key start
LH: loop header
LB: loop body
LE: loop exit
PB: predicated region body
PF: predicated region fallthrough
CT: control target
= control target key end

     0   :  { %vm100_vm0 = vcmask 785408   ;;  %s512_s0 = inlined_call_operand.vmem [shape: bf16[32,96], index: 0, kind: input, shape index: {}]   ;;  %s513_s1 = inlined_call_operand.vmem [shape: bf16[32,96], index: 1, kind: input, shape index: {}]   ;;  %s514_s2 = inlined_call_operand.vmem [shape: bf16[96,96], index: 2, kind: input, shape index: {}]   ;;  %s515_s3 = inlined_call_operand.vmem [shape: bf16[96,96], index: 3, kind: input, shape index: {}]   ;;  %s516_s4 = inlined_call_operand.vmem [shape: f32[1,96], index: 4, kind: input, shape index: {}]   ;;  %s517_s5 = inlined_call_operand.hbm [shape: f32[32,96], index: 5, kind: output, shape index: {}]  }
   0x1   :  { %v368_v0 = vld [vmem:[%s515_s3] sm:$0xff]   ;;  %v370_v2 = vld [vmem:[%s515_s3 + $0x8] sm:$0xff]   ;;  %v372_v4 = vld [vmem:[%s515_s3 + $0x10] sm:$0xff]  }
   0x2   :  { %v369_v1 = vld [vmem:[%s514_s2] sm:$0xff]   ;;  %329 = vmatprep.subr.bf16.mxu1 %v368_v0  ;;  %v371_v3 = vld [vmem:[%s514_s2 + $0x8] sm:$0xff]   ;;  %v373_v5 = vld [vmem:[%s514_s2 + $0x10] sm:$0xff]  }
   0x3   :  { %345 = vmatprep.subr.bf16.mxu0 %v369_v1  ;;  %330 = vmatpush3.bf16.msra.mxu1 %v368_v0  ;;  %v374_v6 = vld [vmem:[%s515_s3 + $0x18] sm:$0xff]   ;;  %v376_v8 = vld [vmem:[%s515_s3 + $0x20] sm:$0xff]   ;;  %v378_v12 = vld [vmem:[%s515_s3 + $0x28] sm:$0xff]  }
   0x4   :  { %346 = vmatpush3.bf16.msra.mxu0 %v369_v1  ;;  %331 = vmatprep.subr.bf16.mxu1 %v370_v2  ;;  %v375_v7 = vld [vmem:[%s514_s2 + $0x18] sm:$0xff]   ;;  %v377_v9 = vld [vmem:[%s514_s2 + $0x20] sm:$0xff]  }
   0x5   :  { %347 = vmatprep.subr.bf16.mxu0 %v371_v3  ;;  %v380_v10 = vld [vmem:[%s513_s1] sm:$0xff]  }
   0x6   :  { %v381_v11 = vld [vmem:[%s512_s0] sm:$0xff]   ;;  %341 = vmatprep.mubr.msk.bf16.mxu1 %vm100_vm0, %v380_v10 }
   0x7   :  { %332 = vmatpush3.bf16.msra.mxu1 %v370_v2  ;;  %357 = vmatprep.mubr.msk.bf16.mxu0 %vm100_vm0, %v381_v11 }
   0x8   :  { %348 = vmatpush3.bf16.msra.mxu0 %v371_v3  ;;  %333 = vmatprep.subr.bf16.mxu1 %v372_v4 }
   0x9   :  { %349 = vmatprep.subr.bf16.mxu0 %v373_v5 }
   0xb   :  { %334 = vmatpush3.bf16.msra.mxu1 %v372_v4 }
   0xc   :  { %350 = vmatpush3.bf16.msra.mxu0 %v373_v5  ;;  %335 = vmatprep.subr.bf16.mxu1 %v374_v6 }
   0xd   :  { %351 = vmatprep.subr.bf16.mxu0 %v375_v7 }
   0xf   :  { %336 = vmatpush3.bf16.msra.mxu1 %v374_v6 }
  0x10   :  { %352 = vmatpush3.bf16.msra.mxu0 %v375_v7  ;;  %337 = vmatprep.subr.bf16.mxu1 %v376_v8 }
  0x11   :  { %10 = vsyncpa [#allocation3], 0  ;;  %353 = vmatprep.subr.bf16.mxu0 %v377_v9  ;;  %v379_v13 = vld [vmem:[%s514_s2 + $0x28] sm:$0xff]   ;;  %v312_v18 = vld [vmem:[%s516_s4] ss:$0 sm:$0xff] }
  0x12   :  { %v382_v14 = vld [vmem:[%s513_s1 + $0x8] sm:$0xff]  }
  0x13   :  { %338 = vmatpush3.bf16.msra.mxu1 %v376_v8  ;;  %v383_v15 = vld [vmem:[%s512_s0 + $0x8] sm:$0xff]   ;;  %s408_s0 = smov [#allocation2]  }
  0x14   :  { %354 = vmatpush3.bf16.msra.mxu0 %v377_v9  ;;  %339 = vmatprep.subr.bf16.mxu1 %v378_v12  ;;  %s281_s1 = sshll.u32 %s408_s0, 4  ;;  %s282_s1 = int_to_ptr.vmem [resolvable:$true] %s281_s1 }
  0x15   :  { %355 = vmatprep.subr.bf16.mxu0 %v379_v13  ;;  %s384_s4 = scalar_lea.vmem %s282_s1, 512  ;;  %p389_p1 = scmp.lt.s32.totalorder %s282_s1, %s282_s1 }
  0x16   :  { %p385_p0 = scmp.ne.s32.totalorder %s282_s1, %s384_s4  ;;  %p390_p2 = scmp.lt.s32.totalorder %s384_s4, %s384_s4 }
  0x17   :  { %340 = vmatpush3.bf16.msra.mxu1 %v378_v12 }
  0x18   :  { %356 = vmatpush3.bf16.msra.mxu0 %v379_v13  ;;  %p391_p3 = por %p390_p2, %p389_p1 }
  0x1a   :  { %342 = vmatmul.mubr.msk.bf16.vlgmr.msra.gmra.mrb[0].mxu1 %vm100_vm0, %v382_v14  ;;  %p392_p4 = pnand %p391_p3, %p385_p0 }
  0x1b   :  { %358 = vmatmul.mubr.msk.bf16.vlgmr.msra.gmra.mrb[0].mxu0 %vm100_vm0, %v383_v15 }
  0xed   :  { %v343_v16 = vpop.f32.mrb[0].mxu1 }
  0xee   :  { %v359_v17 = vpop.f32.mrb[0].mxu0  ;;  %v141_v19 = vpop.f32.mrb[1].mxu1 }
  0xef   :  { %v251_v20 = vadd.f32 %v359_v17, %v343_v16  ;;  %v242_v21 = vpop.f32.mrb[1].mxu0  ;;  %v344_v22 = vpop.f32.mrb[2].mxu1 }
  0xf0   :  { %v243_v23 = vadd.f32 %v242_v21, %v141_v19  ;;  %v360_v24 = vpop.f32.mrb[2].mxu0  ;;  %v144_v25 = vpop.f32.mrb[3].mxu1 }
  0xf1   :  { %v266_v26 = vadd.f32 %v312_v18, %v251_v20  ;;  %v254_v27 = vadd.f32 %v360_v24, %v344_v22  ;;  %v245_v28 = vpop.f32.mrb[3].mxu0 }
  0xf2   :  { %v264_v29 = vadd.f32 %v312_v18, %v243_v23  ;;  %v246_v30 = vadd.f32 %v245_v28, %v144_v25 }
  0xf3   :  { %v270_v31 = vmax.f32 %v266_v26, 0.0  ;;  %v267_v32 = vadd.f32 %v312_v18, %v254_v27 }
  0xf4   :  { %v268_v33 = vmax.f32 %v264_v29, 0.0  ;;  %v265_v34 = vadd.f32 %v312_v18, %v246_v30 }
  0xf5   :  { %274 = vst.msk [vmem:[#allocation2 + $0x10] sm:$0xff] %vm100_vm0, %v270_v31  ;;  %v271_v35 = vmax.f32 %v267_v32, 0.0 }
  0xf6   :  { %272 = vst.msk [vmem:[#allocation2] sm:$0xff] %vm100_vm0, %v268_v33  ;;  %v269_v36 = vmax.f32 %v265_v34, 0.0 }
  0xf7   :  { %275 = vst.msk [vmem:[#allocation2 + $0x18] sm:$0xff] %vm100_vm0, %v271_v35 }
  0xf8   :  { %273 = vst.msk [vmem:[#allocation2 + $0x8] sm:$0xff] %vm100_vm0, %v269_v36 }
  0xf9   :  { %395 = shalt.err (!%p392_p4)
}
  0xfa   :  { %s396_s27 = scalar_lea.hbm %s517_s5, 512 }
  0xfb   :  { %p397_p5 = scmp.ne.s32.totalorder %s517_s5, %s396_s27  ;;  %p400_p6 = scmp.lt.u32.totalorder %s396_s27, %s517_s5 }
  0xfd   :  { %p402_p7 = pnand %p400_p6, %p397_p5 }
  0xff   :  { %405 = shalt.err (!%p402_p7)
}
 0x100   :  { %s409_s7 = smov 128   ;;  %s410_s8 = smov 8  }
 0x101   :  { %287 = dma.vmem_to_hbm [thread:$0]  %s282_s1, 512, %s517_s5, [#allocation3], %s409_s7, %s409_s7, %s410_s8  }
 0x102   :  { %406 = dma.done.wait [#allocation3], 512  }
 0x103   :  { %407 = vsyncadd [#allocation3], 4294966784 }
 0x104   :  { %291 = vsyncpa [#allocation3], 1 }

// kernel: conv_model_forward.15
= control target key start
LH: loop header
LB: loop body
LE: loop exit
PB: predicated region body
PF: predicated region fallthrough
CT: control target
= control target key end

     0   :  { %v1854_v1 = vmov 0   ;;  %v1855_v21 = vmov 1966171168   ;;  %v227_v23 = vlaneseq  ;;  %vm1857_vm0 = vmmov 0   ;;  %s2393_s3 = inlined_call_operand.vmem [shape: bf16[384,384], index: 3, kind: input, shape index: {}]   ;;  %s2394_s1 = inlined_call_operand.vmem [shape: bf16[2,384], index: 1, kind: input, shape index: {}]   ;;  %s2395_s2 = inlined_call_operand.vmem [shape: bf16[384,384], index: 2, kind: input, shape index: {}]   ;;  %s2396_s0 = inlined_call_operand.vmem [shape: bf16[2,384], index: 0, kind: input, shape index: {}]   ;;  %s2397_s4 = inlined_call_operand.vmem [shape: f32[1,384], index: 4, kind: input, shape index: {}]   ;;  %s2398_s5 = inlined_call_operand.vmem [shape: f32[2,384], index: 5, kind: output, shape index: {}]  }
   0x1   :  { %v1662_v0 = vld [vmem:[%s2393_s3 + $0x4] ss:$12 sps:$4 sm:$0xff]   ;;  %699 = vmatprep.mubr.bf16.mxu1 %v1854_v1  ;;  %v1666_v3 = vld [vmem:[%s2393_s3] ss:$12 sps:$4 sm:$0xff]   ;;  %v1668_v5 = vld [vmem:[%s2393_s3 + $0x1c] ss:$12 sps:$4 sm:$0xff]   ;;  %v225_v22 = vunpack.c.l.s4 %v1855_v21 }
   0x2   :  { %v1664_v2 = vld [vmem:[%s2393_s3 + $0x184] ss:$12 sps:$4 sm:$0xff]   ;;  %626 = vmatprep.subr.bf16.mxu0 %v1662_v0  ;;  %v1667_v4 = vld [vmem:[%s2393_s3 + $0x180] ss:$12 sps:$4 sm:$0xff]   ;;  %v1670_v6 = vld [vmem:[%s2393_s3 + $0x19c] ss:$12 sps:$4 sm:$0xff]  }
   0x3   :  { %667 = vmatprep.subr.bf16.mxu1 %v1664_v2  ;;  %627 = vmatpush1.bf16.msra.mxu0 %v1666_v3  ;;  %v1672_v7 = vld [vmem:[%s2393_s3 + $0x18] ss:$12 sps:$4 sm:$0xff]   ;;  %v1674_v9 = vld [vmem:[%s2393_s3 + $0x34] ss:$12 sps:$4 sm:$0xff]   ;;  %v1678_v11 = vld [vmem:[%s2393_s3 + $0x30] ss:$12 sps:$4 sm:$0xff]   ;;  %v226_v27 = vunpack.c.0.s8 %v225_v22 }
   0x4   :  { %668 = vmatpush1.bf16.msra.mxu1 %v1667_v4  ;;  %628 = vmatprep.subr.bf16.mxu0 %v1668_v5  ;;  %v1673_v8 = vld [vmem:[%s2393_s3 + $0x198] ss:$12 sps:$4 sm:$0xff]   ;;  %v1676_v10 = vld [vmem:[%s2393_s3 + $0x1b4] ss:$12 sps:$4 sm:$0xff]   ;;  %v1679_v12 = vld [vmem:[%s2393_s3 + $0x1b0] ss:$12 sps:$4 sm:$0xff]  }
   0x5   :  { %669 = vmatprep.subr.bf16.mxu1 %v1670_v6  ;;  %v1680_v13 = vld [vmem:[%s2393_s3 + $0x4c] ss:$12 sps:$4 sm:$0xff]   ;;  %v1684_v15 = vld [vmem:[%s2393_s3 + $0x48] ss:$12 sps:$4 sm:$0xff]   ;;  %v1686_v17 = vld [vmem:[%s2393_s3 + $0x64] ss:$12 sps:$4 sm:$0xff]  }
   0x6   :  { %v1682_v14 = vld [vmem:[%s2393_s3 + $0x1cc] ss:$12 sps:$4 sm:$0xff]   ;;  %v1685_v16 = vld [vmem:[%s2393_s3 + $0x1c8] ss:$12 sps:$4 sm:$0xff]   ;;  %v1688_v18 = vld [vmem:[%s2393_s3 + $0x1e4] ss:$12 sps:$4 sm:$0xff]  }
   0x7   :  { %629 = vmatpush1.bf16.msra.mxu0 %v1672_v7  ;;  %v1690_v19 = vld [vmem:[%s2393_s3 + $0x60] ss:$12 sps:$4 sm:$0xff]   ;;  %v1692_v24 = vld [vmem:[%s2393_s3 + $0x7c] ss:$12 sps:$4 sm:$0xff]   ;;  %v1696_v26 = vld [vmem:[%s2393_s3 + $0x78] ss:$12 sps:$4 sm:$0xff]  }
   0x8   :  { %670 = vmatpush1.bf16.msra.mxu1 %v1673_v8  ;;  %630 = vmatprep.subr.bf16.mxu0 %v1674_v9  ;;  %v1691_v20 = vld [vmem:[%s2393_s3 + $0x1e0] ss:$12 sps:$4 sm:$0xff]   ;;  %v1694_v25 = vld [vmem:[%s2393_s3 + $0x1fc] ss:$12 sps:$4 sm:$0xff]   ;;  %v1959_v28 = vshrl.u32 %v227_v23, 7 }
   0x9   :  { %671 = vmatprep.subr.bf16.mxu1 %v1676_v10  ;;  %v1697_v29 = vld [vmem:[%s2393_s3 + $0x1f8] ss:$12 sps:$4 sm:$0xff]   ;;  %v1698_v30 = vld [vmem:[%s2393_s3 + $0x94] ss:$12 sps:$4 sm:$0xff]   ;;  %v1702_v32 = vld [vmem:[%s2393_s3 + $0x90] ss:$12 sps:$4 sm:$0xff]  }
   0xa   :  { %v1700_v31 = vld [vmem:[%s2393_s3 + $0x214] ss:$12 sps:$4 sm:$0xff]   ;;  %v1703_v33 = vld [vmem:[%s2393_s3 + $0x210] ss:$12 sps:$4 sm:$0xff]   ;;  %v1704_v34 = vld [vmem:[%s2393_s3 + $0xac] ss:$12 sps:$4 sm:$0xff]   ;;  %v1980_v35 = vsub.s32 %v226_v27, %v1959_v28 }
   0xb   :  { %631 = vmatpush1.bf16.msra.mxu0 %v1678_v11  ;;  %v1409_v36 = vld.sshfl [vmem:[%s2394_s1] sm:$0x13 pattern:$0x75316420]  ;;  %v1706_v37 = vld [vmem:[%s2393_s3 + $0x22c] ss:$12 sps:$4 sm:$0xff]  }
   0xc   :  { %672 = vmatpush1.bf16.msra.mxu1 %v1679_v12  ;;  %632 = vmatprep.subr.bf16.mxu0 %v1680_v13  ;;  %v223_v38 = vcombine.high %v1409_v36, %v1409_v36  ;;  %v1708_v39 = vld [vmem:[%s2393_s3 + $0xa8] ss:$12 sps:$4 sm:$0xff]   ;;  %v1995_v41 = vrot.slane %v1409_v36, %v1980_v35  ;;  %v1710_v43 = vld [vmem:[%s2393_s3 + $0xc4] ss:$12 sps:$4 sm:$0xff]   ;;  %v1713_v45 = vld [vmem:[%s2393_s3 + $0xc0] ss:$12 sps:$4 sm:$0xff]  }
   0xd   :  { %673 = vmatprep.subr.bf16.mxu1 %v1682_v14  ;;  %v1709_v40 = vld [vmem:[%s2393_s3 + $0x228] ss:$12 sps:$4 sm:$0xff]   ;;  %v1717_v49 = vld [vmem:[%s2393_s3 + $0xe0] ss:$12 sps:$4 sm:$0xff]   ;;  %v1718_v50 = vld [vmem:[%s2393_s3 + $0xd8] ss:$12 sps:$4 sm:$0xff]  }
   0xe   :  { %v237_v42 = vrot.slane %v223_v38, %v1980_v35  ;;  %v1712_v44 = vld [vmem:[%s2393_s3 + $0xc8] ss:$12 sps:$4 sm:$0xff]   ;;  %v2009_v46 = vcombine.high %v1995_v41, %v1995_v41  ;;  %v1719_v51 = vld [vmem:[%s2393_s3 + $0x20] ss:$12 sps:$4 sm:$0xff]   ;;  %v1722_v53 = vld [vmem:[%s2393_s3 + $0xf8] ss:$12 sps:$4 sm:$0xff]  }
   0xf   :  { %633 = vmatpush1.bf16.msra.mxu0 %v1684_v15  ;;  %v1714_v47 = vld [vmem:[%s2393_s3 + $0x8] ss:$12 sps:$4 sm:$0xff]   ;;  %v1723_v54 = vld [vmem:[%s2393_s3 + $0xf0] ss:$12 sps:$4 sm:$0xff]   ;;  %v1724_v55 = vld [vmem:[%s2393_s3 + $0x38] ss:$12 sps:$4 sm:$0xff]  }
  0x10   :  { %674 = vmatpush1.bf16.msra.mxu1 %v1685_v16  ;;  %634 = vmatprep.subr.bf16.mxu0 %v1686_v17  ;;  %v1715_v48 = vld [vmem:[%s2393_s3 + $0xdc] ss:$12 sps:$4 sm:$0xff]   ;;  %v1720_v52 = vld [vmem:[%s2393_s3 + $0xf4] ss:$12 sps:$4 sm:$0xff]   ;;  %v1725_v56 = vld [vmem:[%s2393_s3 + $0x10c] ss:$12 sps:$4 sm:$0xff]  }
  0x11   :  { %675 = vmatprep.subr.bf16.mxu1 %v1688_v18  ;;  %658 = vmatprep.mubr.bf16.mxu0 %v237_v42  ;;  %v1727_v57 = vld [vmem:[%s2393_s3 + $0x110] ss:$12 sps:$4 sm:$0xff]   ;;  %v1728_v58 = vld [vmem:[%s2393_s3 + $0x108] ss:$12 sps:$4 sm:$0xff]   ;;  %v1733_v62 = vld [vmem:[%s2393_s3 + $0x120] ss:$12 sps:$4 sm:$0xff]  }
  0x12   :  { %v1729_v59 = vld [vmem:[%s2393_s3 + $0x50] ss:$12 sps:$4 sm:$0xff]   ;;  %v1732_v61 = vld [vmem:[%s2393_s3 + $0x128] ss:$12 sps:$4 sm:$0xff]   ;;  %v1737_v2 = vld [vmem:[%s2393_s3 + $0x140] ss:$12 sps:$4 sm:$0xff]  }
  0x13   :  { %635 = vmatpush1.bf16.msra.mxu0 %v1690_v19  ;;  %v1730_v60 = vld [vmem:[%s2393_s3 + $0x124] ss:$12 sps:$4 sm:$0xff]   ;;  %v1734_v63 = vld [vmem:[%s2393_s3 + $0x68] ss:$12 sps:$4 sm:$0xff]   ;;  %v1739_v4 = vld [vmem:[%s2393_s3 + $0x80] ss:$12 sps:$4 sm:$0xff]  }
  0x14   :  { %676 = vmatpush1.bf16.msra.mxu1 %v1691_v20  ;;  %636 = vmatprep.subr.bf16.mxu0 %v1692_v24  ;;  %v1735_v0 = vld [vmem:[%s2393_s3 + $0x13c] ss:$12 sps:$4 sm:$0xff]   ;;  %v1738_v3 = vld [vmem:[%s2393_s3 + $0x138] ss:$12 sps:$4 sm:$0xff]   ;;  %v1740_v5 = vld [vmem:[%s2393_s3 + $0x154] ss:$12 sps:$4 sm:$0xff]  }
  0x15   :  { %677 = vmatprep.subr.bf16.mxu1 %v1694_v25  ;;  %v1742_v6 = vld [vmem:[%s2393_s3 + $0x158] ss:$12 sps:$4 sm:$0xff]   ;;  %v1743_v7 = vld [vmem:[%s2393_s3 + $0x150] ss:$12 sps:$4 sm:$0xff]   ;;  %v1748_v11 = vld [vmem:[%s2393_s3 + $0x168] ss:$12 sps:$4 sm:$0xff]  }
  0x16   :  { %v1744_v8 = vld [vmem:[%s2393_s3 + $0x98] ss:$12 sps:$4 sm:$0xff]   ;;  %v1747_v10 = vld [vmem:[%s2393_s3 + $0x170] ss:$12 sps:$4 sm:$0xff]   ;;  %v1750_v14 = vld [vmem:[%s2395_s2] ss:$12 sps:$4 sm:$0xff]  }
  0x17   :  { %637 = vmatpush1.bf16.msra.mxu0 %v1696_v26  ;;  %v1745_v9 = vld [vmem:[%s2393_s3 + $0x16c] ss:$12 sps:$4 sm:$0xff]   ;;  %v1749_v12 = vld [vmem:[%s2393_s3 + $0xb0] ss:$12 sps:$4 sm:$0xff]   ;;  %v1753_v15 = vld [vmem:[%s2393_s3 + $0x188] ss:$12 sps:$4 sm:$0xff]  }
  0x18   :  { %678 = vmatpush1.bf16.msra.mxu1 %v1697_v29  ;;  %638 = vmatprep.subr.bf16.mxu0 %v1698_v30  ;;  %v1752_v13 = vld [vmem:[%s2395_s2 + $0x4] ss:$12 sps:$4 sm:$0xff]   ;;  %v1856_v16 = vmov 0.0   ;;  %v1756_v17 = vld [vmem:[%s2395_s2 + $0x1c] ss:$12 sps:$4 sm:$0xff]  }
  0x19   :  { %679 = vmatprep.subr.bf16.mxu1 %v1700_v31  ;;  %v1754_v18 = vld [vmem:[%s2395_s2 + $0x18] ss:$12 sps:$4 sm:$0xff]   ;;  %v1757_v19 = vld [vmem:[%s2393_s3 + $0x1a0] ss:$12 sps:$4 sm:$0xff]   ;;  %v1758_v21 = vld [vmem:[%s2395_s2 + $0x30] ss:$12 sps:$4 sm:$0xff]  }
  0x1a   :  { %v1760_v20 = vld [vmem:[%s2395_s2 + $0x34] ss:$12 sps:$4 sm:$0xff]   ;;  %v1761_v22 = vld [vmem:[%s2393_s3 + $0x1b8] ss:$12 sps:$4 sm:$0xff]   ;;  %v1765_v25 = vld [vmem:[%s2393_s3 + $0x1d0] ss:$12 sps:$4 sm:$0xff]  }
  0x1b   :  { %639 = vmatpush1.bf16.msra.mxu0 %v1702_v32  ;;  %v1764_v23 = vld [vmem:[%s2395_s2 + $0x4c] ss:$12 sps:$4 sm:$0xff]   ;;  %v1762_v24 = vld [vmem:[%s2395_s2 + $0x48] ss:$12 sps:$4 sm:$0xff]   ;;  %v1768_v26 = vld [vmem:[%s2395_s2 + $0x64] ss:$12 sps:$4 sm:$0xff]  }
  0x1c   :  { %680 = vmatpush1.bf16.msra.mxu1 %v1703_v33  ;;  %640 = vmatprep.subr.bf16.mxu0 %v1704_v34  ;;  %v1766_v27 = vld [vmem:[%s2395_s2 + $0x60] ss:$12 sps:$4 sm:$0xff]   ;;  %v1769_v29 = vld [vmem:[%s2393_s3 + $0x1e8] ss:$12 sps:$4 sm:$0xff]   ;;  %v1770_v31 = vld [vmem:[%s2395_s2 + $0x78] ss:$12 sps:$4 sm:$0xff]  }
  0x1d   :  { %681 = vmatprep.subr.bf16.mxu1 %v1706_v37  ;;  %v1772_v30 = vld [vmem:[%s2395_s2 + $0x7c] ss:$12 sps:$4 sm:$0xff]   ;;  %v1773_v32 = vld [vmem:[%s2393_s3 + $0x200] ss:$12 sps:$4 sm:$0xff]   ;;  %v1777_v36 = vld [vmem:[%s2393_s3 + $0x218] ss:$12 sps:$4 sm:$0xff]  }
  0x1e   :  { %v1776_v33 = vld [vmem:[%s2395_s2 + $0x94] ss:$12 sps:$4 sm:$0xff]   ;;  %v1774_v34 = vld [vmem:[%s2395_s2 + $0x90] ss:$12 sps:$4 sm:$0xff]   ;;  %v1780_v37 = vld [vmem:[%s2395_s2 + $0xac] ss:$12 sps:$4 sm:$0xff]  }
  0x1f   :  { %641 = vmatpush1.bf16.msra.mxu0 %v1708_v39  ;;  %v2179_v38 = vld.sshfl [vmem:[%s2396_s0] sm:$0x13 pattern:$0x75316420]  ;;  %v1778_v39 = vld [vmem:[%s2395_s2 + $0xa8] ss:$12 sps:$4 sm:$0xff]  }
  0x20   :  { %682 = vmatpush1.bf16.msra.mxu1 %v1709_v40  ;;  %642 = vmatprep.subr.bf16.mxu0 %v1710_v43  ;;  %v796_v40 = vcombine.high %v2179_v38, %v2179_v38 }
  0x21   :  { %1555 = vmatprep.subr.bf16.mxu1 %v1712_v44  ;;  %v1787_v44 = vld [vmem:[%s2395_s2 + $0x184] ss:$12 sps:$4 sm:$0xff]  }
  0x22   :  { %v2193_v43 = vrot.slane %v796_v40, %v1980_v35 }
  0x23   :  { %700 = vmatmul.mubr.bf16.vlgmr.msra.gmra.mrb[0].mxu1 %v2009_v46  ;;  %643 = vmatpush1.bf16.msra.mxu0 %v1713_v45  ;;  %v1782_v45 = vld [vmem:[%s2395_s2 + $0xc0] ss:$12 sps:$4 sm:$0xff]  }
  0x24   :  { %1556 = vmatpush3.bf16.msra.mxu1 %v1714_v47  ;;  %644 = vmatprep.subr.bf16.mxu0 %v1715_v48  ;;  %v1785_v47 = vld [vmem:[%s2395_s2 + $0x180] ss:$12 sps:$4 sm:$0xff]   ;;  %v1790_v48 = vld [vmem:[%s2395_s2 + $0xdc] ss:$12 sps:$4 sm:$0xff]  }
  0x25   :  { %1557 = vmatprep.subr.bf16.mxu1 %v1717_v49  ;;  %740 = vmatprep.mubr.bf16.mxu1 %v237_v42  ;;  %v1784_v42 = vld [vmem:[%s2395_s2 + $0xc4] ss:$12 sps:$4 sm:$0xff]   ;;  %v1793_v49 = vld [vmem:[%s2395_s2 + $0x19c] ss:$12 sps:$4 sm:$0xff]  }
  0x27   :  { %645 = vmatpush1.bf16.msra.mxu0 %v1718_v50  ;;  %v1788_v50 = vld [vmem:[%s2395_s2 + $0xd8] ss:$12 sps:$4 sm:$0xff]  }
  0x28   :  { %1558 = vmatpush3.bf16.msra.mxu1 %v1719_v51  ;;  %646 = vmatprep.subr.bf16.mxu0 %v1720_v52  ;;  %v1791_v51 = vld [vmem:[%s2395_s2 + $0x198] ss:$12 sps:$4 sm:$0xff]   ;;  %v1796_v52 = vld [vmem:[%s2395_s2 + $0xf4] ss:$12 sps:$4 sm:$0xff]  }
  0x29   :  { %1559 = vmatprep.subr.bf16.mxu1 %v1722_v53  ;;  %v1799_v53 = vld [vmem:[%s2395_s2 + $0x1b4] ss:$12 sps:$4 sm:$0xff]  }
  0x2b   :  { %647 = vmatpush1.bf16.msra.mxu0 %v1723_v54  ;;  %v1797_v54 = vld [vmem:[%s2395_s2 + $0x1b0] ss:$12 sps:$4 sm:$0xff]  }
  0x2c   :  { %1560 = vmatpush3.bf16.msra.mxu1 %v1724_v55  ;;  %648 = vmatprep.subr.bf16.mxu0 %v1725_v56  ;;  %v1802_v55 = vld [vmem:[%s2395_s2 + $0x10c] ss:$12 sps:$4 sm:$0xff]  }
  0x2d   :  { %1561 = vmatprep.subr.bf16.mxu1 %v1727_v57  ;;  %v1805_v56 = vld [vmem:[%s2395_s2 + $0x1cc] ss:$12 sps:$4 sm:$0xff]   ;;  %v1803_v57 = vld [vmem:[%s2395_s2 + $0x1c8] ss:$12 sps:$4 sm:$0xff]  }
  0x2f   :  { %649 = vmatpush1.bf16.msra.mxu0 %v1728_v58  ;;  %v1808_v58 = vld [vmem:[%s2395_s2 + $0x124] ss:$12 sps:$4 sm:$0xff]  }
  0x30   :  { %1562 = vmatpush3.bf16.msra.mxu1 %v1729_v59  ;;  %650 = vmatprep.subr.bf16.mxu0 %v1730_v60  ;;  %v1811_v59 = vld [vmem:[%s2395_s2 + $0x1e4] ss:$12 sps:$4 sm:$0xff]   ;;  %v1806_v60 = vld [vmem:[%s2395_s2 + $0x120] ss:$12 sps:$4 sm:$0xff]  }
  0x31   :  { %1563 = vmatprep.subr.bf16.mxu1 %v1732_v61  ;;  %v1809_v61 = vld [vmem:[%s2395_s2 + $0x1e0] ss:$12 sps:$4 sm:$0xff]  }
  0x33   :  { %651 = vmatpush1.bf16.msra.mxu0 %v1733_v62  ;;  %v1814_v62 = vld [vmem:[%s2395_s2 + $0x13c] ss:$12 sps:$4 sm:$0xff]  }
  0x34   :  { %1564 = vmatpush3.bf16.msra.mxu1 %v1734_v63  ;;  %652 = vmatprep.subr.bf16.mxu0 %v1735_v0  ;;  %v1817_v63 = vld [vmem:[%s2395_s2 + $0x1fc] ss:$12 sps:$4 sm:$0xff]   ;;  %v1812_v0 = vld [vmem:[%s2395_s2 + $0x138] ss:$12 sps:$4 sm:$0xff]  }
  0x35   :  { %1565 = vmatprep.subr.bf16.mxu1 %v1737_v2  ;;  %v1815_v2 = vld [vmem:[%s2395_s2 + $0x1f8] ss:$12 sps:$4 sm:$0xff]  }
  0x37   :  { %653 = vmatpush1.bf16.msra.mxu0 %v1738_v3  ;;  %v1820_v3 = vld [vmem:[%s2395_s2 + $0x154] ss:$12 sps:$4 sm:$0xff]  }
  0x38   :  { %1566 = vmatpush3.bf16.msra.mxu1 %v1739_v4  ;;  %654 = vmatprep.subr.bf16.mxu0 %v1740_v5  ;;  %v1823_v4 = vld [vmem:[%s2395_s2 + $0x214] ss:$12 sps:$4 sm:$0xff]   ;;  %v1818_v5 = vld [vmem:[%s2395_s2 + $0x150] ss:$12 sps:$4 sm:$0xff]  }
  0x39   :  { %1567 = vmatprep.subr.bf16.mxu1 %v1742_v6  ;;  %v1821_v6 = vld [vmem:[%s2395_s2 + $0x210] ss:$12 sps:$4 sm:$0xff]  }
  0x3b   :  { %655 = vmatpush1.bf16.msra.mxu0 %v1743_v7  ;;  %v1826_v7 = vld [vmem:[%s2395_s2 + $0x16c] ss:$12 sps:$4 sm:$0xff]  }
  0x3c   :  { %1568 = vmatpush3.bf16.msra.mxu1 %v1744_v8  ;;  %656 = vmatprep.subr.bf16.mxu0 %v1745_v9  ;;  %v1829_v8 = vld [vmem:[%s2395_s2 + $0x22c] ss:$12 sps:$4 sm:$0xff]   ;;  %v2288_v9 = vrot.slane %v2179_v38, %v1980_v35  ;;  %v1853_v38 = vld [vmem:[%s2395_s2 + $0x230] ss:$12 sps:$4 sm:$0xff]  }
  0x3d   :  { %1569 = vmatprep.subr.bf16.mxu1 %v1747_v10  ;;  %v1824_v10 = vld [vmem:[%s2395_s2 + $0x168] ss:$12 sps:$4 sm:$0xff]  }
  0x3e   :  { %v811_v35 = vcombine.high %v2288_v9, %v2288_v9 }
  0x3f   :  { %657 = vmatpush1.bf16.msra.mxu0 %v1748_v11  ;;  %v1827_v11 = vld [vmem:[%s2395_s2 + $0x228] ss:$12 sps:$4 sm:$0xff]  }
  0x40   :  { %1570 = vmatpush3.bf16.msra.mxu1 %v1749_v12  ;;  %1617 = vmatprep.subr.bf16.mxu0 %v1856_v16  ;;  %v1830_v12 = vld [vmem:[%s2395_s2 + $0xc8] ss:$12 sps:$4 sm:$0xff]  }
  0x41   :  { %1199 = vmatprep.subr.bf16.mxu1 %v1752_v13  ;;  %v1831_v13 = vld [vmem:[%s2395_s2 + $0x8] ss:$12 sps:$4 sm:$0xff]  }
  0x42   :  { %659 = vmatmul.mubr.bf16.vlgmr.msra.gmra.mrb[0].mxu0 %v1995_v41 }
  0x43   :  { %741 = vmatmul.mubr.bf16.vlgmr.msra.gmra.mrb[4].mxu1 %v1995_v41  ;;  %1618 = vmatpush3.bf16.msra.mxu0 %v1753_v15  ;;  %v1781_v41 = vld [vmem:[%s2393_s3 + $0x230] ss:$12 sps:$4 sm:$0xff]   ;;  %v1833_v15 = vld [vmem:[%s2395_s2 + $0xe0] ss:$12 sps:$4 sm:$0xff]  }
  0x44   :  { %1200 = vmatpush1.bf16.msra.mxu1 %v1750_v14  ;;  %1619 = vmatprep.subr.bf16.mxu0 %v1856_v16  ;;  %v1832_v14 = vld [vmem:[%s2395_s2 + $0x188] ss:$12 sps:$4 sm:$0xff]  }
  0x45   :  { %1201 = vmatprep.subr.bf16.mxu1 %v1756_v17  ;;  %1633 = vmatprep.mubr.msk.bf16.mxu0 %vm1857_vm0, %v1856_v16  ;;  %v1834_v17 = vld [vmem:[%s2395_s2 + $0x20] ss:$12 sps:$4 sm:$0xff]  }
  0x46   :  { %1231 = vmatprep.mubr.bf16.mxu1 %v2193_v43 }
  0x47   :  { %1620 = vmatpush3.bf16.msra.mxu0 %v1757_v19  ;;  %v1836_v19 = vld [vmem:[%s2395_s2 + $0xf8] ss:$12 sps:$4 sm:$0xff]  }
  0x48   :  { %1202 = vmatpush1.bf16.msra.mxu1 %v1754_v18  ;;  %1621 = vmatprep.subr.bf16.mxu0 %v1856_v16  ;;  %v1835_v18 = vld [vmem:[%s2395_s2 + $0x1a0] ss:$12 sps:$4 sm:$0xff]  }
  0x49   :  { %1203 = vmatprep.subr.bf16.mxu1 %v1760_v20  ;;  %v1837_v20 = vld [vmem:[%s2395_s2 + $0x38] ss:$12 sps:$4 sm:$0xff]  }
  0x4b   :  { %1622 = vmatpush3.bf16.msra.mxu0 %v1761_v22  ;;  %v1839_v22 = vld [vmem:[%s2395_s2 + $0x110] ss:$12 sps:$4 sm:$0xff]  }
  0x4c   :  { %1204 = vmatpush1.bf16.msra.mxu1 %v1758_v21  ;;  %1623 = vmatprep.subr.bf16.mxu0 %v1856_v16  ;;  %v1838_v21 = vld [vmem:[%s2395_s2 + $0x1b8] ss:$12 sps:$4 sm:$0xff]  }
  0x4d   :  { %1205 = vmatprep.subr.bf16.mxu1 %v1764_v23  ;;  %v1840_v23 = vld [vmem:[%s2395_s2 + $0x50] ss:$12 sps:$4 sm:$0xff]  }
  0x4f   :  { %1624 = vmatpush3.bf16.msra.mxu0 %v1765_v25  ;;  %v1842_v25 = vld [vmem:[%s2395_s2 + $0x128] ss:$12 sps:$4 sm:$0xff]  }
  0x50   :  { %1206 = vmatpush1.bf16.msra.mxu1 %v1762_v24  ;;  %1625 = vmatprep.subr.bf16.mxu0 %v1856_v16  ;;  %v1841_v24 = vld [vmem:[%s2395_s2 + $0x1d0] ss:$12 sps:$4 sm:$0xff]  }
  0x51   :  { %1207 = vmatprep.subr.bf16.mxu1 %v1768_v26  ;;  %v1843_v26 = vld [vmem:[%s2395_s2 + $0x68] ss:$12 sps:$4 sm:$0xff]  }
  0x53   :  { %1626 = vmatpush3.bf16.msra.mxu0 %v1769_v29  ;;  %v1845_v29 = vld [vmem:[%s2395_s2 + $0x140] ss:$12 sps:$4 sm:$0xff]  }
  0x54   :  { %1208 = vmatpush1.bf16.msra.mxu1 %v1766_v27  ;;  %1627 = vmatprep.subr.bf16.mxu0 %v1856_v16  ;;  %v1844_v27 = vld [vmem:[%s2395_s2 + $0x1e8] ss:$12 sps:$4 sm:$0xff]  }
  0x55   :  { %1209 = vmatprep.subr.bf16.mxu1 %v1772_v30  ;;  %v1846_v30 = vld [vmem:[%s2395_s2 + $0x80] ss:$12 sps:$4 sm:$0xff]  }
  0x57   :  { %1628 = vmatpush3.bf16.msra.mxu0 %v1773_v32  ;;  %v1848_v32 = vld [vmem:[%s2395_s2 + $0x158] ss:$12 sps:$4 sm:$0xff]  }
  0x58   :  { %1210 = vmatpush1.bf16.msra.mxu1 %v1770_v31  ;;  %1629 = vmatprep.subr.bf16.mxu0 %v1856_v16  ;;  %v1847_v31 = vld [vmem:[%s2395_s2 + $0x200] ss:$12 sps:$4 sm:$0xff]  }
  0x59   :  { %1211 = vmatprep.subr.bf16.mxu1 %v1776_v33  ;;  %v1849_v33 = vld [vmem:[%s2395_s2 + $0x98] ss:$12 sps:$4 sm:$0xff]  }
  0x5b   :  { %1630 = vmatpush3.bf16.msra.mxu0 %v1777_v36  ;;  %v1851_v36 = vld [vmem:[%s2395_s2 + $0x170] ss:$12 sps:$4 sm:$0xff]  }
  0x5c   :  { %1212 = vmatpush1.bf16.msra.mxu1 %v1774_v34  ;;  %1631 = vmatprep.subr.bf16.mxu0 %v1856_v16  ;;  %v1850_v34 = vld [vmem:[%s2395_s2 + $0x218] ss:$12 sps:$4 sm:$0xff]  }
  0x5d   :  { %1213 = vmatprep.subr.bf16.mxu1 %v1780_v37  ;;  %v1852_v37 = vld [vmem:[%s2395_s2 + $0xb0] ss:$12 sps:$4 sm:$0xff]  }
  0x5f   :  { %1632 = vmatpush3.bf16.msra.mxu0 %v1781_v41 }
  0x60   :  { %1214 = vmatpush1.bf16.msra.mxu1 %v1778_v39  ;;  %1240 = vmatprep.subr.bf16.mxu0 %v1787_v44 }
  0x61   :  { %1215 = vmatprep.subr.bf16.mxu1 %v1784_v42 }
  0x62   :  { %1634 = vmatmul.mubr.bf16.vlgmr.msra.gmra.mrb[4].mxu0 %v2009_v46  ;;  %v1794_v46 = vld [vmem:[%s2395_s2 + $0xf0] ss:$12 sps:$4 sm:$0xff]  }
  0x63   :  { %1241 = vmatpush1.bf16.msra.mxu0 %v1785_v47  ;;  %1272 = vmatprep.mubr.bf16.mxu0 %v1854_v1  ;;  %v1800_v1 = vld [vmem:[%s2395_s2 + $0x108] ss:$12 sps:$4 sm:$0xff]  }
  0x64   :  { %1216 = vmatpush1.bf16.msra.mxu1 %v1782_v45  ;;  %1242 = vmatprep.subr.bf16.mxu0 %v1793_v49 }
  0x65   :  { %1217 = vmatprep.subr.bf16.mxu1 %v1790_v48 }
  0x67   :  { %1243 = vmatpush1.bf16.msra.mxu0 %v1791_v51 }
  0x68   :  { %1218 = vmatpush1.bf16.msra.mxu1 %v1788_v50  ;;  %1244 = vmatprep.subr.bf16.mxu0 %v1799_v53 }
  0x69   :  { %1219 = vmatprep.subr.bf16.mxu1 %v1796_v52 }
  0x6b   :  { %1245 = vmatpush1.bf16.msra.mxu0 %v1797_v54 }
  0x6c   :  { %1220 = vmatpush1.bf16.msra.mxu1 %v1794_v46  ;;  %1246 = vmatprep.subr.bf16.mxu0 %v1805_v56 }
  0x6d   :  { %1221 = vmatprep.subr.bf16.mxu1 %v1802_v55 }
  0x6f   :  { %1247 = vmatpush1.bf16.msra.mxu0 %v1803_v57  ;;  %v1365_v57 = vsub.s32 0, %v1959_v28 }
  0x70   :  { %1222 = vmatpush1.bf16.msra.mxu1 %v1800_v1  ;;  %1248 = vmatprep.subr.bf16.mxu0 %v1811_v59  ;;  %v1369_v59 = vsub.s32 1, %v1959_v28 }
  0x71   :  { %1223 = vmatprep.subr.bf16.mxu1 %v1808_v58  ;;  %v1361_v58 = vld [vmem:[%s2397_s4] sm:$0x7] }
  0x73   :  { %1249 = vmatpush1.bf16.msra.mxu0 %v1809_v61 }
  0x74   :  { %1224 = vmatpush1.bf16.msra.mxu1 %v1806_v60  ;;  %1250 = vmatprep.subr.bf16.mxu0 %v1817_v63  ;;  %v1366_v63 = vrot.slane %v1361_v58, %v1365_v57 }
  0x75   :  { %1225 = vmatprep.subr.bf16.mxu1 %v1814_v62 }
  0x77   :  { %1251 = vmatpush1.bf16.msra.mxu0 %v1815_v2 }
  0x78   :  { %1226 = vmatpush1.bf16.msra.mxu1 %v1812_v0  ;;  %1252 = vmatprep.subr.bf16.mxu0 %v1823_v4  ;;  %v1370_v4 = vrot.slane %v1361_v58, %v1369_v59 }
  0x79   :  { %1227 = vmatprep.subr.bf16.mxu1 %v1820_v3 }
  0x7b   :  { %1253 = vmatpush1.bf16.msra.mxu0 %v1821_v6 }
  0x7c   :  { %1228 = vmatpush1.bf16.msra.mxu1 %v1818_v5  ;;  %1254 = vmatprep.subr.bf16.mxu0 %v1829_v8 }
  0x7d   :  { %1229 = vmatprep.subr.bf16.mxu1 %v1826_v7 }
  0x7f   :  { %1255 = vmatpush1.bf16.msra.mxu0 %v1827_v11 }
  0x80   :  { %1230 = vmatpush1.bf16.msra.mxu1 %v1824_v10  ;;  %1586 = vmatprep.subr.bf16.mxu0 %v1830_v12 }
  0x81   :  { %1637 = vmatprep.subr.bf16.mxu1 %v1856_v16 }
  0x82   :  { %1273 = vmatmul.mubr.bf16.vlgmr.msra.gmra.mrb[8].mxu0 %v811_v35 }
  0x83   :  { %1232 = vmatmul.mubr.bf16.vlgmr.msra.gmra.mrb[8].mxu1 %v2288_v9  ;;  %1587 = vmatpush3.bf16.msra.mxu0 %v1831_v13 }
  0x84   :  { %1638 = vmatpush3.bf16.msra.mxu1 %v1832_v14  ;;  %1588 = vmatprep.subr.bf16.mxu0 %v1833_v15  ;;  %v1858_v15 = vmov 1983009808  }
  0x85   :  { %1639 = vmatprep.subr.bf16.mxu1 %v1856_v16  ;;  %1313 = vmatprep.mubr.bf16.mxu0 %v2193_v43 }
  0x86   :  { %1653 = vmatprep.mubr.msk.bf16.mxu1 %vm1857_vm0, %v1856_v16 }
  0x87   :  { %1589 = vmatpush3.bf16.msra.mxu0 %v1834_v17  ;;  %v1389_v17 = vunpack.c.l.s4 %v1858_v15 }
  0x88   :  { %1640 = vmatpush3.bf16.msra.mxu1 %v1835_v18  ;;  %1590 = vmatprep.subr.bf16.mxu0 %v1836_v19 }
  0x89   :  { %1641 = vmatprep.subr.bf16.mxu1 %v1856_v16 }
  0x8b   :  { %1591 = vmatpush3.bf16.msra.mxu0 %v1837_v20  ;;  %v1373_v20 = vsub.s32 2, %v1959_v28 }
  0x8c   :  { %1642 = vmatpush3.bf16.msra.mxu1 %v1838_v21  ;;  %1592 = vmatprep.subr.bf16.mxu0 %v1839_v22 }
  0x8d   :  { %1643 = vmatprep.subr.bf16.mxu1 %v1856_v16 }
  0x8f   :  { %1593 = vmatpush3.bf16.msra.mxu0 %v1840_v23 }
  0x90   :  { %1644 = vmatpush3.bf16.msra.mxu1 %v1841_v24  ;;  %1594 = vmatprep.subr.bf16.mxu0 %v1842_v25 }
  0x91   :  { %1645 = vmatprep.subr.bf16.mxu1 %v1856_v16 }
  0x93   :  { %1595 = vmatpush3.bf16.msra.mxu0 %v1843_v26 }
  0x94   :  { %1646 = vmatpush3.bf16.msra.mxu1 %v1844_v27  ;;  %1596 = vmatprep.subr.bf16.mxu0 %v1845_v29  ;;  %v1390_v29 = vunpack.c.0.s8 %v1389_v17 }
  0x95   :  { %1647 = vmatprep.subr.bf16.mxu1 %v1856_v16 }
  0x97   :  { %1597 = vmatpush3.bf16.msra.mxu0 %v1846_v30 }
  0x98   :  { %1648 = vmatpush3.bf16.msra.mxu1 %v1847_v31  ;;  %1598 = vmatprep.subr.bf16.mxu0 %v1848_v32  ;;  %v1374_v31 = vrot.slane %v1361_v58, %v1373_v20 }
  0x99   :  { %1649 = vmatprep.subr.bf16.mxu1 %v1856_v16 }
  0x9b   :  { %1599 = vmatpush3.bf16.msra.mxu0 %v1849_v33  ;;  %v1393_v33 = vsub.s32 %v1390_v29, %v1959_v28 }
  0x9c   :  { %1650 = vmatpush3.bf16.msra.mxu1 %v1850_v34  ;;  %1600 = vmatprep.subr.bf16.mxu0 %v1851_v36 }
  0x9d   :  { %1651 = vmatprep.subr.bf16.mxu1 %v1856_v16 }
  0x9f   :  { %1601 = vmatpush3.bf16.msra.mxu0 %v1852_v37 }
  0xa0   :  { %1652 = vmatpush3.bf16.msra.mxu1 %v1853_v38 }
  0xa2   :  { %1314 = vmatmul.mubr.bf16.vlgmr.msra.gmra.mrb[12].mxu0 %v2288_v9 }
  0xa3   :  { %1654 = vmatmul.mubr.bf16.vlgmr.msra.gmra.mrb[12].mxu1 %v811_v35 }
  0xf6   :  { %v701_v39 = vpop.f32.mrb[0].mxu1 }
  0xf7   :  { %v703_v40 = vpop.f32.mrb[1].mxu1 }
  0xf8   :  { %v705_v41 = vpop.f32.mrb[2].mxu1 }
  0xf9   :  { %v706_v42 = vpop.f32.mrb[3].mxu1 }
 0x115   :  { %v660_v43 = vpop.f32.mrb[0].mxu0 }
 0x116   :  { %v1571_v44 = vpop.f32.mrb[4].mxu1  ;;  %v702_v45 = vadd.f32 %v701_v39, %v660_v43  ;;  %v662_v47 = vpop.f32.mrb[1].mxu0 }
 0x117   :  { %v1572_v48 = vpop.f32.mrb[5].mxu1  ;;  %v704_v49 = vadd.f32 %v703_v40, %v662_v47  ;;  %v664_v50 = vpop.f32.mrb[2].mxu0 }
 0x118   :  { %v1573_v51 = vadd.f32 %v1572_v48, %v1571_v44  ;;  %v1574_v52 = vpop.f32.mrb[6].mxu1  ;;  %v665_v53 = vpop.f32.mrb[3].mxu0 }
 0x119   :  { %v1575_v16 = vpop.f32.mrb[7].mxu1 }
 0x135   :  { %v782_v46 = vpop.f32.mrb[4].mxu0 }
 0x136   :  { %v783_v54 = vadd.f32 %v1573_v51, %v782_v46  ;;  %v1635_v55 = vpop.f32.mrb[5].mxu0 }
 0x137   :  { %v785_v56 = vpop.f32.mrb[6].mxu0 }
 0x138   :  { %v1636_v1 = vpop.f32.mrb[7].mxu0 }
 0x155   :  { %v1274_v61 = vpop.f32.mrb[8].mxu0 }
 0x156   :  { %v1233_v60 = vpop.f32.mrb[8].mxu1  ;;  %v1276_v2 = vpop.f32.mrb[9].mxu0 }
 0x157   :  { %v1234_v62 = vadd.f32 %v1233_v60, %v702_v45  ;;  %v1235_v0 = vpop.f32.mrb[9].mxu1  ;;  %v1278_v5 = vpop.f32.mrb[10].mxu0 }
 0x158   :  { %v1236_v3 = vadd.f32 %v1235_v0, %v704_v49  ;;  %v1237_v6 = vpop.f32.mrb[10].mxu1  ;;  %v1279_v8 = vpop.f32.mrb[11].mxu0 }
 0x159   :  { %v1275_v7 = vadd.f32 %v1274_v61, %v1234_v62  ;;  %v1238_v9 = vpop.f32.mrb[11].mxu1 }
 0x15a   :  { %v1277_v10 = vadd.f32 %v1276_v2, %v1236_v3 }
 0x15b   :  { %v1378_v11 = vadd.f32 %v1366_v63, %v1275_v7 }
 0x15c   :  { %v1379_v12 = vadd.f32 %v1370_v4, %v1277_v10 }
 0x15d   :  { %v1381_v35 = vmax.f32 %v1378_v11, 0.0 }
 0x15e   :  { %v1382_v13 = vmax.f32 %v1379_v12, 0.0 }
 0x160   :  { %v1387_v14 = vcombine.low %v1381_v35, %v1382_v13 }
 0x162   :  { %v1394_v37 = vrot.slane %v1387_v14, %v1393_v33 }
 0x175   :  { %v1602_v18 = vpop.f32.mrb[12].mxu0 }
 0x176   :  { %v1355_v19 = vpop.f32.mrb[12].mxu1  ;;  %v1603_v21 = vpop.f32.mrb[13].mxu0 }
 0x177   :  { %v1655_v22 = vpop.f32.mrb[13].mxu1  ;;  %v1604_v23 = vadd.f32 %v1603_v21, %v1602_v18  ;;  %v1605_v24 = vpop.f32.mrb[14].mxu0 }
 0x178   :  { %v1358_v25 = vpop.f32.mrb[14].mxu1  ;;  %v1606_v26 = vpop.f32.mrb[15].mxu0 }
 0x179   :  { %v1656_v27 = vpop.f32.mrb[15].mxu1  ;;  %v1316_v30 = vadd.f32 %v1604_v23, %v783_v54 }
 0x17b   :  { %v1356_v32 = vadd.f32 %v1355_v19, %v1316_v30 }
 0x17d   :  { %v1380_v34 = vadd.f32 %v1374_v31, %v1356_v32 }
 0x17f   :  { %v1383_v36 = vmax.f32 %v1380_v34, 0.0 }
 0x181   :  { %v1401_v38 = vrot.slane %v1383_v36, %v1393_v33 }
 0x183   :  { %v1402_v39 = vcombine.low %v1394_v37, %v1401_v38 }
 0x185   :  { %1404 = vst [vmem:[%s2398_s5] sm:$0x3f] %v1402_v39 }

// kernel: conv_model_forward.12
= control target key start
LH: loop header
LB: loop body
LE: loop exit
PB: predicated region body
PF: predicated region fallthrough
CT: control target
= control target key end

     0   :  { %vm124_vm0 = vcmask 392192   ;;  %s830_s0 = inlined_call_operand.vmem [shape: bf16[128,48], index: 0, kind: input, shape index: {}]   ;;  %s831_s1 = inlined_call_operand.vmem [shape: bf16[128,48], index: 1, kind: input, shape index: {}]   ;;  %s832_s2 = inlined_call_operand.vmem [shape: bf16[48,48], index: 2, kind: input, shape index: {}]   ;;  %s833_s3 = inlined_call_operand.vmem [shape: bf16[48,48], index: 3, kind: input, shape index: {}]   ;;  %s834_s4 = inlined_call_operand.vmem [shape: f32[1,48], index: 4, kind: input, shape index: {}]   ;;  %s835_s5 = inlined_call_operand.hbm [shape: f32[128,48], index: 5, kind: output, shape index: {}]  }
   0x1   :  { %v620_v0 = vld [vmem:[%s833_s3] sm:$0xff]   ;;  %v622_v2 = vld [vmem:[%s833_s3 + $0x8] sm:$0xff]   ;;  %v624_v4 = vld [vmem:[%s833_s3 + $0x10] sm:$0xff]  }
   0x2   :  { %v621_v1 = vld [vmem:[%s832_s2] sm:$0xff]   ;;  %557 = vmatprep.subr.bf16.mxu1 %v620_v0  ;;  %v623_v3 = vld [vmem:[%s832_s2 + $0x8] sm:$0xff]   ;;  %v625_v5 = vld [vmem:[%s832_s2 + $0x10] sm:$0xff]  }
   0x3   :  { %579 = vmatprep.subr.bf16.mxu0 %v621_v1  ;;  %558 = vmatpush3.bf16.msra.mxu1 %v620_v0  ;;  %v626_v6 = vld [vmem:[%s831_s1] sm:$0xff]   ;;  %v628_v8 = vld [vmem:[%s831_s1 + $0x8] sm:$0xff]   ;;  %v630_v10 = vld [vmem:[%s831_s1 + $0x10] sm:$0xff]  }
   0x4   :  { %580 = vmatpush3.bf16.msra.mxu0 %v621_v1  ;;  %559 = vmatprep.subr.bf16.mxu1 %v622_v2  ;;  %v627_v7 = vld [vmem:[%s830_s0] sm:$0xff]   ;;  %v629_v9 = vld [vmem:[%s830_s0 + $0x8] sm:$0xff]   ;;  %v631_v11 = vld [vmem:[%s830_s0 + $0x10] sm:$0xff]  }
   0x5   :  { %581 = vmatprep.subr.bf16.mxu0 %v623_v3  ;;  %563 = vmatprep.mubr.msk.bf16.mxu1 %vm124_vm0, %v626_v6  ;;  %v632_v12 = vld [vmem:[%s831_s1 + $0x18] sm:$0xff]   ;;  %v634_v14 = vld [vmem:[%s831_s1 + $0x20] sm:$0xff]  }
   0x6   :  { %585 = vmatprep.mubr.msk.bf16.mxu0 %vm124_vm0, %v627_v7  ;;  %v633_v13 = vld [vmem:[%s830_s0 + $0x18] sm:$0xff]   ;;  %v635_v15 = vld [vmem:[%s830_s0 + $0x20] sm:$0xff]  }
   0x7   :  { %560 = vmatpush3.bf16.msra.mxu1 %v622_v2 }
   0x8   :  { %582 = vmatpush3.bf16.msra.mxu0 %v623_v3  ;;  %561 = vmatprep.subr.bf16.mxu1 %v624_v4 }
   0x9   :  { %583 = vmatprep.subr.bf16.mxu0 %v625_v5 }
   0xb   :  { %562 = vmatpush3.bf16.msra.mxu1 %v624_v4 }
   0xc   :  { %584 = vmatpush3.bf16.msra.mxu0 %v625_v5 }
   0xe   :  { %564 = vmatmul.mubr.msk.bf16.vlgmr.msra.gmra.mrb[0].mxu1 %vm124_vm0, %v628_v8 }
   0xf   :  { %586 = vmatmul.mubr.msk.bf16.vlgmr.msra.gmra.mrb[0].mxu0 %vm124_vm0, %v629_v9  ;;  %567 = vmatprep.mubr.msk.bf16.mxu1 %vm124_vm0, %v630_v10 }
  0x10   :  { %589 = vmatprep.mubr.msk.bf16.mxu0 %vm124_vm0, %v631_v11 }
  0x16   :  { %568 = vmatmul.mubr.msk.bf16.gmra.mrb[4].mxu1 %vm124_vm0, %v632_v12 }
  0x17   :  { %10 = vsyncpa [#allocation3], 0  ;;  %590 = vmatmul.mubr.msk.bf16.gmra.mrb[4].mxu0 %vm124_vm0, %v633_v13  ;;  %571 = vmatprep.mubr.msk.bf16.mxu1 %vm124_vm0, %v634_v14  ;;  %v636_v16 = vld [vmem:[%s831_s1 + $0x28] sm:$0xff]   ;;  %v638_v18 = vld [vmem:[%s831_s1 + $0x30] sm:$0xff]  }
  0x18   :  { %593 = vmatprep.mubr.msk.bf16.mxu0 %vm124_vm0, %v635_v15  ;;  %v637_v17 = vld [vmem:[%s830_s0 + $0x28] sm:$0xff]   ;;  %v639_v19 = vld [vmem:[%s830_s0 + $0x30] sm:$0xff]   ;;  %v640_v20 = vld [vmem:[%s831_s1 + $0x38] sm:$0xff]  }
  0x19   :  { %v641_v21 = vld [vmem:[%s830_s0 + $0x38] sm:$0xff]   ;;  %v784_v24 = vld [vmem:[%s834_s4] ss:$0 sm:$0xff]  ;;  %s666_s0 = smov [#allocation2]  }
  0x1a   :  { %s485_s1 = sshll.u32 %s666_s0, 4  ;;  %s486_s1 = int_to_ptr.vmem [resolvable:$true] %s485_s1 }
  0x1b   :  { %s642_s4 = scalar_lea.vmem %s486_s1, 2048  ;;  %p647_p1 = scmp.lt.s32.totalorder %s486_s1, %s486_s1 }
  0x1c   :  { %p643_p0 = scmp.ne.s32.totalorder %s486_s1, %s642_s4  ;;  %p648_p2 = scmp.lt.s32.totalorder %s642_s4, %s642_s4 }
  0x1e   :  { %572 = vmatmul.mubr.msk.bf16.gmra.mrb[8].mxu1 %vm124_vm0, %v636_v16  ;;  %p649_p3 = por %p648_p2, %p647_p1 }
  0x1f   :  { %594 = vmatmul.mubr.msk.bf16.gmra.mrb[8].mxu0 %vm124_vm0, %v637_v17  ;;  %575 = vmatprep.mubr.msk.bf16.mxu1 %vm124_vm0, %v638_v18 }
  0x20   :  { %597 = vmatprep.mubr.msk.bf16.mxu0 %vm124_vm0, %v639_v19  ;;  %p650_p4 = pnand %p649_p3, %p643_p0 }
  0x26   :  { %576 = vmatmul.mubr.msk.bf16.gmra.mrb[12].mxu1 %vm124_vm0, %v640_v20 }
  0x27   :  { %598 = vmatmul.mubr.msk.bf16.gmra.mrb[12].mxu0 %vm124_vm0, %v641_v21 }
  0xe1   :  { %v565_v22 = vpop.f32.mrb[0].mxu1 }
  0xe2   :  { %v587_v23 = vpop.f32.mrb[0].mxu0  ;;  %v183_v25 = vpop.f32.mrb[1].mxu1 }
  0xe3   :  { %v371_v26 = vadd.f32 %v587_v23, %v565_v22  ;;  %v362_v27 = vpop.f32.mrb[1].mxu0  ;;  %v566_v28 = vpop.f32.mrb[2].mxu1 }
  0xe4   :  { %v363_v29 = vadd.f32 %v362_v27, %v183_v25  ;;  %v588_v30 = vpop.f32.mrb[2].mxu0  ;;  %v186_v31 = vpop.f32.mrb[3].mxu1 }
  0xe5   :  { %v434_v32 = vadd.f32 %v784_v24, %v371_v26  ;;  %v374_v33 = vadd.f32 %v588_v30, %v566_v28  ;;  %v365_v34 = vpop.f32.mrb[3].mxu0 }
  0xe6   :  { %v432_v35 = vadd.f32 %v784_v24, %v363_v29  ;;  %v366_v36 = vadd.f32 %v365_v34, %v186_v31 }
  0xe7   :  { %v450_v37 = vmax.f32 %v434_v32, 0.0  ;;  %v435_v38 = vadd.f32 %v784_v24, %v374_v33 }
  0xe8   :  { %v448_v39 = vmax.f32 %v432_v35, 0.0  ;;  %v433_v40 = vadd.f32 %v784_v24, %v366_v36 }
  0xe9   :  { %466 = vst.msk [vmem:[#allocation2 + $0x10] sm:$0xff] %vm124_vm0, %v450_v37  ;;  %v451_v41 = vmax.f32 %v435_v38, 0.0  ;;  %v569_v42 = vpop.f32.mrb[4].mxu1 }
  0xea   :  { %464 = vst.msk [vmem:[#allocation2] sm:$0xff] %vm124_vm0, %v448_v39  ;;  %v449_v43 = vmax.f32 %v433_v40, 0.0  ;;  %v591_v44 = vpop.f32.mrb[4].mxu0  ;;  %v199_v45 = vpop.f32.mrb[5].mxu1 }
  0xeb   :  { %467 = vst.msk [vmem:[#allocation2 + $0x18] sm:$0xff] %vm124_vm0, %v451_v41  ;;  %v387_v46 = vadd.f32 %v591_v44, %v569_v42  ;;  %v378_v47 = vpop.f32.mrb[5].mxu0  ;;  %v570_v48 = vpop.f32.mrb[6].mxu1 }
  0xec   :  { %465 = vst.msk [vmem:[#allocation2 + $0x8] sm:$0xff] %vm124_vm0, %v449_v43  ;;  %v379_v49 = vadd.f32 %v378_v47, %v199_v45  ;;  %v592_v50 = vpop.f32.mrb[6].mxu0  ;;  %v202_v51 = vpop.f32.mrb[7].mxu1 }
  0xed   :  { %v438_v52 = vadd.f32 %v784_v24, %v387_v46  ;;  %v390_v53 = vadd.f32 %v592_v50, %v570_v48  ;;  %v381_v54 = vpop.f32.mrb[7].mxu0 }
  0xee   :  { %v436_v55 = vadd.f32 %v784_v24, %v379_v49  ;;  %v382_v56 = vadd.f32 %v381_v54, %v202_v51 }
  0xef   :  { %v454_v57 = vmax.f32 %v438_v52, 0.0  ;;  %v439_v58 = vadd.f32 %v784_v24, %v390_v53 }
  0xf0   :  { %v452_v59 = vmax.f32 %v436_v55, 0.0  ;;  %v437_v60 = vadd.f32 %v784_v24, %v382_v56 }
  0xf1   :  { %470 = vst.msk [vmem:[#allocation2 + $0x30] sm:$0xff] %vm124_vm0, %v454_v57  ;;  %v455_v61 = vmax.f32 %v439_v58, 0.0  ;;  %v573_v62 = vpop.f32.mrb[8].mxu1 }
  0xf2   :  { %468 = vst.msk [vmem:[#allocation2 + $0x20] sm:$0xff] %vm124_vm0, %v452_v59  ;;  %v453_v63 = vmax.f32 %v437_v60, 0.0  ;;  %v595_v0 = vpop.f32.mrb[8].mxu0  ;;  %v215_v1 = vpop.f32.mrb[9].mxu1 }
  0xf3   :  { %471 = vst.msk [vmem:[#allocation2 + $0x38] sm:$0xff] %vm124_vm0, %v455_v61  ;;  %v403_v2 = vadd.f32 %v595_v0, %v573_v62  ;;  %v394_v3 = vpop.f32.mrb[9].mxu0  ;;  %v574_v4 = vpop.f32.mrb[10].mxu1 }
  0xf4   :  { %469 = vst.msk [vmem:[#allocation2 + $0x28] sm:$0xff] %vm124_vm0, %v453_v63  ;;  %v395_v5 = vadd.f32 %v394_v3, %v215_v1  ;;  %v596_v6 = vpop.f32.mrb[10].mxu0  ;;  %v218_v7 = vpop.f32.mrb[11].mxu1 }
  0xf5   :  { %v442_v8 = vadd.f32 %v784_v24, %v403_v2  ;;  %v406_v9 = vadd.f32 %v596_v6, %v574_v4  ;;  %v397_v10 = vpop.f32.mrb[11].mxu0 }
  0xf6   :  { %v440_v11 = vadd.f32 %v784_v24, %v395_v5  ;;  %v398_v12 = vadd.f32 %v397_v10, %v218_v7 }
  0xf7   :  { %v458_v13 = vmax.f32 %v442_v8, 0.0  ;;  %v443_v14 = vadd.f32 %v784_v24, %v406_v9 }
  0xf8   :  { %v456_v15 = vmax.f32 %v440_v11, 0.0  ;;  %v441_v16 = vadd.f32 %v784_v24, %v398_v12 }
  0xf9   :  { %474 = vst.msk [vmem:[#allocation2 + $0x50] sm:$0xff] %vm124_vm0, %v458_v13  ;;  %v459_v17 = vmax.f32 %v443_v14, 0.0  ;;  %v577_v18 = vpop.f32.mrb[12].mxu1 }
  0xfa   :  { %472 = vst.msk [vmem:[#allocation2 + $0x40] sm:$0xff] %vm124_vm0, %v456_v15  ;;  %v457_v19 = vmax.f32 %v441_v16, 0.0  ;;  %v599_v20 = vpop.f32.mrb[12].mxu0  ;;  %v231_v21 = vpop.f32.mrb[13].mxu1 }
  0xfb   :  { %475 = vst.msk [vmem:[#allocation2 + $0x58] sm:$0xff] %vm124_vm0, %v459_v17  ;;  %v419_v22 = vadd.f32 %v599_v20, %v577_v18  ;;  %v410_v23 = vpop.f32.mrb[13].mxu0  ;;  %v578_v25 = vpop.f32.mrb[14].mxu1 }
  0xfc   :  { %473 = vst.msk [vmem:[#allocation2 + $0x48] sm:$0xff] %vm124_vm0, %v457_v19  ;;  %v411_v26 = vadd.f32 %v410_v23, %v231_v21  ;;  %v600_v27 = vpop.f32.mrb[14].mxu0  ;;  %v234_v28 = vpop.f32.mrb[15].mxu1 }
  0xfd   :  { %v446_v29 = vadd.f32 %v784_v24, %v419_v22  ;;  %v422_v30 = vadd.f32 %v600_v27, %v578_v25  ;;  %v413_v31 = vpop.f32.mrb[15].mxu0 }
  0xfe   :  { %v444_v32 = vadd.f32 %v784_v24, %v411_v26  ;;  %v414_v33 = vadd.f32 %v413_v31, %v234_v28 }
  0xff   :  { %v462_v34 = vmax.f32 %v446_v29, 0.0  ;;  %v447_v35 = vadd.f32 %v784_v24, %v422_v30 }
 0x100   :  { %v460_v36 = vmax.f32 %v444_v32, 0.0  ;;  %v445_v37 = vadd.f32 %v784_v24, %v414_v33 }
 0x101   :  { %478 = vst.msk [vmem:[#allocation2 + $0x70] sm:$0xff] %vm124_vm0, %v462_v34  ;;  %v463_v38 = vmax.f32 %v447_v35, 0.0 }
 0x102   :  { %476 = vst.msk [vmem:[#allocation2 + $0x60] sm:$0xff] %vm124_vm0, %v460_v36  ;;  %v461_v39 = vmax.f32 %v445_v37, 0.0 }
 0x103   :  { %479 = vst.msk [vmem:[#allocation2 + $0x78] sm:$0xff] %vm124_vm0, %v463_v38 }
 0x104   :  { %477 = vst.msk [vmem:[#allocation2 + $0x68] sm:$0xff] %vm124_vm0, %v461_v39 }
 0x105   :  { %653 = shalt.err (!%p650_p4)
}
 0x106   :  { %s654_s12 = scalar_lea.hbm %s835_s5, 2048 }
 0x107   :  { %p655_p5 = scmp.ne.s32.totalorder %s835_s5, %s654_s12  ;;  %p658_p6 = scmp.lt.u32.totalorder %s654_s12, %s835_s5 }
 0x109   :  { %p660_p7 = pnand %p658_p6, %p655_p5 }
 0x10b   :  { %663 = shalt.err (!%p660_p7)
}
 0x10c   :  { %s667_s17 = smov 128   ;;  %s668_s18 = smov 8  }
 0x10d   :  { %491 = dma.vmem_to_hbm [thread:$0]  %s486_s1, 2048, %s835_s5, [#allocation3], %s667_s17, %s667_s17, %s668_s18  }
 0x10e   :  { %664 = dma.done.wait [#allocation3], 2048  }
 0x10f   :  { %665 = vsyncadd [#allocation3], 4294965248 }
 0x110   :  { %495 = vsyncpa [#allocation3], 1 }

</bundles_post_ra>
